<compile_context>
chip_gen: v7x
topology: tpu7x:2x2x1
jax: 0.10.0
libtpu: 0.0.40
codegen_flags: <defaults>
</compile_context>

<pallas_src>
import functools

import jax
import jax.numpy as jnp
from jax.experimental import pallas as pl
from jax.experimental.pallas import tpu as pltpu

LANE = 128  # TPU lane width; every channel dim is padded to this internally.


# ----------------------------------------------------------------------------
# Fused 3x3 conv (+ bias + optional residual skip + ReLU) kernel
# ----------------------------------------------------------------------------
def _conv3x3_kernel(x_ref, w_ref, b_ref, *rest, H, W, act, has_skip):
    if has_skip:
        skip_ref, o_ref = rest
    else:
        (o_ref,) = rest
    cin = x_ref.shape[-1]
    cout = o_ref.shape[-1]

    acc = jnp.zeros((H * W, cout), jnp.float32)
    # 9 shifted-slice matmuls accumulated in f32 — the im2col never touches HBM.
    for dy in range(3):
        for dx in range(3):
            patch = x_ref[0, dy:dy + H, dx:dx + W, :].reshape(H * W, cin)
            acc = acc + jnp.dot(patch.astype(jnp.bfloat16),
                                w_ref[dy * 3 + dx],
                                preferred_element_type=jnp.float32)

    y = acc + b_ref[...]                              # f32 epilogue
    if has_skip:
        y = y + skip_ref[0].reshape(H * W, cout)
    if act == "relu":
        y = jnp.maximum(y, 0.0)
    o_ref[0] = y.reshape(H, W, cout).astype(o_ref.dtype)


def conv3x3(x, w, b, skip=None, act="relu"):
    """x: (B,H,W,Cp) f32, w: (9,Cp,Cout) bf16, b: (1,Cout) f32, skip: (B,H,W,Cout) f32."""
    B, H, W, Cp = x.shape
    Cout = w.shape[-1]
    xp = jnp.pad(x, ((0, 0), (1, 1), (1, 1), (0, 0)))   # spatial halo pad only
    has_skip = skip is not None

    in_specs = [
        pl.BlockSpec((1, H + 2, W + 2, Cp), lambda bi: (bi, 0, 0, 0)),
        pl.BlockSpec((9, Cp, Cout), lambda bi: (0, 0, 0)),
        pl.BlockSpec((1, Cout), lambda bi: (0, 0)),
    ]
    args = [xp, w, b]
    if has_skip:
        in_specs.append(pl.BlockSpec((1, H, W, Cout), lambda bi: (bi, 0, 0, 0)))
        args.append(skip)

    bytes_accessed = (xp.size * 4 + w.size * 2 + b.size * 4 + B * H * W * Cout * 4
                      + (skip.size * 4 if has_skip else 0))

    return pl.pallas_call(
        functools.partial(_conv3x3_kernel, H=H, W=W, act=act, has_skip=has_skip),
        out_shape=jax.ShapeDtypeStruct((B, H, W, Cout), jnp.float32),
        grid=(B,),
        in_specs=in_specs,
        out_specs=pl.BlockSpec((1, H, W, Cout), lambda bi: (bi, 0, 0, 0)),
        compiler_params=pltpu.CompilerParams(
            dimension_semantics=("parallel",),
            vmem_limit_bytes=32 * 1024 * 1024),
        cost_estimate=pl.CostEstimate(
            flops=2 * B * H * W * 9 * Cp * Cout,
            transcendentals=0,
            bytes_accessed=bytes_accessed),
    )(*args)


# ----------------------------------------------------------------------------
# Global average pool: tiled spatial reduction with a VMEM accumulator
# ----------------------------------------------------------------------------
def _gap_kernel(x_ref, o_ref, acc_ref, *, inv_n):
    @pl.when(pl.program_id(0) == 0)
    def _():
        acc_ref[...] = jnp.zeros_like(acc_ref)

    acc_ref[...] += jnp.sum(x_ref[...], axis=1)

    @pl.when(pl.program_id(0) == pl.num_programs(0) - 1)
    def _():
        o_ref[...] = acc_ref[...] * inv_n


def global_avg_pool(x):
    B, H, W, Cp = x.shape
    S = H * W
    xs = x.reshape(B, S, Cp)
    ts = 128 if S % 128 == 0 else S
    nt = S // ts
    return pl.pallas_call(
        functools.partial(_gap_kernel, inv_n=1.0 / S),
        out_shape=jax.ShapeDtypeStruct((B, Cp), jnp.float32),
        grid=(nt,),
        in_specs=[pl.BlockSpec((B, ts, Cp), lambda s: (0, s, 0))],
        out_specs=pl.BlockSpec((B, Cp), lambda s: (0, 0)),
        scratch_shapes=[pltpu.VMEM((B, Cp), jnp.float32)],
        compiler_params=pltpu.CompilerParams(dimension_semantics=("arbitrary",)),
    )(xs)


# ----------------------------------------------------------------------------
# Fused 3-layer MLP projector (all weights fit VMEM trivially)
# ----------------------------------------------------------------------------
def _projector_kernel(h_ref, w1_ref, b1_ref, w2_ref, b2_ref, w3_ref, b3_ref, o_ref):
    z = jnp.dot(h_ref[...].astype(jnp.bfloat16), w1_ref[...],
                preferred_element_type=jnp.float32)
    z = jnp.maximum(z + b1_ref[...], 0.0)
    z = jnp.dot(z.astype(jnp.bfloat16), w2_ref[...],
                preferred_element_type=jnp.float32)
    z = jnp.maximum(z + b2_ref[...], 0.0)
    z = jnp.dot(z.astype(jnp.bfloat16), w3_ref[...],
                preferred_element_type=jnp.float32)
    o_ref[...] = z + b3_ref[...]


def projector(params, h_p):
    B, Cp = h_p.shape
    full2 = lambda: (0, 0)
    return pl.pallas_call(
        _projector_kernel,
        out_shape=jax.ShapeDtypeStruct((B, LANE), jnp.float32),
        in_specs=[
            pl.BlockSpec((B, Cp), full2),
            pl.BlockSpec((LANE, LANE), full2), pl.BlockSpec((1, LANE), full2),
            pl.BlockSpec((LANE, LANE), full2), pl.BlockSpec((1, LANE), full2),
            pl.BlockSpec((LANE, LANE), full2), pl.BlockSpec((1, LANE), full2),
        ],
        out_specs=pl.BlockSpec((B, LANE), full2),
    )(h_p, params["proj1_w"], params["proj1_b"],
      params["proj2_w"], params["proj2_b"],
      params["proj3_w"], params["proj3_b"])


# ----------------------------------------------------------------------------
# Model: scaled-down SimCLRv2 (encoder + 3-layer MLP projector)
# ----------------------------------------------------------------------------
def init_params(key, c_in=3, width=32, proj_hidden=32, proj_out=16):
    keys = jax.random.split(key, 6)

    def conv_p(k, cin, cout):
        w = jax.random.normal(k, (9, cin, cout), jnp.float32) / jnp.sqrt(9.0 * cin)
        wp = jnp.zeros((9, LANE, LANE), jnp.float32).at[:, :cin, :cout].set(w)
        return wp.astype(jnp.bfloat16), jnp.zeros((1, LANE), jnp.float32)

    def dense_p(k, fin, fout):
        w = jax.random.normal(k, (fin, fout), jnp.float32) / jnp.sqrt(float(fin))
        wp = jnp.zeros((LANE, LANE), jnp.float32).at[:fin, :fout].set(w)
        return wp.astype(jnp.bfloat16), jnp.zeros((1, LANE), jnp.float32)

    p = {}
    p["stem_w"], p["stem_b"] = conv_p(keys[0], c_in, width)
    p["blk1_w"], p["blk1_b"] = conv_p(keys[1], width, width)
    p["blk2_w"], p["blk2_b"] = conv_p(keys[2], width, width)
    p["proj1_w"], p["proj1_b"] = dense_p(keys[3], width, proj_hidden)
    p["proj2_w"], p["proj2_b"] = dense_p(keys[4], proj_hidden, proj_hidden)
    p["proj3_w"], p["proj3_b"] = dense_p(keys[5], proj_hidden, proj_out)
    return p


def encoder(params, x_nchw):
    B, C, H, W = x_nchw.shape
    # NCHW -> NHWC + zero-pad channels to the 128-lane width, one XLA pass.
    x = jnp.transpose(x_nchw, (0, 2, 3, 1)).astype(jnp.float32)
    x = jnp.pad(x, ((0, 0), (0, 0), (0, 0), (0, LANE - C)))
    # conv stem
    x = conv3x3(x, params["stem_w"], params["stem_b"], act="relu")
    # residual block: relu(conv2(relu(conv1(x))) + x), skip fused into conv2 epilogue
    y = conv3x3(x, params["blk1_w"], params["blk1_b"], act="relu")
    x = conv3x3(y, params["blk2_w"], params["blk2_b"], skip=x, act="relu")
    # global average pool -> padded representation h
    return global_avg_pool(x)                     # (B, 128) f32 (cols >= width are 0)


def simclrv2_forward(params, x_i, x_j, *, width, proj_out):
    B = x_i.shape[0]
    # Batch the two augmented views into one encoder/projector pass.
    x = jnp.concatenate([x_i, x_j], axis=0)
    h_p = encoder(params, x)                      # (2B, 128)
    z_p = projector(params, h_p)                  # (2B, 128)
    h_i, h_j = h_p[:B, :width], h_p[B:, :width]
    z_i, z_j = z_p[:B, :proj_out], z_p[B:, :proj_out]
    return h_i, h_j, z_i, z_j


# ----------------------------------------------------------------------------
# Pure-JAX reference (same padded parameters) for a loose numerical check
# ----------------------------------------------------------------------------
def _ref_forward(params, x_nchw, width, proj_out):
    C = x_nchw.shape[1]
    x = jnp.transpose(x_nchw, (0, 2, 3, 1)).astype(jnp.float32)
    x = jnp.pad(x, ((0, 0), (0, 0), (0, 0), (0, LANE - C)))

    def conv(x, w, b, skip=None):
        B, H, W, _ = x.shape
        xp = jnp.pad(x, ((0, 0), (1, 1), (1, 1), (0, 0)))
        wf = w.astype(jnp.float32)
        acc = jnp.zeros((B, H, W, w.shape[-1]), jnp.float32)
        for dy in range(3):
            for dx in range(3):
                acc = acc + jnp.einsum("bhwc,cn->bhwn",
                                       xp[:, dy:dy + H, dx:dx + W, :], wf[dy * 3 + dx])
        y = acc + b.reshape(1, 1, 1, -1)
        if skip is not None:
            y = y + skip
        return jnp.maximum(y, 0.0)

    x = conv(x, params["stem_w"], params["stem_b"])
    y = conv(x, params["blk1_w"], params["blk1_b"])
    x = conv(y, params["blk2_w"], params["blk2_b"], skip=x)
    h = jnp.mean(x, axis=(1, 2))
    z = jnp.maximum(h @ params["proj1_w"].astype(jnp.float32) + params["proj1_b"][0], 0.0)
    z = jnp.maximum(z @ params["proj2_w"].astype(jnp.float32) + params["proj2_b"][0], 0.0)
    z = z @ params["proj3_w"].astype(jnp.float32) + params["proj3_b"][0]
    return h[:, :width], z[:, :proj_out]


# ----------------------------------------------------------------------------
if __name__ == "__main__":
    key = jax.random.PRNGKey(0)
    k_p, k_i, k_j = jax.random.split(key, 3)

    WIDTH, PROJ_HIDDEN, PROJ_OUT = 32, 32, 16
    params = init_params(k_p, c_in=3, width=WIDTH,
                         proj_hidden=PROJ_HIDDEN, proj_out=PROJ_OUT)

    # small NCHW inputs (two augmented views), matching the PyTorch convention
    x_i = jax.random.normal(k_i, (2, 3, 16, 16), jnp.float32)
    x_j = jax.random.normal(k_j, (2, 3, 16, 16), jnp.float32)

    fwd = jax.jit(functools.partial(simclrv2_forward, width=WIDTH, proj_out=PROJ_OUT))
    h_i, h_j, z_i, z_j = fwd(params, x_i, x_j)
    jax.block_until_ready((h_i, h_j, z_i, z_j))

    assert h_i.shape == (2, WIDTH) and h_j.shape == (2, WIDTH)
    assert z_i.shape == (2, PROJ_OUT) and z_j.shape == (2, PROJ_OUT)

    # loose tolerance: kernel uses bf16 MXU operands with f32 accumulation
    h_ref, z_ref = _ref_forward(params, x_i, WIDTH, PROJ_OUT)
    assert jnp.allclose(h_i, h_ref, rtol=1e-1, atol=1e-1)
    assert jnp.allclose(z_i, z_ref, rtol=1e-1, atol=1e-1)

    print("KERNEL_OK")
</pallas_src>

<mosaic_0001>
module attributes {stable_mosaic.version = 11 : i64} {
  func.func @_conv3x3_kernel(%arg0: i32, %arg1: memref<1x18x18x128xf32, #tpu.memory_space<vmem>>, %arg2: memref<9x128x128xbf16, #tpu.memory_space<vmem>>, %arg3: memref<1x128xf32, #tpu.memory_space<vmem>>, %arg4: memref<1x16x16x128xf32, #tpu.memory_space<vmem>>) attributes {dimension_semantics = [#tpu.dimension_semantics<parallel>], iteration_bounds = array<i64: 4>, scalar_prefetch = 0 : i64, scratch_operands = 0 : i64, tpu.core_type = #tpu.core_type<tc>, window_params = [{transform_indices = @transform_0, window_bounds = array<i64: 1, 18, 18, 128>}, {pipeline_mode = #tpu.pipeline_mode<synchronous>, transform_indices = @transform_1, window_bounds = array<i64: 9, 128, 128>}, {pipeline_mode = #tpu.pipeline_mode<synchronous>, transform_indices = @transform_2, window_bounds = array<i64: 1, 128>}, {transform_indices = @transform_3, window_bounds = array<i64: 1, 16, 16, 128>}]} {
    %cst = arith.constant 0.000000e+00 : f32
    %0 = vector.broadcast %cst : f32 to vector<256x128xf32>
    %c0 = arith.constant 0 : index
    %c0_0 = arith.constant 0 : index
    %c0_1 = arith.constant 0 : index
    %c0_2 = arith.constant 0 : index
    %1 = vector.load %arg1[%c0, %c0_0, %c0_1, %c0_2] : memref<1x18x18x128xf32, #tpu.memory_space<vmem>>, vector<1x16x16x128xf32>
    %2 = vector.shape_cast %1 : vector<1x16x16x128xf32> to vector<16x16x128xf32>
    %3 = vector.shape_cast %2 : vector<16x16x128xf32> to vector<256x128xf32>
    %4 = arith.truncf %3 : vector<256x128xf32> to vector<256x128xbf16>
    %c0_3 = arith.constant 0 : index
    %c0_4 = arith.constant 0 : index
    %c0_5 = arith.constant 0 : index
    %5 = vector.load %arg2[%c0_3, %c0_4, %c0_5] : memref<9x128x128xbf16, #tpu.memory_space<vmem>>, vector<1x128x128xbf16>
    %6 = vector.shape_cast %5 : vector<1x128x128xbf16> to vector<128x128xbf16>
    %cst_6 = arith.constant dense<0.000000e+00> : vector<256x128xf32>
    %7 = tpu.matmul %4, %6, %cst_6 {dimension_numbers = #tpu.dot_dimension_numbers<[1], [0], [0], [1], [0, 0, 1, 1], [], []>} : vector<256x128xbf16>, vector<128x128xbf16>, vector<256x128xf32> -> vector<256x128xf32>
    %8 = arith.addf %0, %7 : vector<256x128xf32>
    %c0_7 = arith.constant 0 : index
    %c0_8 = arith.constant 0 : index
    %c1 = arith.constant 1 : index
    %c0_9 = arith.constant 0 : index
    %9 = vector.load %arg1[%c0_7, %c0_8, %c1, %c0_9] : memref<1x18x18x128xf32, #tpu.memory_space<vmem>>, vector<1x16x16x128xf32>
    %10 = vector.shape_cast %9 : vector<1x16x16x128xf32> to vector<16x16x128xf32>
    %11 = vector.shape_cast %10 : vector<16x16x128xf32> to vector<256x128xf32>
    %12 = arith.truncf %11 : vector<256x128xf32> to vector<256x128xbf16>
    %c1_10 = arith.constant 1 : index
    %c0_11 = arith.constant 0 : index
    %c0_12 = arith.constant 0 : index
    %13 = vector.load %arg2[%c1_10, %c0_11, %c0_12] : memref<9x128x128xbf16, #tpu.memory_space<vmem>>, vector<1x128x128xbf16>
    %14 = vector.shape_cast %13 : vector<1x128x128xbf16> to vector<128x128xbf16>
    %cst_13 = arith.constant dense<0.000000e+00> : vector<256x128xf32>
    %15 = tpu.matmul %12, %14, %cst_13 {dimension_numbers = #tpu.dot_dimension_numbers<[1], [0], [0], [1], [0, 0, 1, 1], [], []>} : vector<256x128xbf16>, vector<128x128xbf16>, vector<256x128xf32> -> vector<256x128xf32>
    %16 = arith.addf %8, %15 : vector<256x128xf32>
    %c0_14 = arith.constant 0 : index
    %c0_15 = arith.constant 0 : index
    %c2 = arith.constant 2 : index
    %c0_16 = arith.constant 0 : index
    %17 = vector.load %arg1[%c0_14, %c0_15, %c2, %c0_16] : memref<1x18x18x128xf32, #tpu.memory_space<vmem>>, vector<1x16x16x128xf32>
    %18 = vector.shape_cast %17 : vector<1x16x16x128xf32> to vector<16x16x128xf32>
    %19 = vector.shape_cast %18 : vector<16x16x128xf32> to vector<256x128xf32>
    %20 = arith.truncf %19 : vector<256x128xf32> to vector<256x128xbf16>
    %c2_17 = arith.constant 2 : index
    %c0_18 = arith.constant 0 : index
    %c0_19 = arith.constant 0 : index
    %21 = vector.load %arg2[%c2_17, %c0_18, %c0_19] : memref<9x128x128xbf16, #tpu.memory_space<vmem>>, vector<1x128x128xbf16>
    %22 = vector.shape_cast %21 : vector<1x128x128xbf16> to vector<128x128xbf16>
    %cst_20 = arith.constant dense<0.000000e+00> : vector<256x128xf32>
    %23 = tpu.matmul %20, %22, %cst_20 {dimension_numbers = #tpu.dot_dimension_numbers<[1], [0], [0], [1], [0, 0, 1, 1], [], []>} : vector<256x128xbf16>, vector<128x128xbf16>, vector<256x128xf32> -> vector<256x128xf32>
    %24 = arith.addf %16, %23 : vector<256x128xf32>
    %c0_21 = arith.constant 0 : index
    %c1_22 = arith.constant 1 : index
    %c0_23 = arith.constant 0 : index
    %c0_24 = arith.constant 0 : index
    %25 = vector.load %arg1[%c0_21, %c1_22, %c0_23, %c0_24] : memref<1x18x18x128xf32, #tpu.memory_space<vmem>>, vector<1x16x16x128xf32>
    %26 = vector.shape_cast %25 : vector<1x16x16x128xf32> to vector<16x16x128xf32>
    %27 = vector.shape_cast %26 : vector<16x16x128xf32> to vector<256x128xf32>
    %28 = arith.truncf %27 : vector<256x128xf32> to vector<256x128xbf16>
    %c3 = arith.constant 3 : index
    %c0_25 = arith.constant 0 : index
    %c0_26 = arith.constant 0 : index
    %29 = vector.load %arg2[%c3, %c0_25, %c0_26] : memref<9x128x128xbf16, #tpu.memory_space<vmem>>, vector<1x128x128xbf16>
    %30 = vector.shape_cast %29 : vector<1x128x128xbf16> to vector<128x128xbf16>
    %cst_27 = arith.constant dense<0.000000e+00> : vector<256x128xf32>
    %31 = tpu.matmul %28, %30, %cst_27 {dimension_numbers = #tpu.dot_dimension_numbers<[1], [0], [0], [1], [0, 0, 1, 1], [], []>} : vector<256x128xbf16>, vector<128x128xbf16>, vector<256x128xf32> -> vector<256x128xf32>
    %32 = arith.addf %24, %31 : vector<256x128xf32>
    %c0_28 = arith.constant 0 : index
    %c1_29 = arith.constant 1 : index
    %c1_30 = arith.constant 1 : index
    %c0_31 = arith.constant 0 : index
    %33 = vector.load %arg1[%c0_28, %c1_29, %c1_30, %c0_31] : memref<1x18x18x128xf32, #tpu.memory_space<vmem>>, vector<1x16x16x128xf32>
    %34 = vector.shape_cast %33 : vector<1x16x16x128xf32> to vector<16x16x128xf32>
    %35 = vector.shape_cast %34 : vector<16x16x128xf32> to vector<256x128xf32>
    %36 = arith.truncf %35 : vector<256x128xf32> to vector<256x128xbf16>
    %c4 = arith.constant 4 : index
    %c0_32 = arith.constant 0 : index
    %c0_33 = arith.constant 0 : index
    %37 = vector.load %arg2[%c4, %c0_32, %c0_33] : memref<9x128x128xbf16, #tpu.memory_space<vmem>>, vector<1x128x128xbf16>
    %38 = vector.shape_cast %37 : vector<1x128x128xbf16> to vector<128x128xbf16>
    %cst_34 = arith.constant dense<0.000000e+00> : vector<256x128xf32>
    %39 = tpu.matmul %36, %38, %cst_34 {dimension_numbers = #tpu.dot_dimension_numbers<[1], [0], [0], [1], [0, 0, 1, 1], [], []>} : vector<256x128xbf16>, vector<128x128xbf16>, vector<256x128xf32> -> vector<256x128xf32>
    %40 = arith.addf %32, %39 : vector<256x128xf32>
    %c0_35 = arith.constant 0 : index
    %c1_36 = arith.constant 1 : index
    %c2_37 = arith.constant 2 : index
    %c0_38 = arith.constant 0 : index
    %41 = vector.load %arg1[%c0_35, %c1_36, %c2_37, %c0_38] : memref<1x18x18x128xf32, #tpu.memory_space<vmem>>, vector<1x16x16x128xf32>
    %42 = vector.shape_cast %41 : vector<1x16x16x128xf32> to vector<16x16x128xf32>
    %43 = vector.shape_cast %42 : vector<16x16x128xf32> to vector<256x128xf32>
    %44 = arith.truncf %43 : vector<256x128xf32> to vector<256x128xbf16>
    %c5 = arith.constant 5 : index
    %c0_39 = arith.constant 0 : index
    %c0_40 = arith.constant 0 : index
    %45 = vector.load %arg2[%c5, %c0_39, %c0_40] : memref<9x128x128xbf16, #tpu.memory_space<vmem>>, vector<1x128x128xbf16>
    %46 = vector.shape_cast %45 : vector<1x128x128xbf16> to vector<128x128xbf16>
    %cst_41 = arith.constant dense<0.000000e+00> : vector<256x128xf32>
    %47 = tpu.matmul %44, %46, %cst_41 {dimension_numbers = #tpu.dot_dimension_numbers<[1], [0], [0], [1], [0, 0, 1, 1], [], []>} : vector<256x128xbf16>, vector<128x128xbf16>, vector<256x128xf32> -> vector<256x128xf32>
    %48 = arith.addf %40, %47 : vector<256x128xf32>
    %c0_42 = arith.constant 0 : index
    %c2_43 = arith.constant 2 : index
    %c0_44 = arith.constant 0 : index
    %c0_45 = arith.constant 0 : index
    %49 = vector.load %arg1[%c0_42, %c2_43, %c0_44, %c0_45] : memref<1x18x18x128xf32, #tpu.memory_space<vmem>>, vector<1x16x16x128xf32>
    %50 = vector.shape_cast %49 : vector<1x16x16x128xf32> to vector<16x16x128xf32>
    %51 = vector.shape_cast %50 : vector<16x16x128xf32> to vector<256x128xf32>
    %52 = arith.truncf %51 : vector<256x128xf32> to vector<256x128xbf16>
    %c6 = arith.constant 6 : index
    %c0_46 = arith.constant 0 : index
    %c0_47 = arith.constant 0 : index
    %53 = vector.load %arg2[%c6, %c0_46, %c0_47] : memref<9x128x128xbf16, #tpu.memory_space<vmem>>, vector<1x128x128xbf16>
    %54 = vector.shape_cast %53 : vector<1x128x128xbf16> to vector<128x128xbf16>
    %cst_48 = arith.constant dense<0.000000e+00> : vector<256x128xf32>
    %55 = tpu.matmul %52, %54, %cst_48 {dimension_numbers = #tpu.dot_dimension_numbers<[1], [0], [0], [1], [0, 0, 1, 1], [], []>} : vector<256x128xbf16>, vector<128x128xbf16>, vector<256x128xf32> -> vector<256x128xf32>
    %56 = arith.addf %48, %55 : vector<256x128xf32>
    %c0_49 = arith.constant 0 : index
    %c2_50 = arith.constant 2 : index
    %c1_51 = arith.constant 1 : index
    %c0_52 = arith.constant 0 : index
    %57 = vector.load %arg1[%c0_49, %c2_50, %c1_51, %c0_52] : memref<1x18x18x128xf32, #tpu.memory_space<vmem>>, vector<1x16x16x128xf32>
    %58 = vector.shape_cast %57 : vector<1x16x16x128xf32> to vector<16x16x128xf32>
    %59 = vector.shape_cast %58 : vector<16x16x128xf32> to vector<256x128xf32>
    %60 = arith.truncf %59 : vector<256x128xf32> to vector<256x128xbf16>
    %c7 = arith.constant 7 : index
    %c0_53 = arith.constant 0 : index
    %c0_54 = arith.constant 0 : index
    %61 = vector.load %arg2[%c7, %c0_53, %c0_54] : memref<9x128x128xbf16, #tpu.memory_space<vmem>>, vector<1x128x128xbf16>
    %62 = vector.shape_cast %61 : vector<1x128x128xbf16> to vector<128x128xbf16>
    %cst_55 = arith.constant dense<0.000000e+00> : vector<256x128xf32>
    %63 = tpu.matmul %60, %62, %cst_55 {dimension_numbers = #tpu.dot_dimension_numbers<[1], [0], [0], [1], [0, 0, 1, 1], [], []>} : vector<256x128xbf16>, vector<128x128xbf16>, vector<256x128xf32> -> vector<256x128xf32>
    %64 = arith.addf %56, %63 : vector<256x128xf32>
    %c0_56 = arith.constant 0 : index
    %c2_57 = arith.constant 2 : index
    %c2_58 = arith.constant 2 : index
    %c0_59 = arith.constant 0 : index
    %65 = vector.load %arg1[%c0_56, %c2_57, %c2_58, %c0_59] : memref<1x18x18x128xf32, #tpu.memory_space<vmem>>, vector<1x16x16x128xf32>
    %66 = vector.shape_cast %65 : vector<1x16x16x128xf32> to vector<16x16x128xf32>
    %67 = vector.shape_cast %66 : vector<16x16x128xf32> to vector<256x128xf32>
    %68 = arith.truncf %67 : vector<256x128xf32> to vector<256x128xbf16>
    %c8 = arith.constant 8 : index
    %c0_60 = arith.constant 0 : index
    %c0_61 = arith.constant 0 : index
    %69 = vector.load %arg2[%c8, %c0_60, %c0_61] : memref<9x128x128xbf16, #tpu.memory_space<vmem>>, vector<1x128x128xbf16>
    %70 = vector.shape_cast %69 : vector<1x128x128xbf16> to vector<128x128xbf16>
    %cst_62 = arith.constant dense<0.000000e+00> : vector<256x128xf32>
    %71 = tpu.matmul %68, %70, %cst_62 {dimension_numbers = #tpu.dot_dimension_numbers<[1], [0], [0], [1], [0, 0, 1, 1], [], []>} : vector<256x128xbf16>, vector<128x128xbf16>, vector<256x128xf32> -> vector<256x128xf32>
    %72 = arith.addf %64, %71 : vector<256x128xf32>
    %c0_63 = arith.constant 0 : index
    %c0_64 = arith.constant 0 : index
    %73 = vector.load %arg3[%c0_63, %c0_64] : memref<1x128xf32, #tpu.memory_space<vmem>>, vector<1x128xf32>
    %74 = vector.broadcast %73 : vector<1x128xf32> to vector<256x128xf32>
    %75 = arith.addf %72, %74 : vector<256x128xf32>
    %cst_65 = arith.constant 0.000000e+00 : f32
    %76 = vector.broadcast %cst_65 : f32 to vector<256x128xf32>
    %77 = arith.maximumf %75, %76 : vector<256x128xf32>
    %78 = vector.shape_cast %77 : vector<256x128xf32> to vector<16x16x128xf32>
    %c0_66 = arith.constant 0 : index
    %c0_67 = arith.constant 0 : index
    %c0_68 = arith.constant 0 : index
    %c0_69 = arith.constant 0 : index
    %79 = vector.load %arg4[%c0_66, %c0_67, %c0_68, %c0_69] : memref<1x16x16x128xf32, #tpu.memory_space<vmem>>, vector<1x16x16x128xf32>
    %80 = vector.shape_cast %79 : vector<1x16x16x128xf32> to vector<16x16x128xf32>
    %81 = vector.shape_cast %78 : vector<16x16x128xf32> to vector<1x16x16x128xf32>
    tpu.vector_store %arg4[%c0_66, %c0_67, %c0_68, %c0_69], %81 {strides = array<i32>} : memref<1x16x16x128xf32, #tpu.memory_space<vmem>>, vector<1x16x16x128xf32>,
    return
  }
  func.func @transform_0(%arg0: i32) -> (i32, i32, i32, i32) {
    %c0_i32 = arith.constant 0 : i32
    %c0_i32_0 = arith.constant 0 : i32
    %c0_i32_1 = arith.constant 0 : i32
    %c0_i32_2 = arith.constant 0 : i32
    return %arg0, %c0_i32, %c0_i32_0, %c0_i32_1 : i32, i32, i32, i32
  }
  func.func @transform_1(%arg0: i32) -> (i32, i32, i32) {
    %c0_i32 = arith.constant 0 : i32
    %c0_i32_0 = arith.constant 0 : i32
    %c0_i32_1 = arith.constant 0 : i32
    %c0_i32_2 = arith.constant 0 : i32
    return %c0_i32, %c0_i32_0, %c0_i32_1 : i32, i32, i32
  }
  func.func @transform_2(%arg0: i32) -> (i32, i32) {
    %c0_i32 = arith.constant 0 : i32
    %c0_i32_0 = arith.constant 0 : i32
    %c0_i32_1 = arith.constant 0 : i32
    return %c0_i32, %c0_i32_0 : i32, i32
  }
  func.func @transform_3(%arg0: i32) -> (i32, i32, i32, i32) {
    %c0_i32 = arith.constant 0 : i32
    %c0_i32_0 = arith.constant 0 : i32
    %c0_i32_1 = arith.constant 0 : i32
    %c0_i32_2 = arith.constant 0 : i32
    return %arg0, %c0_i32, %c0_i32_0, %c0_i32_1 : i32, i32, i32, i32
  }
}

module attributes {stable_mosaic.version = 11 : i64} {
  func.func @_conv3x3_kernel(%arg0: i32, %arg1: memref<1x18x18x128xf32, #tpu.memory_space<vmem>>, %arg2: memref<9x128x128xbf16, #tpu.memory_space<vmem>>, %arg3: memref<1x128xf32, #tpu.memory_space<vmem>>, %arg4: memref<1x16x16x128xf32, #tpu.memory_space<vmem>>, %arg5: memref<1x16x16x128xf32, #tpu.memory_space<vmem>>) attributes {dimension_semantics = [#tpu.dimension_semantics<parallel>], iteration_bounds = array<i64: 4>, scalar_prefetch = 0 : i64, scratch_operands = 0 : i64, tpu.core_type = #tpu.core_type<tc>, window_params = [{transform_indices = @transform_0, window_bounds = array<i64: 1, 18, 18, 128>}, {pipeline_mode = #tpu.pipeline_mode<synchronous>, transform_indices = @transform_1, window_bounds = array<i64: 9, 128, 128>}, {pipeline_mode = #tpu.pipeline_mode<synchronous>, transform_indices = @transform_2, window_bounds = array<i64: 1, 128>}, {transform_indices = @transform_3, window_bounds = array<i64: 1, 16, 16, 128>}, {transform_indices = @transform_4, window_bounds = array<i64: 1, 16, 16, 128>}]} {
    %cst = arith.constant 0.000000e+00 : f32
    %0 = vector.broadcast %cst : f32 to vector<256x128xf32>
    %c0 = arith.constant 0 : index
    %c0_0 = arith.constant 0 : index
    %c0_1 = arith.constant 0 : index
    %c0_2 = arith.constant 0 : index
    %1 = vector.load %arg1[%c0, %c0_0, %c0_1, %c0_2] : memref<1x18x18x128xf32, #tpu.memory_space<vmem>>, vector<1x16x16x128xf32>
    %2 = vector.shape_cast %1 : vector<1x16x16x128xf32> to vector<16x16x128xf32>
    %3 = vector.shape_cast %2 : vector<16x16x128xf32> to vector<256x128xf32>
    %4 = arith.truncf %3 : vector<256x128xf32> to vector<256x128xbf16>
    %c0_3 = arith.constant 0 : index
    %c0_4 = arith.constant 0 : index
    %c0_5 = arith.constant 0 : index
    %5 = vector.load %arg2[%c0_3, %c0_4, %c0_5] : memref<9x128x128xbf16, #tpu.memory_space<vmem>>, vector<1x128x128xbf16>
    %6 = vector.shape_cast %5 : vector<1x128x128xbf16> to vector<128x128xbf16>
    %cst_6 = arith.constant dense<0.000000e+00> : vector<256x128xf32>
    %7 = tpu.matmul %4, %6, %cst_6 {dimension_numbers = #tpu.dot_dimension_numbers<[1], [0], [0], [1], [0, 0, 1, 1], [], []>} : vector<256x128xbf16>, vector<128x128xbf16>, vector<256x128xf32> -> vector<256x128xf32>
    %8 = arith.addf %0, %7 : vector<256x128xf32>
    %c0_7 = arith.constant 0 : index
    %c0_8 = arith.constant 0 : index
    %c1 = arith.constant 1 : index
    %c0_9 = arith.constant 0 : index
    %9 = vector.load %arg1[%c0_7, %c0_8, %c1, %c0_9] : memref<1x18x18x128xf32, #tpu.memory_space<vmem>>, vector<1x16x16x128xf32>
    %10 = vector.shape_cast %9 : vector<1x16x16x128xf32> to vector<16x16x128xf32>
    %11 = vector.shape_cast %10 : vector<16x16x128xf32> to vector<256x128xf32>
    %12 = arith.truncf %11 : vector<256x128xf32> to vector<256x128xbf16>
    %c1_10 = arith.constant 1 : index
    %c0_11 = arith.constant 0 : index
    %c0_12 = arith.constant 0 : index
    %13 = vector.load %arg2[%c1_10, %c0_11, %c0_12] : memref<9x128x128xbf16, #tpu.memory_space<vmem>>, vector<1x128x128xbf16>
    %14 = vector.shape_cast %13 : vector<1x128x128xbf16> to vector<128x128xbf16>
    %cst_13 = arith.constant dense<0.000000e+00> : vector<256x128xf32>
    %15 = tpu.matmul %12, %14, %cst_13 {dimension_numbers = #tpu.dot_dimension_numbers<[1], [0], [0], [1], [0, 0, 1, 1], [], []>} : vector<256x128xbf16>, vector<128x128xbf16>, vector<256x128xf32> -> vector<256x128xf32>
    %16 = arith.addf %8, %15 : vector<256x128xf32>
    %c0_14 = arith.constant 0 : index
    %c0_15 = arith.constant 0 : index
    %c2 = arith.constant 2 : index
    %c0_16 = arith.constant 0 : index
    %17 = vector.load %arg1[%c0_14, %c0_15, %c2, %c0_16] : memref<1x18x18x128xf32, #tpu.memory_space<vmem>>, vector<1x16x16x128xf32>
    %18 = vector.shape_cast %17 : vector<1x16x16x128xf32> to vector<16x16x128xf32>
    %19 = vector.shape_cast %18 : vector<16x16x128xf32> to vector<256x128xf32>
    %20 = arith.truncf %19 : vector<256x128xf32> to vector<256x128xbf16>
    %c2_17 = arith.constant 2 : index
    %c0_18 = arith.constant 0 : index
    %c0_19 = arith.constant 0 : index
    %21 = vector.load %arg2[%c2_17, %c0_18, %c0_19] : memref<9x128x128xbf16, #tpu.memory_space<vmem>>, vector<1x128x128xbf16>
    %22 = vector.shape_cast %21 : vector<1x128x128xbf16> to vector<128x128xbf16>
    %cst_20 = arith.constant dense<0.000000e+00> : vector<256x128xf32>
    %23 = tpu.matmul %20, %22, %cst_20 {dimension_numbers = #tpu.dot_dimension_numbers<[1], [0], [0], [1], [0, 0, 1, 1], [], []>} : vector<256x128xbf16>, vector<128x128xbf16>, vector<256x128xf32> -> vector<256x128xf32>
    %24 = arith.addf %16, %23 : vector<256x128xf32>
    %c0_21 = arith.constant 0 : index
    %c1_22 = arith.constant 1 : index
    %c0_23 = arith.constant 0 : index
    %c0_24 = arith.constant 0 : index
    %25 = vector.load %arg1[%c0_21, %c1_22, %c0_23, %c0_24] : memref<1x18x18x128xf32, #tpu.memory_space<vmem>>, vector<1x16x16x128xf32>
    %26 = vector.shape_cast %25 : vector<1x16x16x128xf32> to vector<16x16x128xf32>
    %27 = vector.shape_cast %26 : vector<16x16x128xf32> to vector<256x128xf32>
    %28 = arith.truncf %27 : vector<256x128xf32> to vector<256x128xbf16>
    %c3 = arith.constant 3 : index
    %c0_25 = arith.constant 0 : index
    %c0_26 = arith.constant 0 : index
    %29 = vector.load %arg2[%c3, %c0_25, %c0_26] : memref<9x128x128xbf16, #tpu.memory_space<vmem>>, vector<1x128x128xbf16>
    %30 = vector.shape_cast %29 : vector<1x128x128xbf16> to vector<128x128xbf16>
    %cst_27 = arith.constant dense<0.000000e+00> : vector<256x128xf32>
    %31 = tpu.matmul %28, %30, %cst_27 {dimension_numbers = #tpu.dot_dimension_numbers<[1], [0], [0], [1], [0, 0, 1, 1], [], []>} : vector<256x128xbf16>, vector<128x128xbf16>, vector<256x128xf32> -> vector<256x128xf32>
    %32 = arith.addf %24, %31 : vector<256x128xf32>
    %c0_28 = arith.constant 0 : index
    %c1_29 = arith.constant 1 : index
    %c1_30 = arith.constant 1 : index
    %c0_31 = arith.constant 0 : index
    %33 = vector.load %arg1[%c0_28, %c1_29, %c1_30, %c0_31] : memref<1x18x18x128xf32, #tpu.memory_space<vmem>>, vector<1x16x16x128xf32>
    %34 = vector.shape_cast %33 : vector<1x16x16x128xf32> to vector<16x16x128xf32>
    %35 = vector.shape_cast %34 : vector<16x16x128xf32> to vector<256x128xf32>
    %36 = arith.truncf %35 : vector<256x128xf32> to vector<256x128xbf16>
    %c4 = arith.constant 4 : index
    %c0_32 = arith.constant 0 : index
    %c0_33 = arith.constant 0 : index
    %37 = vector.load %arg2[%c4, %c0_32, %c0_33] : memref<9x128x128xbf16, #tpu.memory_space<vmem>>, vector<1x128x128xbf16>
    %38 = vector.shape_cast %37 : vector<1x128x128xbf16> to vector<128x128xbf16>
    %cst_34 = arith.constant dense<0.000000e+00> : vector<256x128xf32>
    %39 = tpu.matmul %36, %38, %cst_34 {dimension_numbers = #tpu.dot_dimension_numbers<[1], [0], [0], [1], [0, 0, 1, 1], [], []>} : vector<256x128xbf16>, vector<128x128xbf16>, vector<256x128xf32> -> vector<256x128xf32>
    %40 = arith.addf %32, %39 : vector<256x128xf32>
    %c0_35 = arith.constant 0 : index
    %c1_36 = arith.constant 1 : index
    %c2_37 = arith.constant 2 : index
    %c0_38 = arith.constant 0 : index
    %41 = vector.load %arg1[%c0_35, %c1_36, %c2_37, %c0_38] : memref<1x18x18x128xf32, #tpu.memory_space<vmem>>, vector<1x16x16x128xf32>
    %42 = vector.shape_cast %41 : vector<1x16x16x128xf32> to vector<16x16x128xf32>
    %43 = vector.shape_cast %42 : vector<16x16x128xf32> to vector<256x128xf32>
    %44 = arith.truncf %43 : vector<256x128xf32> to vector<256x128xbf16>
    %c5 = arith.constant 5 : index
    %c0_39 = arith.constant 0 : index
    %c0_40 = arith.constant 0 : index
    %45 = vector.load %arg2[%c5, %c0_39, %c0_40] : memref<9x128x128xbf16, #tpu.memory_space<vmem>>, vector<1x128x128xbf16>
    %46 = vector.shape_cast %45 : vector<1x128x128xbf16> to vector<128x128xbf16>
    %cst_41 = arith.constant dense<0.000000e+00> : vector<256x128xf32>
    %47 = tpu.matmul %44, %46, %cst_41 {dimension_numbers = #tpu.dot_dimension_numbers<[1], [0], [0], [1], [0, 0, 1, 1], [], []>} : vector<256x128xbf16>, vector<128x128xbf16>, vector<256x128xf32> -> vector<256x128xf32>
    %48 = arith.addf %40, %47 : vector<256x128xf32>
    %c0_42 = arith.constant 0 : index
    %c2_43 = arith.constant 2 : index
    %c0_44 = arith.constant 0 : index
    %c0_45 = arith.constant 0 : index
    %49 = vector.load %arg1[%c0_42, %c2_43, %c0_44, %c0_45] : memref<1x18x18x128xf32, #tpu.memory_space<vmem>>, vector<1x16x16x128xf32>
    %50 = vector.shape_cast %49 : vector<1x16x16x128xf32> to vector<16x16x128xf32>
    %51 = vector.shape_cast %50 : vector<16x16x128xf32> to vector<256x128xf32>
    %52 = arith.truncf %51 : vector<256x128xf32> to vector<256x128xbf16>
    %c6 = arith.constant 6 : index
    %c0_46 = arith.constant 0 : index
    %c0_47 = arith.constant 0 : index
    %53 = vector.load %arg2[%c6, %c0_46, %c0_47] : memref<9x128x128xbf16, #tpu.memory_space<vmem>>, vector<1x128x128xbf16>
    %54 = vector.shape_cast %53 : vector<1x128x128xbf16> to vector<128x128xbf16>
    %cst_48 = arith.constant dense<0.000000e+00> : vector<256x128xf32>
    %55 = tpu.matmul %52, %54, %cst_48 {dimension_numbers = #tpu.dot_dimension_numbers<[1], [0], [0], [1], [0, 0, 1, 1], [], []>} : vector<256x128xbf16>, vector<128x128xbf16>, vector<256x128xf32> -> vector<256x128xf32>
    %56 = arith.addf %48, %55 : vector<256x128xf32>
    %c0_49 = arith.constant 0 : index
    %c2_50 = arith.constant 2 : index
    %c1_51 = arith.constant 1 : index
    %c0_52 = arith.constant 0 : index
    %57 = vector.load %arg1[%c0_49, %c2_50, %c1_51, %c0_52] : memref<1x18x18x128xf32, #tpu.memory_space<vmem>>, vector<1x16x16x128xf32>
    %58 = vector.shape_cast %57 : vector<1x16x16x128xf32> to vector<16x16x128xf32>
    %59 = vector.shape_cast %58 : vector<16x16x128xf32> to vector<256x128xf32>
    %60 = arith.truncf %59 : vector<256x128xf32> to vector<256x128xbf16>
    %c7 = arith.constant 7 : index
    %c0_53 = arith.constant 0 : index
    %c0_54 = arith.constant 0 : index
    %61 = vector.load %arg2[%c7, %c0_53, %c0_54] : memref<9x128x128xbf16, #tpu.memory_space<vmem>>, vector<1x128x128xbf16>
    %62 = vector.shape_cast %61 : vector<1x128x128xbf16> to vector<128x128xbf16>
    %cst_55 = arith.constant dense<0.000000e+00> : vector<256x128xf32>
    %63 = tpu.matmul %60, %62, %cst_55 {dimension_numbers = #tpu.dot_dimension_numbers<[1], [0], [0], [1], [0, 0, 1, 1], [], []>} : vector<256x128xbf16>, vector<128x128xbf16>, vector<256x128xf32> -> vector<256x128xf32>
    %64 = arith.addf %56, %63 : vector<256x128xf32>
    %c0_56 = arith.constant 0 : index
    %c2_57 = arith.constant 2 : index
    %c2_58 = arith.constant 2 : index
    %c0_59 = arith.constant 0 : index
    %65 = vector.load %arg1[%c0_56, %c2_57, %c2_58, %c0_59] : memref<1x18x18x128xf32, #tpu.memory_space<vmem>>, vector<1x16x16x128xf32>
    %66 = vector.shape_cast %65 : vector<1x16x16x128xf32> to vector<16x16x128xf32>
    %67 = vector.shape_cast %66 : vector<16x16x128xf32> to vector<256x128xf32>
    %68 = arith.truncf %67 : vector<256x128xf32> to vector<256x128xbf16>
    %c8 = arith.constant 8 : index
    %c0_60 = arith.constant 0 : index
    %c0_61 = arith.constant 0 : index
    %69 = vector.load %arg2[%c8, %c0_60, %c0_61] : memref<9x128x128xbf16, #tpu.memory_space<vmem>>, vector<1x128x128xbf16>
    %70 = vector.shape_cast %69 : vector<1x128x128xbf16> to vector<128x128xbf16>
    %cst_62 = arith.constant dense<0.000000e+00> : vector<256x128xf32>
    %71 = tpu.matmul %68, %70, %cst_62 {dimension_numbers = #tpu.dot_dimension_numbers<[1], [0], [0], [1], [0, 0, 1, 1], [], []>} : vector<256x128xbf16>, vector<128x128xbf16>, vector<256x128xf32> -> vector<256x128xf32>
    %72 = arith.addf %64, %71 : vector<256x128xf32>
    %c0_63 = arith.constant 0 : index
    %c0_64 = arith.constant 0 : index
    %73 = vector.load %arg3[%c0_63, %c0_64] : memref<1x128xf32, #tpu.memory_space<vmem>>, vector<1x128xf32>
    %74 = vector.broadcast %73 : vector<1x128xf32> to vector<256x128xf32>
    %75 = arith.addf %72, %74 : vector<256x128xf32>
    %c0_65 = arith.constant 0 : index
    %c0_66 = arith.constant 0 : index
    %c0_67 = arith.constant 0 : index
    %c0_68 = arith.constant 0 : index
    %76 = vector.load %arg4[%c0_65, %c0_66, %c0_67, %c0_68] : memref<1x16x16x128xf32, #tpu.memory_space<vmem>>, vector<1x16x16x128xf32>
    %77 = vector.shape_cast %76 : vector<1x16x16x128xf32> to vector<16x16x128xf32>
    %78 = vector.shape_cast %77 : vector<16x16x128xf32> to vector<256x128xf32>
    %79 = arith.addf %75, %78 : vector<256x128xf32>
    %cst_69 = arith.constant 0.000000e+00 : f32
    %80 = vector.broadcast %cst_69 : f32 to vector<256x128xf32>
    %81 = arith.maximumf %79, %80 : vector<256x128xf32>
    %82 = vector.shape_cast %81 : vector<256x128xf32> to vector<16x16x128xf32>
    %c0_70 = arith.constant 0 : index
    %c0_71 = arith.constant 0 : index
    %c0_72 = arith.constant 0 : index
    %c0_73 = arith.constant 0 : index
    %83 = vector.load %arg5[%c0_70, %c0_71, %c0_72, %c0_73] : memref<1x16x16x128xf32, #tpu.memory_space<vmem>>, vector<1x16x16x128xf32>
    %84 = vector.shape_cast %83 : vector<1x16x16x128xf32> to vector<16x16x128xf32>
    %85 = vector.shape_cast %82 : vector<16x16x128xf32> to vector<1x16x16x128xf32>
    tpu.vector_store %arg5[%c0_70, %c0_71, %c0_72, %c0_73], %85 {strides = array<i32>} : memref<1x16x16x128xf32, #tpu.memory_space<vmem>>, vector<1x16x16x128xf32>,
    return
  }
  func.func @transform_0(%arg0: i32) -> (i32, i32, i32, i32) {
    %c0_i32 = arith.constant 0 : i32
    %c0_i32_0 = arith.constant 0 : i32
    %c0_i32_1 = arith.constant 0 : i32
    %c0_i32_2 = arith.constant 0 : i32
    return %arg0, %c0_i32, %c0_i32_0, %c0_i32_1 : i32, i32, i32, i32
  }
  func.func @transform_1(%arg0: i32) -> (i32, i32, i32) {
    %c0_i32 = arith.constant 0 : i32
    %c0_i32_0 = arith.constant 0 : i32
    %c0_i32_1 = arith.constant 0 : i32
    %c0_i32_2 = arith.constant 0 : i32
    return %c0_i32, %c0_i32_0, %c0_i32_1 : i32, i32, i32
  }
  func.func @transform_2(%arg0: i32) -> (i32, i32) {
    %c0_i32 = arith.constant 0 : i32
    %c0_i32_0 = arith.constant 0 : i32
    %c0_i32_1 = arith.constant 0 : i32
    return %c0_i32, %c0_i32_0 : i32, i32
  }
  func.func @transform_3(%arg0: i32) -> (i32, i32, i32, i32) {
    %c0_i32 = arith.constant 0 : i32
    %c0_i32_0 = arith.constant 0 : i32
    %c0_i32_1 = arith.constant 0 : i32
    %c0_i32_2 = arith.constant 0 : i32
    return %arg0, %c0_i32, %c0_i32_0, %c0_i32_1 : i32, i32, i32, i32
  }
  func.func @transform_4(%arg0: i32) -> (i32, i32, i32, i32) {
    %c0_i32 = arith.constant 0 : i32
    %c0_i32_0 = arith.constant 0 : i32
    %c0_i32_1 = arith.constant 0 : i32
    %c0_i32_2 = arith.constant 0 : i32
    return %arg0, %c0_i32, %c0_i32_0, %c0_i32_1 : i32, i32, i32, i32
  }
}

module attributes {stable_mosaic.version = 11 : i64} {
  func.func @_gap_kernel(%arg0: i32, %arg1: memref<4x128x128xf32, #tpu.memory_space<vmem>>, %arg2: memref<4x128xf32, #tpu.memory_space<vmem>>, %arg3: memref<4x128xf32, #tpu.memory_space<vmem>>) attributes {dimension_semantics = [#tpu.dimension_semantics<arbitrary>], iteration_bounds = array<i64: 2>, scalar_prefetch = 0 : i64, scratch_operands = 1 : i64, tpu.core_type = #tpu.core_type<tc>, window_params = [{transform_indices = @transform_0, window_bounds = array<i64: 4, 128, 128>}, {pipeline_mode = #tpu.pipeline_mode<synchronous>, transform_indices = @transform_1, window_bounds = array<i64: 4, 128>}]} {
    %c0_i32 = arith.constant 0 : i32
    %0 = arith.cmpi eq, %arg0, %c0_i32 : i32
    %1 = arith.extui %0 : i1 to i32
    %c0_i32_0 = arith.constant 0 : i32
    %2 = arith.cmpi ne, %1, %c0_i32_0 : i32
    scf.if %2 {
      %cst_8 = arith.constant 0.000000e+00 : f32
      %11 = vector.broadcast %cst_8 : f32 to vector<4x128xf32>
      %c0_9 = arith.constant 0 : index
      %c0_10 = arith.constant 0 : index
      %12 = vector.load %arg3[%c0_9, %c0_10] : memref<4x128xf32, #tpu.memory_space<vmem>>, vector<4x128xf32>
      tpu.vector_store %arg3[%c0_9, %c0_10], %11 {strides = array<i32>} : memref<4x128xf32, #tpu.memory_space<vmem>>, vector<4x128xf32>,
    } else {
    }
    %c0 = arith.constant 0 : index
    %c0_1 = arith.constant 0 : index
    %3 = vector.load %arg3[%c0, %c0_1] : memref<4x128xf32, #tpu.memory_space<vmem>>, vector<4x128xf32>
    %c0_2 = arith.constant 0 : index
    %c0_3 = arith.constant 0 : index
    %c0_4 = arith.constant 0 : index
    %4 = vector.load %arg1[%c0_2, %c0_3, %c0_4] : memref<4x128x128xf32, #tpu.memory_space<vmem>>, vector<4x128x128xf32>
    %cst = arith.constant dense<0.000000e+00> : vector<4x128xf32>
    %5 = vector.multi_reduction <add>, %4, %cst [1] : vector<4x128x128xf32> to vector<4x128xf32>
    %6 = arith.addf %3, %5 : vector<4x128xf32>
    %c0_5 = arith.constant 0 : index
    %c0_6 = arith.constant 0 : index
    %7 = vector.load %arg3[%c0_5, %c0_6] : memref<4x128xf32, #tpu.memory_space<vmem>>, vector<4x128xf32>
    tpu.vector_store %arg3[%c0_5, %c0_6], %6 {strides = array<i32>} : memref<4x128xf32, #tpu.memory_space<vmem>>, vector<4x128xf32>,
    %c1_i32 = arith.constant 1 : i32
    %8 = arith.cmpi eq, %arg0, %c1_i32 : i32
    %9 = arith.extui %8 : i1 to i32
    %c0_i32_7 = arith.constant 0 : i32
    %10 = arith.cmpi ne, %9, %c0_i32_7 : i32
    scf.if %10 {
      %c0_8 = arith.constant 0 : index
      %c0_9 = arith.constant 0 : index
      %11 = vector.load %arg3[%c0_8, %c0_9] : memref<4x128xf32, #tpu.memory_space<vmem>>, vector<4x128xf32>
      %cst_10 = arith.constant 3.906250e-03 : f32
      %12 = vector.broadcast %cst_10 : f32 to vector<4x128xf32>
      %13 = arith.mulf %11, %12 : vector<4x128xf32>
      %c0_11 = arith.constant 0 : index
      %c0_12 = arith.constant 0 : index
      %14 = vector.load %arg2[%c0_11, %c0_12] : memref<4x128xf32, #tpu.memory_space<vmem>>, vector<4x128xf32>
      tpu.vector_store %arg2[%c0_11, %c0_12], %13 {strides = array<i32>} : memref<4x128xf32, #tpu.memory_space<vmem>>, vector<4x128xf32>,
    } else {
    }
    return
  }
  func.func @transform_0(%arg0: i32) -> (i32, i32, i32) {
    %c0_i32 = arith.constant 0 : i32
    %c0_i32_0 = arith.constant 0 : i32
    %c0_i32_1 = arith.constant 0 : i32
    return %c0_i32, %arg0, %c0_i32_0 : i32, i32, i32
  }
  func.func @transform_1(%arg0: i32) -> (i32, i32) {
    %c0_i32 = arith.constant 0 : i32
    %c0_i32_0 = arith.constant 0 : i32
    %c0_i32_1 = arith.constant 0 : i32
    return %c0_i32, %c0_i32_0 : i32, i32
  }
}

module attributes {stable_mosaic.version = 11 : i64} {
  func.func @_projector_kernel(%arg0: memref<4x128xf32, #tpu.memory_space<vmem>>, %arg1: memref<128x128xbf16, #tpu.memory_space<vmem>>, %arg2: memref<1x128xf32, #tpu.memory_space<vmem>>, %arg3: memref<128x128xbf16, #tpu.memory_space<vmem>>, %arg4: memref<1x128xf32, #tpu.memory_space<vmem>>, %arg5: memref<128x128xbf16, #tpu.memory_space<vmem>>, %arg6: memref<1x128xf32, #tpu.memory_space<vmem>>, %arg7: memref<4x128xf32, #tpu.memory_space<vmem>>) attributes {dimension_semantics = [], scalar_prefetch = 0 : i64, scratch_operands = 0 : i64, tpu.core_type = #tpu.core_type<tc>} {
    %c0 = arith.constant 0 : index
    %c0_0 = arith.constant 0 : index
    %0 = vector.load %arg0[%c0, %c0_0] : memref<4x128xf32, #tpu.memory_space<vmem>>, vector<4x128xf32>
    %1 = arith.truncf %0 : vector<4x128xf32> to vector<4x128xbf16>
    %c0_1 = arith.constant 0 : index
    %c0_2 = arith.constant 0 : index
    %2 = vector.load %arg1[%c0_1, %c0_2] : memref<128x128xbf16, #tpu.memory_space<vmem>>, vector<128x128xbf16>
    %cst = arith.constant dense<0.000000e+00> : vector<4x128xf32>
    %3 = tpu.matmul %1, %2, %cst {dimension_numbers = #tpu.dot_dimension_numbers<[1], [0], [0], [1], [0, 0, 1, 1], [], []>} : vector<4x128xbf16>, vector<128x128xbf16>, vector<4x128xf32> -> vector<4x128xf32>
    %c0_3 = arith.constant 0 : index
    %c0_4 = arith.constant 0 : index
    %4 = vector.load %arg2[%c0_3, %c0_4] : memref<1x128xf32, #tpu.memory_space<vmem>>, vector<1x128xf32>
    %5 = vector.broadcast %4 : vector<1x128xf32> to vector<4x128xf32>
    %6 = arith.addf %3, %5 : vector<4x128xf32>
    %cst_5 = arith.constant 0.000000e+00 : f32
    %7 = vector.broadcast %cst_5 : f32 to vector<4x128xf32>
    %8 = arith.maximumf %6, %7 : vector<4x128xf32>
    %9 = arith.truncf %8 : vector<4x128xf32> to vector<4x128xbf16>
    %c0_6 = arith.constant 0 : index
    %c0_7 = arith.constant 0 : index
    %10 = vector.load %arg3[%c0_6, %c0_7] : memref<128x128xbf16, #tpu.memory_space<vmem>>, vector<128x128xbf16>
    %cst_8 = arith.constant dense<0.000000e+00> : vector<4x128xf32>
    %11 = tpu.matmul %9, %10, %cst_8 {dimension_numbers = #tpu.dot_dimension_numbers<[1], [0], [0], [1], [0, 0, 1, 1], [], []>} : vector<4x128xbf16>, vector<128x128xbf16>, vector<4x128xf32> -> vector<4x128xf32>
    %c0_9 = arith.constant 0 : index
    %c0_10 = arith.constant 0 : index
    %12 = vector.load %arg4[%c0_9, %c0_10] : memref<1x128xf32, #tpu.memory_space<vmem>>, vector<1x128xf32>
    %13 = vector.broadcast %12 : vector<1x128xf32> to vector<4x128xf32>
    %14 = arith.addf %11, %13 : vector<4x128xf32>
    %cst_11 = arith.constant 0.000000e+00 : f32
    %15 = vector.broadcast %cst_11 : f32 to vector<4x128xf32>
    %16 = arith.maximumf %14, %15 : vector<4x128xf32>
    %17 = arith.truncf %16 : vector<4x128xf32> to vector<4x128xbf16>
    %c0_12 = arith.constant 0 : index
    %c0_13 = arith.constant 0 : index
    %18 = vector.load %arg5[%c0_12, %c0_13] : memref<128x128xbf16, #tpu.memory_space<vmem>>, vector<128x128xbf16>
    %cst_14 = arith.constant dense<0.000000e+00> : vector<4x128xf32>
    %19 = tpu.matmul %17, %18, %cst_14 {dimension_numbers = #tpu.dot_dimension_numbers<[1], [0], [0], [1], [0, 0, 1, 1], [], []>} : vector<4x128xbf16>, vector<128x128xbf16>, vector<4x128xf32> -> vector<4x128xf32>
    %c0_15 = arith.constant 0 : index
    %c0_16 = arith.constant 0 : index
    %20 = vector.load %arg6[%c0_15, %c0_16] : memref<1x128xf32, #tpu.memory_space<vmem>>, vector<1x128xf32>
    %21 = vector.broadcast %20 : vector<1x128xf32> to vector<4x128xf32>
    %22 = arith.addf %19, %21 : vector<4x128xf32>
    %c0_17 = arith.constant 0 : index
    %c0_18 = arith.constant 0 : index
    %23 = vector.load %arg7[%c0_17, %c0_18] : memref<4x128xf32, #tpu.memory_space<vmem>>, vector<4x128xf32>
    tpu.vector_store %arg7[%c0_17, %c0_18], %22 {strides = array<i32>} : memref<4x128xf32, #tpu.memory_space<vmem>>, vector<4x128xf32>,
    return
  }
}

</mosaic_0001>

<bundles_post_ra>
// kernel: simclrv2_forward.8
= control target key start
LH: loop header
LB: loop body
LE: loop exit
PB: predicated region body
PF: predicated region fallthrough
CT: control target
= control target key end

     0   :  { %s671_s6 = smov 0   ;;  %s673_s7 = smov 0   ;;  %s923_s0 = inlined_call_operand.vmem [shape: f32[4,256,128], index: 0, kind: input, shape index: {}]   ;;  %s924_s1 = inlined_call_operand.vmem [shape: f32[4,128], index: 1, kind: output, shape index: {}]  }
   0x1   :  { %s675_s8 = smov 0  }
   0x2 LB: > { %s598_s9 = sadd.s32 4294967295, %s658_s8   ;;  %s688_s10 = sadd.s32 1, %s658_s8   ;;  %s658_s8 = sphi %s675_s8, %s927_s8   ;;  %s654_s7 = sphi %s673_s7, %s926_s7   ;;  %s650_s6 = sphi %s671_s6, %s925_s6  }
   0x3   : > { %s15_s11 = ssub.s32 %s658_s8, %s688_s10  ;;  %s18_s12 = sadd.s32 1, %s654_s7 }
   0x4   : > { %p16_p0 = scmp.eq.s32.totalorder %s15_s11, 0  ;;  %p25_p1 = scmp.ne.s32.totalorder %s654_s7, %s650_s6 }
   0x5   : > { %p26_p2 = scmp.eq.s32.totalorder %s658_s8, 0  ;;  %p600_p4 = scmp.ge.s32.totalorder %s658_s8, 2 }
   0x6   : > { %s697_s13 = scalar_select %p16_p0, %s654_s7, %s18_s12  }
   0x7   : > { %p27_p3 = por %p26_p2, %p25_p1  ;;  %72 = sbr.rel (%p600_p4) target bundleno = 50 (0x32), region = 16 }
   0xe   : > { %75 = sbr.rel (!%p27_p3) target bundleno = 50 (0x32), region = 20  ;;  %s77_s14 = sand.u32 (%p27_p3), 1, %s654_s7  }
   0xf   : > { %s610_s15 = sshll.u32 (%p27_p3), %s658_s8, 7  ;;  %s601_s16 = sshll.u32 (%p27_p3), %s77_s14, 9 }
  0x10   : > { %s705_s19 = scalar_lea.vmem (%p27_p3), %s923_s0, %s610_s15  ;;  %s710_s20 = scalar_lea.vmem (%p27_p3), [#allocation3], %s601_s16 }
  0x11   : > { %v236_v0 = vld [vmem:[%s705_s19] sm:$0xff] (%p27_p3)  ;;  %v238_v1 = vld [vmem:[%s705_s19 + $0x8] sm:$0xff] (%p27_p3)  ;;  %v240_v2 = vld [vmem:[%s705_s19 + $0x10] sm:$0xff] (%p27_p3) }
  0x12   : > { %237 = vst [vmem:[%s710_s20] sm:$0xff] (%p27_p3), %v236_v0  ;;  %239 = vst [vmem:[%s710_s20 + $0x8] sm:$0xff] (%p27_p3), %v238_v1  ;;  %v242_v3 = vld [vmem:[%s705_s19 + $0x18] sm:$0xff] (%p27_p3)  ;;  %v244_v4 = vld [vmem:[%s705_s19 + $0x20] sm:$0xff] (%p27_p3) }
  0x13   : > { %241 = vst [vmem:[%s710_s20 + $0x10] sm:$0xff] (%p27_p3), %v240_v2  ;;  %v246_v5 = vld [vmem:[%s705_s19 + $0x28] sm:$0xff] (%p27_p3)  ;;  %243 = vst [vmem:[%s710_s20 + $0x18] sm:$0xff] (%p27_p3), %v242_v3  ;;  %v248_v6 = vld [vmem:[%s705_s19 + $0x30] sm:$0xff] (%p27_p3) }
  0x14   : > { %245 = vst [vmem:[%s710_s20 + $0x20] sm:$0xff] (%p27_p3), %v244_v4  ;;  %247 = vst [vmem:[%s710_s20 + $0x28] sm:$0xff] (%p27_p3), %v246_v5  ;;  %v250_v7 = vld [vmem:[%s705_s19 + $0x38] sm:$0xff] (%p27_p3)  ;;  %v252_v8 = vld [vmem:[%s705_s19 + $0x40] sm:$0xff] (%p27_p3) }
  0x15   : > { %249 = vst [vmem:[%s710_s20 + $0x30] sm:$0xff] %v248_v6  ;;  %251 = vst [vmem:[%s710_s20 + $0x38] sm:$0xff] %v250_v7  ;;  %v254_v9 = vld [vmem:[%s705_s19 + $0x48] sm:$0xff]  ;;  %v256_v10 = vld [vmem:[%s705_s19 + $0x50] sm:$0xff] }
  0x16   : > { %253 = vst [vmem:[%s710_s20 + $0x40] sm:$0xff] %v252_v8  ;;  %v258_v11 = vld [vmem:[%s705_s19 + $0x58] sm:$0xff]  ;;  %255 = vst [vmem:[%s710_s20 + $0x48] sm:$0xff] %v254_v9  ;;  %v260_v12 = vld [vmem:[%s705_s19 + $0x60] sm:$0xff] }
  0x17   : > { %257 = vst [vmem:[%s710_s20 + $0x50] sm:$0xff] %v256_v10  ;;  %259 = vst [vmem:[%s710_s20 + $0x58] sm:$0xff] %v258_v11  ;;  %v262_v13 = vld [vmem:[%s705_s19 + $0x68] sm:$0xff]  ;;  %v264_v14 = vld [vmem:[%s705_s19 + $0x70] sm:$0xff] }
  0x18   : > { %261 = vst [vmem:[%s710_s20 + $0x60] sm:$0xff] %v260_v12  ;;  %263 = vst [vmem:[%s710_s20 + $0x68] sm:$0xff] %v262_v13  ;;  %v266_v15 = vld [vmem:[%s705_s19 + $0x78] sm:$0xff]  ;;  %v268_v16 = vld [vmem:[%s705_s19 + $0x100] sm:$0xff] }
  0x19   : > { %265 = vst [vmem:[%s710_s20 + $0x70] sm:$0xff] %v264_v14  ;;  %v270_v17 = vld [vmem:[%s705_s19 + $0x108] sm:$0xff]  ;;  %267 = vst [vmem:[%s710_s20 + $0x78] sm:$0xff] %v266_v15  ;;  %v272_v18 = vld [vmem:[%s705_s19 + $0x110] sm:$0xff] }
  0x1a   : > { %269 = vst [vmem:[%s710_s20 + $0x80] sm:$0xff] %v268_v16  ;;  %271 = vst [vmem:[%s710_s20 + $0x88] sm:$0xff] %v270_v17  ;;  %v274_v19 = vld [vmem:[%s705_s19 + $0x118] sm:$0xff]  ;;  %v276_v20 = vld [vmem:[%s705_s19 + $0x120] sm:$0xff] }
  0x1b   : > { %273 = vst [vmem:[%s710_s20 + $0x90] sm:$0xff] %v272_v18  ;;  %275 = vst [vmem:[%s710_s20 + $0x98] sm:$0xff] %v274_v19  ;;  %v278_v21 = vld [vmem:[%s705_s19 + $0x128] sm:$0xff]  ;;  %v280_v22 = vld [vmem:[%s705_s19 + $0x130] sm:$0xff] }
  0x1c   : > { %277 = vst [vmem:[%s710_s20 + $0xa0] sm:$0xff] %v276_v20  ;;  %v282_v23 = vld [vmem:[%s705_s19 + $0x138] sm:$0xff]  ;;  %279 = vst [vmem:[%s710_s20 + $0xa8] sm:$0xff] %v278_v21  ;;  %v284_v24 = vld [vmem:[%s705_s19 + $0x140] sm:$0xff] }
  0x1d   : > { %281 = vst [vmem:[%s710_s20 + $0xb0] sm:$0xff] %v280_v22  ;;  %283 = vst [vmem:[%s710_s20 + $0xb8] sm:$0xff] %v282_v23  ;;  %v286_v25 = vld [vmem:[%s705_s19 + $0x148] sm:$0xff]  ;;  %v288_v26 = vld [vmem:[%s705_s19 + $0x150] sm:$0xff] }
  0x1e   : > { %285 = vst [vmem:[%s710_s20 + $0xc0] sm:$0xff] %v284_v24  ;;  %287 = vst [vmem:[%s710_s20 + $0xc8] sm:$0xff] %v286_v25  ;;  %v290_v27 = vld [vmem:[%s705_s19 + $0x158] sm:$0xff]  ;;  %v292_v28 = vld [vmem:[%s705_s19 + $0x160] sm:$0xff] }
  0x1f   : > { %289 = vst [vmem:[%s710_s20 + $0xd0] sm:$0xff] %v288_v26  ;;  %v294_v29 = vld [vmem:[%s705_s19 + $0x168] sm:$0xff]  ;;  %291 = vst [vmem:[%s710_s20 + $0xd8] sm:$0xff] %v290_v27  ;;  %v296_v30 = vld [vmem:[%s705_s19 + $0x170] sm:$0xff] }
  0x20   : > { %293 = vst [vmem:[%s710_s20 + $0xe0] sm:$0xff] %v292_v28  ;;  %295 = vst [vmem:[%s710_s20 + $0xe8] sm:$0xff] %v294_v29  ;;  %v298_v31 = vld [vmem:[%s705_s19 + $0x178] sm:$0xff]  ;;  %v300_v32 = vld [vmem:[%s705_s19 + $0x200] sm:$0xff] }
  0x21   : > { %297 = vst [vmem:[%s710_s20 + $0xf0] sm:$0xff] %v296_v30  ;;  %299 = vst [vmem:[%s710_s20 + $0xf8] sm:$0xff] %v298_v31  ;;  %v302_v33 = vld [vmem:[%s705_s19 + $0x208] sm:$0xff]  ;;  %v304_v34 = vld [vmem:[%s705_s19 + $0x210] sm:$0xff] }
  0x22   : > { %301 = vst [vmem:[%s710_s20 + $0x100] sm:$0xff] %v300_v32  ;;  %v306_v35 = vld [vmem:[%s705_s19 + $0x218] sm:$0xff]  ;;  %303 = vst [vmem:[%s710_s20 + $0x108] sm:$0xff] %v302_v33  ;;  %v308_v36 = vld [vmem:[%s705_s19 + $0x220] sm:$0xff] }
  0x23   : > { %305 = vst [vmem:[%s710_s20 + $0x110] sm:$0xff] %v304_v34  ;;  %307 = vst [vmem:[%s710_s20 + $0x118] sm:$0xff] %v306_v35  ;;  %v310_v37 = vld [vmem:[%s705_s19 + $0x228] sm:$0xff]  ;;  %v312_v38 = vld [vmem:[%s705_s19 + $0x230] sm:$0xff] }
  0x24   : > { %309 = vst [vmem:[%s710_s20 + $0x120] sm:$0xff] %v308_v36  ;;  %311 = vst [vmem:[%s710_s20 + $0x128] sm:$0xff] %v310_v37  ;;  %v314_v39 = vld [vmem:[%s705_s19 + $0x238] sm:$0xff]  ;;  %v316_v40 = vld [vmem:[%s705_s19 + $0x240] sm:$0xff] }
  0x25   : > { %313 = vst [vmem:[%s710_s20 + $0x130] sm:$0xff] %v312_v38  ;;  %v318_v41 = vld [vmem:[%s705_s19 + $0x248] sm:$0xff]  ;;  %315 = vst [vmem:[%s710_s20 + $0x138] sm:$0xff] %v314_v39  ;;  %v320_v42 = vld [vmem:[%s705_s19 + $0x250] sm:$0xff] }
  0x26   : > { %317 = vst [vmem:[%s710_s20 + $0x140] sm:$0xff] %v316_v40  ;;  %319 = vst [vmem:[%s710_s20 + $0x148] sm:$0xff] %v318_v41  ;;  %v322_v43 = vld [vmem:[%s705_s19 + $0x258] sm:$0xff]  ;;  %v324_v44 = vld [vmem:[%s705_s19 + $0x260] sm:$0xff] }
  0x27   : > { %321 = vst [vmem:[%s710_s20 + $0x150] sm:$0xff] %v320_v42  ;;  %323 = vst [vmem:[%s710_s20 + $0x158] sm:$0xff] %v322_v43  ;;  %v326_v45 = vld [vmem:[%s705_s19 + $0x268] sm:$0xff]  ;;  %v328_v46 = vld [vmem:[%s705_s19 + $0x270] sm:$0xff] }
  0x28   : > { %325 = vst [vmem:[%s710_s20 + $0x160] sm:$0xff] %v324_v44  ;;  %v330_v47 = vld [vmem:[%s705_s19 + $0x278] sm:$0xff]  ;;  %327 = vst [vmem:[%s710_s20 + $0x168] sm:$0xff] %v326_v45  ;;  %v332_v48 = vld [vmem:[%s705_s19 + $0x300] sm:$0xff] }
  0x29   : > { %329 = vst [vmem:[%s710_s20 + $0x170] sm:$0xff] %v328_v46  ;;  %331 = vst [vmem:[%s710_s20 + $0x178] sm:$0xff] %v330_v47  ;;  %v334_v49 = vld [vmem:[%s705_s19 + $0x308] sm:$0xff]  ;;  %v336_v50 = vld [vmem:[%s705_s19 + $0x310] sm:$0xff] }
  0x2a   : > { %333 = vst [vmem:[%s710_s20 + $0x180] sm:$0xff] %v332_v48  ;;  %335 = vst [vmem:[%s710_s20 + $0x188] sm:$0xff] %v334_v49  ;;  %v338_v51 = vld [vmem:[%s705_s19 + $0x318] sm:$0xff]  ;;  %v340_v52 = vld [vmem:[%s705_s19 + $0x320] sm:$0xff] }
  0x2b   : > { %337 = vst [vmem:[%s710_s20 + $0x190] sm:$0xff] %v336_v50  ;;  %v342_v53 = vld [vmem:[%s705_s19 + $0x328] sm:$0xff]  ;;  %339 = vst [vmem:[%s710_s20 + $0x198] sm:$0xff] %v338_v51  ;;  %v344_v54 = vld [vmem:[%s705_s19 + $0x330] sm:$0xff] }
  0x2c   : > { %341 = vst [vmem:[%s710_s20 + $0x1a0] sm:$0xff] %v340_v52  ;;  %343 = vst [vmem:[%s710_s20 + $0x1a8] sm:$0xff] %v342_v53  ;;  %v346_v55 = vld [vmem:[%s705_s19 + $0x338] sm:$0xff]  ;;  %v348_v56 = vld [vmem:[%s705_s19 + $0x340] sm:$0xff] }
  0x2d   : > { %345 = vst [vmem:[%s710_s20 + $0x1b0] sm:$0xff] %v344_v54  ;;  %347 = vst [vmem:[%s710_s20 + $0x1b8] sm:$0xff] %v346_v55  ;;  %v350_v57 = vld [vmem:[%s705_s19 + $0x348] sm:$0xff]  ;;  %v352_v58 = vld [vmem:[%s705_s19 + $0x350] sm:$0xff] }
  0x2e   : > { %349 = vst [vmem:[%s710_s20 + $0x1c0] sm:$0xff] %v348_v56  ;;  %v354_v59 = vld [vmem:[%s705_s19 + $0x358] sm:$0xff]  ;;  %351 = vst [vmem:[%s710_s20 + $0x1c8] sm:$0xff] %v350_v57  ;;  %v356_v60 = vld [vmem:[%s705_s19 + $0x360] sm:$0xff] }
  0x2f   : > { %353 = vst [vmem:[%s710_s20 + $0x1d0] sm:$0xff] %v352_v58  ;;  %355 = vst [vmem:[%s710_s20 + $0x1d8] sm:$0xff] %v354_v59  ;;  %v358_v61 = vld [vmem:[%s705_s19 + $0x368] sm:$0xff]  ;;  %v360_v62 = vld [vmem:[%s705_s19 + $0x370] sm:$0xff] }
  0x30   : > { %357 = vst [vmem:[%s710_s20 + $0x1e0] sm:$0xff] %v356_v60  ;;  %359 = vst [vmem:[%s710_s20 + $0x1e8] sm:$0xff] %v358_v61  ;;  %v362_v63 = vld [vmem:[%s705_s19 + $0x378] sm:$0xff] }
  0x31   : > { %361 = vst [vmem:[%s710_s20 + $0x1f0] sm:$0xff] %v360_v62  ;;  %363 = vst [vmem:[%s710_s20 + $0x1f8] sm:$0xff] %v362_v63 }
  0x32 PF: > { %p604_p5 = scmp.ge.s32.totalorder %s658_s8, 1  ;;  %p368_p6 = scmp.lt.s32.totalorder %s658_s8, 3 }
  0x34   : > { %p369_p7 = pnand %p604_p5, %p368_p6 }
  0x35   : > { %s375_s21 = sand.u32 (!%p369_p7), 1, %s650_s6   ;;  %p606_p8 = scmp.ne.s32.totalorder (!%p369_p7), %s598_s9, 0 }
  0x36   : > { %372 = sbr.rel (%p369_p7) target bundleno = 133 (0x85), region = 58  ;;  %s605_s22 = sshll.u32 (!%p369_p7), %s375_s21, 9 }
  0x37   : > { %s840_s23 = scalar_lea.vmem (!%p369_p7), [#allocation3], %s605_s22 }
  0x3d   : > { %393 = sbr.rel (%p606_p8) target bundleno = 68 (0x44), region = 66  ;;  %v660_v0 = vmov (!%p606_p8), 0.0  }
  0x3e   : > { %394 = vst [vmem:[#allocation2] sm:$0xf] (!%p606_p8), %v660_v0 }
  0x44 PF: > { %v396_v1 = vld [vmem:[%s840_s23] sm:$0xff]  ;;  %v397_v2 = vld [vmem:[%s840_s23 + $0x8] sm:$0xff]  ;;  %v398_v3 = vld [vmem:[%s840_s23 + $0x10] sm:$0xff]  ;;  %vm548_vm0 = vcmask 1041409   ;;  %vm550_vm1 = vcmask 1042434   ;;  %vm552_vm2 = vcmask 1043459  }
  0x45   : > { %v460_v4 = vadd.f32 %v397_v2, %v396_v1  ;;  %v399_v5 = vld [vmem:[%s840_s23 + $0x18] sm:$0xff]  ;;  %v400_v7 = vld [vmem:[%s840_s23 + $0x20] sm:$0xff]  ;;  %v401_v10 = vld [vmem:[%s840_s23 + $0x28] sm:$0xff]  ;;  %p607_p9 = scmp.ne.s32.totalorder %s598_s9, 1 }
  0x46   : > { %v412_v8 = vld [vmem:[%s840_s23 + $0x80] sm:$0xff]  ;;  %v413_v11 = vld [vmem:[%s840_s23 + $0x88] sm:$0xff]  ;;  %v414_v12 = vld [vmem:[%s840_s23 + $0x90] sm:$0xff] }
  0x47   : > { %v461_v6 = vadd.f32 %v460_v4, %v398_v3  ;;  %v481_v14 = vadd.f32 %v413_v11, %v412_v8  ;;  %v402_v15 = vld [vmem:[%s840_s23 + $0x30] sm:$0xff]  ;;  %v415_v16 = vld [vmem:[%s840_s23 + $0x98] sm:$0xff]  ;;  %v416_v20 = vld [vmem:[%s840_s23 + $0xa0] sm:$0xff] }
  0x48   : > { %v403_v19 = vld [vmem:[%s840_s23 + $0x38] sm:$0xff]  ;;  %v428_v21 = vld [vmem:[%s840_s23 + $0x100] sm:$0xff]  ;;  %v429_v22 = vld [vmem:[%s840_s23 + $0x108] sm:$0xff] }
  0x49   : > { %v462_v9 = vadd.f32 %v461_v6, %v399_v5  ;;  %v482_v18 = vadd.f32 %v481_v14, %v414_v12  ;;  %v430_v23 = vld [vmem:[%s840_s23 + $0x110] sm:$0xff]  ;;  %v404_v26 = vld [vmem:[%s840_s23 + $0x40] sm:$0xff]  ;;  %v417_v27 = vld [vmem:[%s840_s23 + $0xa8] sm:$0xff]  ;;  %v502_v28 = vadd.f32 %v429_v22, %v428_v21 }
  0x4a   : > { %v431_v29 = vld [vmem:[%s840_s23 + $0x118] sm:$0xff]  ;;  %v405_v32 = vld [vmem:[%s840_s23 + $0x48] sm:$0xff]  ;;  %v418_v33 = vld [vmem:[%s840_s23 + $0xb0] sm:$0xff] }
  0x4b   : > { %v463_v13 = vadd.f32 %v462_v9, %v400_v7  ;;  %v483_v25 = vadd.f32 %v482_v18, %v415_v16  ;;  %v503_v34 = vadd.f32 %v502_v28, %v430_v23  ;;  %v406_v35 = vld [vmem:[%s840_s23 + $0x50] sm:$0xff]  ;;  %v432_v36 = vld [vmem:[%s840_s23 + $0x120] sm:$0xff]  ;;  %v419_v39 = vld [vmem:[%s840_s23 + $0xb8] sm:$0xff] }
  0x4c   : > { %v444_v40 = vld [vmem:[%s840_s23 + $0x180] sm:$0xff]  ;;  %v445_v41 = vld [vmem:[%s840_s23 + $0x188] sm:$0xff]  ;;  %v446_v44 = vld [vmem:[%s840_s23 + $0x190] sm:$0xff] }
  0x4d   : > { %v464_v17 = vadd.f32 %v463_v13, %v401_v10  ;;  %v484_v31 = vadd.f32 %v483_v25, %v416_v20  ;;  %v504_v42 = vadd.f32 %v503_v34, %v431_v29  ;;  %v433_v43 = vld [vmem:[%s840_s23 + $0x128] sm:$0xff]  ;;  %v523_v47 = vadd.f32 %v445_v41, %v444_v40  ;;  %v407_v48 = vld [vmem:[%s840_s23 + $0x58] sm:$0xff]  ;;  %v420_v49 = vld [vmem:[%s840_s23 + $0xc0] sm:$0xff] }
  0x4e   : > { %v447_v50 = vld [vmem:[%s840_s23 + $0x198] sm:$0xff]  ;;  %v434_v52 = vld [vmem:[%s840_s23 + $0x130] sm:$0xff]  ;;  %v408_v56 = vld [vmem:[%s840_s23 + $0x60] sm:$0xff] }
  0x4f   : > { %v465_v24 = vadd.f32 %v464_v17, %v402_v15  ;;  %v485_v38 = vadd.f32 %v484_v31, %v417_v27  ;;  %v505_v51 = vadd.f32 %v504_v42, %v432_v36  ;;  %v524_v55 = vadd.f32 %v523_v47, %v446_v44  ;;  %v421_v57 = vld [vmem:[%s840_s23 + $0xc8] sm:$0xff]  ;;  %v448_v58 = vld [vmem:[%s840_s23 + $0x1a0] sm:$0xff]  ;;  %v435_v60 = vld [vmem:[%s840_s23 + $0x138] sm:$0xff] }
  0x50   : > { %v409_v0 = vld [vmem:[%s840_s23 + $0x68] sm:$0xff]  ;;  %v422_v1 = vld [vmem:[%s840_s23 + $0xd0] sm:$0xff]  ;;  %v436_v4 = vld [vmem:[%s840_s23 + $0x140] sm:$0xff] }
  0x51   : > { %v466_v30 = vadd.f32 %v465_v24, %v403_v19  ;;  %v486_v46 = vadd.f32 %v485_v38, %v418_v33  ;;  %v506_v59 = vadd.f32 %v505_v51, %v433_v43  ;;  %v525_v63 = vadd.f32 %v524_v55, %v447_v50  ;;  %v449_v2 = vld [vmem:[%s840_s23 + $0x1a8] sm:$0xff]  ;;  %v410_v8 = vld [vmem:[%s840_s23 + $0x70] sm:$0xff]  ;;  %v423_v9 = vld [vmem:[%s840_s23 + $0xd8] sm:$0xff] }
  0x52   : > { %v450_v10 = vld [vmem:[%s840_s23 + $0x1b0] sm:$0xff]  ;;  %v437_v12 = vld [vmem:[%s840_s23 + $0x148] sm:$0xff]  ;;  %v411_v16 = vld [vmem:[%s840_s23 + $0x78] sm:$0xff] }
  0x53   : > { %v467_v37 = vadd.f32 %v466_v30, %v404_v26  ;;  %v487_v54 = vadd.f32 %v486_v46, %v419_v39  ;;  %v507_v3 = vadd.f32 %v506_v59, %v434_v52  ;;  %v526_v7 = vadd.f32 %v525_v63, %v448_v58  ;;  %v424_v17 = vld [vmem:[%s840_s23 + $0xe0] sm:$0xff]  ;;  %v451_v18 = vld [vmem:[%s840_s23 + $0x1b8] sm:$0xff]  ;;  %v438_v20 = vld [vmem:[%s840_s23 + $0x150] sm:$0xff] }
  0x54   : > { %v425_v24 = vld [vmem:[%s840_s23 + $0xe8] sm:$0xff]  ;;  %v452_v25 = vld [vmem:[%s840_s23 + $0x1c0] sm:$0xff]  ;;  %v439_v27 = vld [vmem:[%s840_s23 + $0x158] sm:$0xff] }
  0x55   : > { %v468_v45 = vadd.f32 %v467_v37, %v405_v32  ;;  %v488_v62 = vadd.f32 %v487_v54, %v420_v49  ;;  %v508_v11 = vadd.f32 %v507_v3, %v435_v60  ;;  %v527_v15 = vadd.f32 %v526_v7, %v449_v2  ;;  %v426_v31 = vld [vmem:[%s840_s23 + $0xf0] sm:$0xff]  ;;  %v453_v32 = vld [vmem:[%s840_s23 + $0x1c8] sm:$0xff]  ;;  %v440_v34 = vld [vmem:[%s840_s23 + $0x160] sm:$0xff] }
  0x56   : > { %v427_v38 = vld [vmem:[%s840_s23 + $0xf8] sm:$0xff]  ;;  %v454_v39 = vld [vmem:[%s840_s23 + $0x1d0] sm:$0xff]  ;;  %v441_v41 = vld [vmem:[%s840_s23 + $0x168] sm:$0xff] }
  0x57   : > { %v469_v53 = vadd.f32 %v468_v45, %v406_v35  ;;  %v489_v6 = vadd.f32 %v488_v62, %v421_v57  ;;  %v509_v19 = vadd.f32 %v508_v11, %v436_v4  ;;  %v528_v23 = vadd.f32 %v527_v15, %v450_v10  ;;  %v455_v45 = vld [vmem:[%s840_s23 + $0x1d8] sm:$0xff]  ;;  %v442_v47 = vld [vmem:[%s840_s23 + $0x170] sm:$0xff]  ;;  %v456_v50 = vld [vmem:[%s840_s23 + $0x1e0] sm:$0xff] }
  0x58   : > { %v443_v52 = vld [vmem:[%s840_s23 + $0x178] sm:$0xff]  ;;  %v458_v60 = vld [vmem:[%s840_s23 + $0x1f0] sm:$0xff] }
  0x59   : > { %v470_v61 = vadd.f32 %v469_v53, %v407_v48  ;;  %v490_v14 = vadd.f32 %v489_v6, %v422_v1  ;;  %v510_v26 = vadd.f32 %v509_v19, %v437_v12  ;;  %v529_v30 = vadd.f32 %v528_v23, %v451_v18  ;;  %v459_v1 = vld [vmem:[%s840_s23 + $0x1f8] sm:$0xff] }
  0x5b   : > { %v471_v5 = vadd.f32 %v470_v61, %v408_v56  ;;  %v491_v22 = vadd.f32 %v490_v14, %v423_v9  ;;  %v511_v33 = vadd.f32 %v510_v26, %v438_v20  ;;  %v530_v37 = vadd.f32 %v529_v30, %v452_v25  ;;  %v457_v56 = vld [vmem:[%s840_s23 + $0x1e8] sm:$0xff] }
  0x5d   : > { %v472_v13 = vadd.f32 %v471_v5, %v409_v0  ;;  %v492_v29 = vadd.f32 %v491_v22, %v424_v17  ;;  %v512_v40 = vadd.f32 %v511_v33, %v439_v27  ;;  %v531_v44 = vadd.f32 %v530_v37, %v453_v32  ;;  %v395_v22 = vld [vmem:[#allocation2] sm:$0xf] }
  0x5f   : > { %v473_v21 = vadd.f32 %v472_v13, %v410_v8  ;;  %v493_v36 = vadd.f32 %v492_v29, %v425_v24  ;;  %v513_v46 = vadd.f32 %v512_v40, %v440_v34  ;;  %v532_v49 = vadd.f32 %v531_v44, %v454_v39 }
  0x61   : > { %v474_v28 = vadd.f32 %v473_v21, %v411_v16  ;;  %v494_v43 = vadd.f32 %v493_v36, %v426_v31  ;;  %v514_v51 = vadd.f32 %v513_v46, %v441_v41  ;;  %v533_v55 = vadd.f32 %v532_v49, %v455_v45 }
  0x63   : > { %v475_v35 = vrot.slane %v474_v28, 4  ;;  %v495_v48 = vadd.f32 %v494_v43, %v427_v38  ;;  %v515_v57 = vadd.f32 %v514_v51, %v442_v47  ;;  %v534_v59 = vadd.f32 %v533_v55, %v456_v50 }
  0x65   : > { %v476_v42 = vadd.f32 %v475_v35, %v474_v28  ;;  %v496_v54 = vrot.slane %v495_v48, 4  ;;  %v516_v61 = vadd.f32 %v515_v57, %v443_v52  ;;  %v535_v0 = vadd.f32 %v534_v59, %v457_v56 }
  0x67   : > { %v477_v53 = vrot.slane %v476_v42, 2  ;;  %v497_v58 = vadd.f32 %v496_v54, %v495_v48  ;;  %v517_v2 = vrot.slane %v516_v61, 4  ;;  %v536_v4 = vadd.f32 %v535_v0, %v458_v60 }
  0x69   : > { %v478_v62 = vadd.f32 %v477_v53, %v476_v42  ;;  %v498_v63 = vrot.slane %v497_v58, 2  ;;  %v518_v5 = vadd.f32 %v517_v2, %v516_v61  ;;  %v537_v8 = vadd.f32 %v536_v4, %v459_v1 }
  0x6b   : > { %v499_v3 = vadd.f32 %v498_v63, %v497_v58  ;;  %v479_v6 = vrot.slane %v478_v62, 1  ;;  %v519_v9 = vrot.slane %v518_v5, 2  ;;  %v538_v10 = vrot.slane %v537_v8, 4 }
  0x6d   : > { %v500_v7 = vrot.slane %v499_v3, 1  ;;  %v520_v11 = vadd.f32 %v519_v9, %v518_v5  ;;  %v480_v12 = vadd.f32 %v479_v6, %v478_v62  ;;  %v539_v14 = vadd.f32 %v538_v10, %v537_v8 }
  0x6f   : > { %v501_v13 = vadd.f32 %v500_v7, %v499_v3  ;;  %v521_v15 = vrot.slane %v520_v11, 1  ;;  %v540_v16 = vrot.slane %v539_v14, 2 }
  0x71   : > { %v522_v17 = vadd.f32 %v521_v15, %v520_v11  ;;  %v541_v18 = vadd.f32 %v540_v16, %v539_v14  ;;  %v549_v19 = vsel %vm548_vm0, %v501_v13, %v480_v12 }
  0x73   : > { %v542_v20 = vrot.slane %v541_v18, 1  ;;  %v551_v21 = vsel %vm550_vm1, %v522_v17, %v549_v19 }
  0x74   : > { %560 = sbr.rel (%p607_p9) target bundleno = 133 (0x85), region = 70 }
  0x75   : > { %v543_v23 = vadd.f32 %v542_v20, %v541_v18 }
  0x77   : > { %v553_v24 = vsel %vm552_vm2, %v543_v23, %v551_v21 }
  0x78   : > { %v555_v25 = vadd.f32 %v553_v24, %v395_v22 }
  0x7a   : > { %556 = vst [vmem:[#allocation2] sm:$0xf] %v555_v25 }
  0x81   : > { %v561_v26 = vld [vmem:[#allocation2] sm:$0xf] }
  0x82   : > { %v562_v27 = vmul.f32 0.00390625, %v561_v26 }
  0x84   : > { %563 = vst [vmem:[%s924_s1] sm:$0xf] %v562_v27 }
  0x85 PF: > { %p8_p10 = scmp.ge.s32.totalorder %s688_s10, 4   ;;  %s925_s6 = smov %s654_s7 }
  0x86   : > { %s926_s7 = smov %s697_s13  ;;  %s927_s8 = smov %s688_s10 }
  0x87   :  { %10 = sbr.rel (!%p8_p10) target bundleno = 2 (0x2), region = 101 }

// kernel: simclrv2_forward.5
= control target key start
LH: loop header
LB: loop body
LE: loop exit
PB: predicated region body
PF: predicated region fallthrough
CT: control target
= control target key end

     0   :  { %s4462_s12 = smov 0   ;;  %s5159_s0 = inlined_call_operand.vmem [shape: f32[4,18,18,128], index: 0, kind: input, shape index: {}]   ;;  %s5160_s1 = inlined_call_operand.vmem [shape: bf16[9,128,128], index: 1, kind: input, shape index: {}]   ;;  %s5161_s2 = inlined_call_operand.vmem [shape: f32[1,128], index: 2, kind: input, shape index: {}]   ;;  %s5162_s3 = inlined_call_operand.vmem [shape: f32[4,16,16,128], index: 3, kind: output, shape index: {}]  }
   0x1 LB: > { %s3021_s13 = sadd.s32 4294967295, %s4440_s12   ;;  %p3025_p0 = scmp.ge.s32.totalorder %s4440_s12, 1  ;;  %s4440_s12 = sphi %s4462_s12, %s13_s12  }
   0x2   : > { %p137_p1 = scmp.lt.s32.totalorder %s4440_s12, 5 }
   0x4   : > { %p138_p2 = pnand %p3025_p0, %p137_p1 }
   0x5   : > { %v4354_v0 = vld [vmem:[%s5160_s1 + $0x40] sm:$0xff] (!%p138_p2)   ;;  %p161_p3 = scmp.lt.s32.totalorder (!%p138_p2), %s3021_s13, 3  ;;  %v4356_v2 = vld [vmem:[%s5160_s1 + $0x48] sm:$0xff] (!%p138_p2)   ;;  %v4358_v4 = vld [vmem:[%s5160_s1 + $0x50] sm:$0xff] (!%p138_p2)  }
   0x6   : > { %141 = sbr.rel (%p138_p2) target bundleno = 541 (0x21d), region = 32  ;;  %v4355_v1 = vld [vmem:[%s5160_s1 + $0x100] sm:$0xff] (!%p138_p2)   ;;  %3641 = vmatprep.subr.bf16.mxu1 (!%p138_p2), %v4354_v0  ;;  %v4357_v3 = vld [vmem:[%s5160_s1 + $0x108] sm:$0xff] (!%p138_p2)   ;;  %v4359_v5 = vld [vmem:[%s5160_s1 + $0x110] sm:$0xff] (!%p138_p2)  }
   0x7   : > { %3833 = vmatprep.subr.bf16.mxu0 (!%p138_p2), %v4355_v1  ;;  %3642 = vmatpush3.bf16.msra.mxu1 (!%p138_p2), %v4354_v0  ;;  %v4360_v6 = vld [vmem:[%s5160_s1 + $0x58] sm:$0xff] (!%p138_p2)   ;;  %v4362_v8 = vld [vmem:[%s5160_s1 + $0x60] sm:$0xff] (!%p138_p2)   ;;  %v4364_v10 = vld [vmem:[%s5160_s1 + $0x68] sm:$0xff] (!%p138_p2)  }
   0x8   : > { %3834 = vmatpush3.bf16.msra.mxu0 (!%p138_p2), %v4355_v1  ;;  %3643 = vmatprep.subr.bf16.mxu1 (!%p138_p2), %v4356_v2  ;;  %v4361_v7 = vld [vmem:[%s5160_s1 + $0x118] sm:$0xff] (!%p138_p2)   ;;  %v4363_v9 = vld [vmem:[%s5160_s1 + $0x120] sm:$0xff] (!%p138_p2)   ;;  %v4365_v11 = vld [vmem:[%s5160_s1 + $0x128] sm:$0xff] (!%p138_p2)  }
   0x9   : > { %3835 = vmatprep.subr.bf16.mxu0 (!%p138_p2), %v4357_v3  ;;  %v4366_v18 = vld [vmem:[%s5160_s1 + $0x70] sm:$0xff] (!%p138_p2)   ;;  %v4368_v20 = vld [vmem:[%s5160_s1 + $0x78] sm:$0xff] (!%p138_p2)   ;;  %v4370_v22 = vld [vmem:[%s5160_s1] sm:$0xff] (!%p138_p2)  }
   0xa   : > { %v4367_v19 = vld [vmem:[%s5160_s1 + $0x130] sm:$0xff] (!%p138_p2)   ;;  %v4369_v21 = vld [vmem:[%s5160_s1 + $0x138] sm:$0xff] (!%p138_p2)   ;;  %v4371_v25 = vld [vmem:[%s5160_s1 + $0x140] sm:$0xff] (!%p138_p2)  }
   0xb   : > { %3644 = vmatpush3.bf16.msra.mxu1 (!%p138_p2), %v4356_v2  ;;  %v4372_v29 = vld [vmem:[%s5160_s1 + $0x148] sm:$0xff] (!%p138_p2)   ;;  %v4374_v34 = vld [vmem:[%s5160_s1 + $0x150] sm:$0xff] (!%p138_p2)   ;;  %v4375_v40 = vld [vmem:[%s5160_s1 + $0x158] sm:$0xff] (!%p138_p2)  }
   0xc   : > { %3836 = vmatpush3.bf16.msra.mxu0 (!%p138_p2), %v4357_v3  ;;  %3645 = vmatprep.subr.bf16.mxu1 (!%p138_p2), %v4358_v4  ;;  %v4373_v31 = vld [vmem:[%s5160_s1 + $0x8] sm:$0xff] (!%p138_p2)   ;;  %v4376_v36 = vld [vmem:[%s5160_s1 + $0x10] sm:$0xff] (!%p138_p2)   ;;  %v4379_v41 = vld [vmem:[%s5160_s1 + $0x18] sm:$0xff] (!%p138_p2)  }
   0xd   : > { %s5164_s13 = smov (!%p161_p3, %s3021_s13), 3  ;;  %3837 = vmatprep.subr.bf16.mxu0 %v4359_v5  ;;  %v4377_v44 = vld [vmem:[%s5160_s1 + $0x160] sm:$0xff]   ;;  %v4378_v50 = vld [vmem:[%s5160_s1 + $0x168] sm:$0xff]   ;;  %v4380_v54 = vld [vmem:[%s5160_s1 + $0x170] sm:$0xff]  }
   0xe   : > { %s4345_s30 = smul.u32 432, %s5164_s13  ;;  %v4382_v47 = vld [vmem:[%s5160_s1 + $0x20] sm:$0xff]   ;;  %v4384_v51 = vld [vmem:[%s5160_s1 + $0x28] sm:$0xff]   ;;  %v4386_v57 = vld [vmem:[%s5160_s1 + $0x30] sm:$0xff]   ;;  %s3424_s7 = sshll.u32 %s5164_s13, 8 }
   0xf   : > { %3646 = vmatpush3.bf16.msra.mxu1 %v4358_v4  ;;  %v4381_v60 = vld [vmem:[%s5160_s1 + $0x178] sm:$0xff]   ;;  %v4383_v4 = vld [vmem:[%s5160_s1 + $0x180] sm:$0xff]   ;;  %s5087_s11 = scalar_lea.vmem %s5162_s3, %s3424_s7 }
  0x10   : > { %3838 = vmatpush3.bf16.msra.mxu0 %v4359_v5  ;;  %3647 = vmatprep.subr.bf16.mxu1 %v4360_v6  ;;  %s4506_s10 = scalar_lea.vmem %s5159_s0, %s4345_s30  ;;  %v4388_v0 = vld [vmem:[%s5160_s1 + $0x38] sm:$0xff]  }
  0x11   : > { %3839 = vmatprep.subr.bf16.mxu0 %v4361_v7  ;;  %v236_v12 = vld [vmem:[%s4506_s10 + $0x1] sm:$0xff]  ;;  %v237_v13 = vld [vmem:[%s4506_s10 + $0x9] sm:$0xff]  ;;  %v3141_v14 = vld [vmem:[%s4506_s10 + $0x19] sm:$0xff] }
  0x12   : > { %v268_v15 = vpack.c.bf16 %v237_v13, %v236_v12  ;;  %v3142_v16 = vld [vmem:[%s4506_s10 + $0x21] sm:$0xff]  ;;  %v3143_v23 = vld [vmem:[%s4506_s10 + $0x31] sm:$0xff]  ;;  %v3144_v24 = vld [vmem:[%s4506_s10 + $0x39] sm:$0xff] }
  0x13   : > { %3648 = vmatpush3.bf16.msra.mxu1 %v4360_v6  ;;  %v1364_v17 = vpack.c.bf16 %v3142_v16, %v3141_v14  ;;  %v3145_v26 = vld [vmem:[%s4506_s10 + $0x49] sm:$0xff]  ;;  %v3146_v27 = vld [vmem:[%s4506_s10 + $0x51] sm:$0xff]  ;;  %v1365_v28 = vpack.c.bf16 %v3144_v24, %v3143_v23  ;;  %v3147_v32 = vld [vmem:[%s4506_s10 + $0x61] sm:$0xff] }
  0x14   : > { %3840 = vmatpush3.bf16.msra.mxu0 %v4361_v7  ;;  %3649 = vmatprep.subr.bf16.mxu1 %v4362_v8  ;;  %v1366_v30 = vpack.c.bf16 %v3146_v27, %v3145_v26  ;;  %v3148_v33 = vld [vmem:[%s4506_s10 + $0x69] sm:$0xff]  ;;  %v3149_v35 = vld [vmem:[%s4506_s10 + $0x79] sm:$0xff]  ;;  %v3150_v37 = vld [vmem:[%s4506_s10 + $0x81] sm:$0xff] }
  0x15   : > { %3841 = vmatprep.subr.bf16.mxu0 %v4363_v9  ;;  %3657 = vmatprep.mubr.bf16.mxu1 %v268_v15  ;;  %v1367_v38 = vpack.c.bf16 %v3148_v33, %v3147_v32  ;;  %v1368_v39 = vpack.c.bf16 %v3150_v37, %v3149_v35  ;;  %v3151_v42 = vld [vmem:[%s4506_s10 + $0x91] sm:$0xff]  ;;  %v3152_v43 = vld [vmem:[%s4506_s10 + $0x99] sm:$0xff]  ;;  %v3153_v45 = vld [vmem:[%s4506_s10 + $0xa9] sm:$0xff] }
  0x16   : > { %3849 = vmatprep.mubr.bf16.mxu0 %v1364_v17  ;;  %v3154_v46 = vld [vmem:[%s4506_s10 + $0xb1] sm:$0xff]  ;;  %v1369_v48 = vpack.c.bf16 %v3152_v43, %v3151_v42  ;;  %v3155_v52 = vld [vmem:[%s4506_s10 + $0xc1] sm:$0xff]  ;;  %v3156_v53 = vld [vmem:[%s4506_s10 + $0xc9] sm:$0xff] }
  0x17   : > { %3650 = vmatpush3.bf16.msra.mxu1 %v4362_v8  ;;  %v4572_v49 = vpack.c.bf16 %v3154_v46, %v3153_v45  ;;  %v3197_v55 = vld [vmem:[%s4506_s10 + $0x1a] sm:$0xff]  ;;  %v3198_v56 = vld [vmem:[%s4506_s10 + $0x22] sm:$0xff]  ;;  %v1371_v58 = vpack.c.bf16 %v3156_v53, %v3155_v52  ;;  %v3199_v63 = vld [vmem:[%s4506_s10 + $0x32] sm:$0xff] }
  0x18   : > { %3842 = vmatpush3.bf16.msra.mxu0 %v4363_v9  ;;  %3651 = vmatprep.subr.bf16.mxu1 %v4364_v10  ;;  %v4591_v59 = vpack.c.bf16 %v3198_v56, %v3197_v55  ;;  %v254_v61 = vld [vmem:[%s4506_s10 + $0xd9] sm:$0xff]  ;;  %v255_v62 = vld [vmem:[%s4506_s10 + $0xe1] sm:$0xff]  ;;  %v256_v2 = vld [vmem:[%s4506_s10 + $0xf1] sm:$0xff] }
  0x19   : > { %3843 = vmatprep.subr.bf16.mxu0 %v4365_v11  ;;  %v3200_v1 = vld [vmem:[%s4506_s10 + $0x3a] sm:$0xff]  ;;  %v3201_v5 = vld [vmem:[%s4506_s10 + $0x4a] sm:$0xff]  ;;  %v3202_v6 = vld [vmem:[%s4506_s10 + $0x52] sm:$0xff]  ;;  %v4612_v7 = vpack.c.bf16 %v255_v62, %v254_v61 }
  0x1a   : > { %v257_v3 = vld [vmem:[%s4506_s10 + $0xf9] sm:$0xff]  ;;  %v4619_v9 = vpack.c.bf16 %v3200_v1, %v3199_v63  ;;  %v4385_v12 = vld [vmem:[%s5160_s1 + $0x188] sm:$0xff]   ;;  %v259_v14 = vld [vmem:[%s4506_s10 + $0x111] sm:$0xff] }
  0x1b   : > { %3652 = vmatpush3.bf16.msra.mxu1 %v4364_v10  ;;  %v4617_v8 = vld [vmem:[%s5160_s1 + $0x80] sm:$0xff]   ;;  %v4621_v10 = vpack.c.bf16 %v257_v3, %v256_v2  ;;  %v258_v13 = vld [vmem:[%s4506_s10 + $0x109] sm:$0xff]  ;;  %v4389_v27 = vld [vmem:[%s5160_s1 + $0x198] sm:$0xff]  }
  0x1c   : > { %3844 = vmatpush3.bf16.msra.mxu0 %v4365_v11  ;;  %3653 = vmatprep.subr.bf16.mxu1 %v4366_v18  ;;  %v4623_v11 = vpack.c.bf16 %v3202_v6, %v3201_v5  ;;  %v3203_v15 = vld [vmem:[%s4506_s10 + $0x62] sm:$0xff]  ;;  %v3204_v16 = vld [vmem:[%s4506_s10 + $0x6a] sm:$0xff]  ;;  %v262_v26 = vld [vmem:[%s4506_s10 + $0x139] sm:$0xff] }
  0x1d   : > { %3845 = vmatprep.subr.bf16.mxu0 %v4367_v19  ;;  %v4646_v23 = vpack.c.bf16 %v3204_v16, %v3203_v15  ;;  %v265_v32 = vld [vmem:[%s4506_s10 + $0x159] sm:$0xff]  ;;  %v3209_v33 = vld [vmem:[%s4506_s10 + $0xaa] sm:$0xff]  ;;  %v3211_v43 = vld [vmem:[%s4506_s10 + $0xc2] sm:$0xff] }
  0x1e   : > { %v4391_v35 = vld [vmem:[%s5160_s1 + $0x1a0] sm:$0xff]   ;;  %v4393_v42 = vld [vmem:[%s5160_s1 + $0x1a8] sm:$0xff]   ;;  %v174_v55 = vld [vmem:[%s4506_s10 + $0x18] sm:$0xff] }
  0x1f   : > { %3654 = vmatpush3.bf16.msra.mxu1 %v4366_v18  ;;  %v261_v18 = vld [vmem:[%s4506_s10 + $0x129] sm:$0xff]  ;;  %v172_v45 = vld [vmem:[%s4506_s10] sm:$0xff]  ;;  %v177_v62 = vld [vmem:[%s4506_s10 + $0x38] sm:$0xff] }
  0x20   : > { %3846 = vmatpush3.bf16.msra.mxu0 %v4367_v19  ;;  %3655 = vmatprep.subr.bf16.mxu1 %v4368_v20  ;;  %v3205_v19 = vld [vmem:[%s4506_s10 + $0x7a] sm:$0xff]  ;;  %v173_v46 = vld [vmem:[%s4506_s10 + $0x8] sm:$0xff]  ;;  %v176_v61 = vld [vmem:[%s4506_s10 + $0x30] sm:$0xff] }
  0x21   : > { %3847 = vmatprep.subr.bf16.mxu0 %v4369_v21  ;;  %v204_v53 = vpack.c.bf16 %v173_v46, %v172_v45  ;;  %v175_v56 = vld [vmem:[%s4506_s10 + $0x20] sm:$0xff]  ;;  %v3217_v63 = vld [vmem:[%s4506_s10 + $0x10a] sm:$0xff] }
  0x22   : > { %v4719_v1 = vld [vmem:[%s5160_s1 + $0x1c0] sm:$0xff]   ;;  %v4721_v2 = vpack.c.bf16 %v175_v56, %v174_v55  ;;  %v178_v6 = vld [vmem:[%s4506_s10 + $0x48] sm:$0xff] }
  0x23   : > { %3656 = vmatpush3.bf16.msra.mxu1 %v4368_v20  ;;  %v3206_v20 = vld [vmem:[%s4506_s10 + $0x82] sm:$0xff]  ;;  %v3220_v15 = vld [vmem:[%s4506_s10 + $0x12a] sm:$0xff] }
  0x24   : > { %3848 = vmatpush3.bf16.msra.mxu0 %v4369_v21  ;;  %3689 = vmatprep.subr.bf16.mxu1 %v4370_v22  ;;  %v4387_v21 = vld [vmem:[%s5160_s1 + $0x190] sm:$0xff]   ;;  %v180_v16 = vld [vmem:[%s4506_s10 + $0x60] sm:$0xff]  ;;  %v4400_v46 = vld [vmem:[%s5160_s1 + $0xa8] sm:$0xff]  }
  0x25   : > { %3881 = vmatprep.subr.bf16.mxu0 %v4371_v25  ;;  %v188_v55 = vld [vmem:[%s4506_s10 + $0xc0] sm:$0xff]  ;;  %v189_v56 = vld [vmem:[%s4506_s10 + $0xc8] sm:$0xff] }
  0x26   : > { %3658 = vmatmul.mubr.bf16.vlgmr.msra.gmra.mrb[0].mxu1 %v1364_v17  ;;  %v260_v17 = vld [vmem:[%s4506_s10 + $0x121] sm:$0xff] }
  0x27   : > { %3850 = vmatmul.mubr.bf16.vlgmr.msra.gmra.mrb[0].mxu0 %v1365_v28  ;;  %3690 = vmatpush3.bf16.msra.mxu1 %v4370_v22  ;;  %v4644_v22 = vpack.c.bf16 %v259_v14, %v258_v13  ;;  %v4648_v24 = vpack.c.bf16 %v261_v18, %v260_v17  ;;  %v4392_v13 = vld [vmem:[%s5160_s1 + $0x88] sm:$0xff]   ;;  %v3221_v18 = vld [vmem:[%s4506_s10 + $0x13a] sm:$0xff] }
  0x28   : > { %3882 = vmatpush3.bf16.msra.mxu0 %v4371_v25  ;;  %3661 = vmatprep.mubr.bf16.mxu1 %v1365_v28  ;;  %v4650_v25 = vpack.c.bf16 %v3206_v20, %v3205_v19  ;;  %v263_v28 = vld [vmem:[%s4506_s10 + $0x141] sm:$0xff]  ;;  %v4394_v19 = vld [vmem:[%s5160_s1 + $0x90] sm:$0xff]  }
  0x29   : > { %3883 = vmatprep.subr.bf16.mxu0 %v4372_v29  ;;  %3853 = vmatprep.mubr.bf16.mxu0 %v1366_v30  ;;  %v3219_v14 = vld [vmem:[%s4506_s10 + $0x122] sm:$0xff] }
  0x2a   : > { %3691 = vmatprep.subr.bf16.mxu1 %v4373_v31  ;;  %v181_v17 = vld [vmem:[%s4506_s10 + $0x68] sm:$0xff] }
  0x2b   : > { %3692 = vmatpush3.bf16.msra.mxu1 %v4373_v31  ;;  %v264_v31 = vld [vmem:[%s4506_s10 + $0x151] sm:$0xff]  ;;  %v3222_v20 = vld [vmem:[%s4506_s10 + $0x142] sm:$0xff] }
  0x2c   : > { %3884 = vmatpush3.bf16.msra.mxu0 %v4372_v29  ;;  %3693 = vmatprep.subr.bf16.mxu1 %v4376_v36  ;;  %v3207_v29 = vld [vmem:[%s4506_s10 + $0x92] sm:$0xff] }
  0x2d   : > { %3885 = vmatprep.subr.bf16.mxu0 %v4374_v34 }
  0x2e   : > { %3662 = vmatmul.mubr.bf16.gmra.mrb[4].mxu1 %v1366_v30  ;;  %v3208_v30 = vld [vmem:[%s4506_s10 + $0x9a] sm:$0xff] }
  0x2f   : > { %3854 = vmatmul.mubr.bf16.gmra.mrb[4].mxu0 %v1367_v38  ;;  %3665 = vmatprep.mubr.bf16.mxu1 %v1367_v38  ;;  %v4672_v37 = vpack.c.bf16 %v3208_v30, %v3207_v29  ;;  %v4674_v38 = vpack.c.bf16 %v265_v32, %v264_v31  ;;  %v183_v29 = vld [vmem:[%s4506_s10 + $0x80] sm:$0xff]  ;;  %v4396_v30 = vld [vmem:[%s5160_s1 + $0x98] sm:$0xff]  }
  0x30   : > { %3886 = vmatpush3.bf16.msra.mxu0 %v4374_v34  ;;  %3857 = vmatprep.mubr.bf16.mxu0 %v1368_v39  ;;  %v3210_v34 = vld [vmem:[%s4506_s10 + $0xb2] sm:$0xff]  ;;  %v3224_v32 = vld [vmem:[%s4506_s10 + $0x15a] sm:$0xff] }
  0x31   : > { %3887 = vmatprep.subr.bf16.mxu0 %v4375_v40  ;;  %3694 = vmatpush3.bf16.msra.mxu1 %v4376_v36  ;;  %v4670_v36 = vpack.c.bf16 %v263_v28, %v262_v26  ;;  %v4753_v26 = vpack.c.bf16 %v181_v17, %v180_v16  ;;  %v182_v28 = vld [vmem:[%s4506_s10 + $0x78] sm:$0xff]  ;;  %v4401_v16 = vld [vmem:[%s5160_s1 + $0x1c8] sm:$0xff]  }
  0x32   : > { %3695 = vmatprep.subr.bf16.mxu1 %v4379_v41  ;;  %v3223_v31 = vld [vmem:[%s4506_s10 + $0x152] sm:$0xff]  ;;  %v194_v17 = vld [vmem:[%s4506_s10 + $0x108] sm:$0xff] }
  0x34   : > { %3888 = vmatpush3.bf16.msra.mxu0 %v4375_v40  ;;  %v266_v40 = vld [vmem:[%s4506_s10 + $0x169] sm:$0xff] }
  0x35   : > { %3889 = vmatprep.subr.bf16.mxu0 %v4377_v44  ;;  %3696 = vmatpush3.bf16.msra.mxu1 %v4379_v41  ;;  %v267_v41 = vld [vmem:[%s4506_s10 + $0x171] sm:$0xff] }
  0x36   : > { %3666 = vmatmul.mubr.bf16.gmra.mrb[8].mxu1 %v1368_v39  ;;  %3697 = vmatprep.subr.bf16.mxu1 %v4382_v47  ;;  %v4676_v39 = vpack.c.bf16 %v3210_v34, %v3209_v33  ;;  %v184_v33 = vld [vmem:[%s4506_s10 + $0x90] sm:$0xff]  ;;  %v185_v34 = vld [vmem:[%s4506_s10 + $0x98] sm:$0xff] }
  0x37   : > { %3858 = vmatmul.mubr.bf16.gmra.mrb[8].mxu0 %v1369_v48  ;;  %3669 = vmatprep.mubr.bf16.mxu1 %v1369_v48  ;;  %v3214_v48 = vld [vmem:[%s4506_s10 + $0xe2] sm:$0xff] }
  0x38   : > { %3890 = vmatpush3.bf16.msra.mxu0 %v4377_v44  ;;  %3861 = vmatprep.mubr.bf16.mxu0 %v4572_v49  ;;  %v3212_v44 = vld [vmem:[%s4506_s10 + $0xca] sm:$0xff] }
  0x39   : > { %3891 = vmatprep.subr.bf16.mxu0 %v4378_v50  ;;  %3698 = vmatpush3.bf16.msra.mxu1 %v4382_v47  ;;  %v3213_v47 = vld [vmem:[%s4506_s10 + $0xda] sm:$0xff]  ;;  %v4698_v52 = vpack.c.bf16 %v3212_v44, %v3211_v43  ;;  %v4777_v43 = vpack.c.bf16 %v3224_v32, %v3223_v31  ;;  %v4779_v44 = vpack.c.bf16 %v185_v34, %v184_v33  ;;  %v200_v33 = vld [vmem:[%s4506_s10 + $0x150] sm:$0xff] }
  0x3a   : > { %3699 = vmatprep.subr.bf16.mxu1 %v4384_v51  ;;  %v198_v31 = vld [vmem:[%s4506_s10 + $0x138] sm:$0xff]  ;;  %v199_v32 = vld [vmem:[%s4506_s10 + $0x140] sm:$0xff] }
  0x3b   : > { %v201_v34 = vld [vmem:[%s4506_s10 + $0x158] sm:$0xff] }
  0x3c   : > { %3892 = vmatpush3.bf16.msra.mxu0 %v4378_v50  ;;  %v4395_v50 = vld [vmem:[%s5160_s1 + $0x1b0] sm:$0xff]  }
  0x3d   : > { %3893 = vmatprep.subr.bf16.mxu0 %v4380_v54  ;;  %3700 = vmatpush3.bf16.msra.mxu1 %v4384_v51  ;;  %v4696_v51 = vpack.c.bf16 %v267_v41, %v266_v40  ;;  %v3226_v40 = vld [vmem:[%s4506_s10 + $0x172] sm:$0xff]  ;;  %v4398_v41 = vld [vmem:[%s5160_s1 + $0xa0] sm:$0xff]  }
  0x3e   : > { %3670 = vmatmul.mubr.bf16.gmra.mrb[12].mxu1 %v4572_v49  ;;  %3701 = vmatprep.subr.bf16.mxu1 %v4386_v57 }
  0x3f   : > { %3862 = vmatmul.mubr.bf16.gmra.mrb[12].mxu0 %v1371_v58  ;;  %3673 = vmatprep.mubr.bf16.mxu1 %v1371_v58  ;;  %v3215_v58 = vld [vmem:[%s4506_s10 + $0xf2] sm:$0xff] }
  0x40   : > { %3894 = vmatpush3.bf16.msra.mxu0 %v4380_v54  ;;  %3897 = vmatprep.mubr.bf16.mxu0 %v4591_v59  ;;  %v4700_v54 = vpack.c.bf16 %v3214_v48, %v3213_v47  ;;  %v186_v47 = vld [vmem:[%s4506_s10 + $0xa8] sm:$0xff]  ;;  %v187_v48 = vld [vmem:[%s4506_s10 + $0xb0] sm:$0xff] }
  0x41   : > { %3895 = vmatprep.subr.bf16.mxu0 %v4381_v60  ;;  %3702 = vmatpush3.bf16.msra.mxu1 %v4386_v57  ;;  %v4397_v57 = vld [vmem:[%s5160_s1 + $0x1b8] sm:$0xff]  }
  0x42   : > { %3703 = vmatprep.subr.bf16.mxu1 %v4388_v0 }
  0x44   : > { %3896 = vmatpush3.bf16.msra.mxu0 %v4381_v60  ;;  %v3216_v60 = vld [vmem:[%s4506_s10 + $0xfa] sm:$0xff] }
  0x45   : > { %3929 = vmatprep.subr.bf16.mxu0 %v4383_v4  ;;  %3704 = vmatpush3.bf16.msra.mxu1 %v4388_v0  ;;  %v3218_v0 = vld [vmem:[%s4506_s10 + $0x112] sm:$0xff]  ;;  %v4723_v3 = vpack.c.bf16 %v3216_v60, %v3215_v58  ;;  %v4799_v58 = vpack.c.bf16 %v187_v48, %v186_v47  ;;  %v202_v47 = vld [vmem:[%s4506_s10 + $0x168] sm:$0xff] }
  0x46   : > { %3674 = vmatmul.mubr.bf16.gmra.mrb[16].mxu1 %v4612_v7  ;;  %3737 = vmatprep.subr.bf16.mxu1 %v4617_v8  ;;  %v4727_v5 = vpack.c.bf16 %v3218_v0, %v3217_v63  ;;  %v190_v63 = vld [vmem:[%s4506_s10 + $0xd8] sm:$0xff]  ;;  %v191_v0 = vld [vmem:[%s4506_s10 + $0xe0] sm:$0xff]  ;;  %v203_v48 = vld [vmem:[%s4506_s10 + $0x170] sm:$0xff] }
  0x47   : > { %3898 = vmatmul.mubr.bf16.vlgmr.msra.gmra.mrb[0].mxu0 %v4619_v9  ;;  %3677 = vmatprep.mubr.bf16.mxu1 %v4621_v10 }
  0x48   : > { %3930 = vmatpush3.bf16.msra.mxu0 %v4383_v4  ;;  %3901 = vmatprep.mubr.bf16.mxu0 %v4623_v11  ;;  %v4725_v4 = vpack.c.bf16 %v177_v62, %v176_v61  ;;  %v4801_v61 = vpack.c.bf16 %v189_v56, %v188_v55  ;;  %v4404_v62 = vld [vmem:[%s5160_s1 + $0xb8] sm:$0xff]   ;;  %v4411_v55 = vld [vmem:[%s5160_s1 + $0x1f0] sm:$0xff]   ;;  %v4874_v56 = vpack.c.bf16 %v203_v48, %v202_v47 }
  0x49   : > { %3931 = vmatprep.subr.bf16.mxu0 %v4385_v12  ;;  %v3317_v47 = vld [vmem:[%s4506_s10 + $0x91] sm:$0xff]  ;;  %v3318_v48 = vld [vmem:[%s4506_s10 + $0x99] sm:$0xff] }
  0x4c   : > { %3932 = vmatpush3.bf16.msra.mxu0 %v4385_v12  ;;  %v179_v12 = vld [vmem:[%s4506_s10 + $0x50] sm:$0xff] }
  0x4d   : > { %3933 = vmatprep.subr.bf16.mxu0 %v4387_v21 }
  0x4e   : > { %3678 = vmatmul.mubr.bf16.gmra.mrb[20].mxu1 %v4644_v22 }
  0x4f   : > { %3902 = vmatmul.mubr.bf16.gmra.mrb[4].mxu0 %v4646_v23  ;;  %3681 = vmatprep.mubr.bf16.mxu1 %v4648_v24 }
  0x50   : > { %3905 = vmatprep.mubr.bf16.mxu0 %v4650_v25  ;;  %3934 = vmatpush3.bf16.msra.mxu0 %v4387_v21  ;;  %v4749_v21 = vpack.c.bf16 %v179_v12, %v178_v6  ;;  %v192_v6 = vld [vmem:[%s4506_s10 + $0xf0] sm:$0xff]  ;;  %v193_v12 = vld [vmem:[%s4506_s10 + $0xf8] sm:$0xff] }
  0x51   : > { %3935 = vmatprep.subr.bf16.mxu0 %v4389_v27 }
  0x54   : > { %3936 = vmatpush3.bf16.msra.mxu0 %v4389_v27  ;;  %v4755_v27 = vpack.c.bf16 %v3222_v20, %v3221_v18  ;;  %v195_v18 = vld [vmem:[%s4506_s10 + $0x110] sm:$0xff]  ;;  %v197_v20 = vld [vmem:[%s4506_s10 + $0x128] sm:$0xff] }
  0x55   : > { %3937 = vmatprep.subr.bf16.mxu0 %v4391_v35 }
  0x56   : > { %3682 = vmatmul.mubr.bf16.gmra.mrb[24].mxu1 %v4670_v36 }
  0x57   : > { %3906 = vmatmul.mubr.bf16.gmra.mrb[8].mxu0 %v4672_v37  ;;  %3685 = vmatprep.mubr.bf16.mxu1 %v4674_v38 }
  0x58   : > { %3909 = vmatprep.mubr.bf16.mxu0 %v4676_v39  ;;  %3938 = vmatpush3.bf16.msra.mxu0 %v4391_v35  ;;  %v3225_v35 = vld [vmem:[%s4506_s10 + $0x16a] sm:$0xff] }
  0x59   : > { %3939 = vmatprep.subr.bf16.mxu0 %v4393_v42  ;;  %v4781_v45 = vpack.c.bf16 %v3226_v40, %v3225_v35  ;;  %v4407_v35 = vld [vmem:[%s5160_s1 + $0x1e0] sm:$0xff]   ;;  %v4856_v40 = vpack.c.bf16 %v199_v32, %v198_v31  ;;  %v3314_v32 = vld [vmem:[%s4506_s10 + $0x69] sm:$0xff] }
  0x5a   : > { %v3313_v31 = vld [vmem:[%s4506_s10 + $0x61] sm:$0xff] }
  0x5c   : > { %3940 = vmatpush3.bf16.msra.mxu0 %v4393_v42  ;;  %v4775_v42 = vpack.c.bf16 %v183_v29, %v182_v28  ;;  %v4403_v28 = vld [vmem:[%s5160_s1 + $0x1d0] sm:$0xff]   ;;  %v4838_v29 = vpack.c.bf16 %v195_v18, %v194_v17  ;;  %v3310_v18 = vld [vmem:[%s4506_s10 + $0x39] sm:$0xff] }
  0x5d   : > { %3941 = vmatprep.subr.bf16.mxu0 %v4395_v50  ;;  %v3309_v17 = vld [vmem:[%s4506_s10 + $0x31] sm:$0xff] }
  0x5e   : > { %3686 = vmatmul.mubr.bf16.gmra.mrb[28].mxu1 %v4696_v51 }
  0x5f   : > { %3910 = vmatmul.mubr.bf16.gmra.mrb[12].mxu0 %v4698_v52  ;;  %3705 = vmatprep.mubr.bf16.mxu1 %v204_v53  ;;  %v3228_v53 = vld [vmem:[%s4506_s10 + $0x18a] sm:$0xff] }
  0x60   : > { %3913 = vmatprep.mubr.bf16.mxu0 %v4700_v54  ;;  %3942 = vmatpush3.bf16.msra.mxu0 %v4395_v50  ;;  %v3227_v50 = vld [vmem:[%s4506_s10 + $0x182] sm:$0xff] }
  0x61   : > { %3943 = vmatprep.subr.bf16.mxu0 %v4397_v57  ;;  %v1685_v60 = vpack.c.bf16 %v3228_v53, %v3227_v50  ;;  %v719_v50 = vld [vmem:[%s4506_s10 + $0x2] sm:$0xff]  ;;  %v720_v53 = vld [vmem:[%s4506_s10 + $0xa] sm:$0xff] }
  0x64   : > { %3944 = vmatpush3.bf16.msra.mxu0 %v4397_v57  ;;  %v4402_v57 = vld [vmem:[%s5160_s1 + $0xb0] sm:$0xff]  }
  0x65   : > { %3977 = vmatprep.subr.bf16.mxu0 %v4719_v1 }
  0x66   : > { %3706 = vmatmul.mubr.bf16.vlgmr.msra.gmra.mrb[0].mxu1 %v4721_v2 }
  0x67   : > { %3914 = vmatmul.mubr.bf16.gmra.mrb[16].mxu0 %v4723_v3  ;;  %3738 = vmatpush3.bf16.msra.mxu1 %v4617_v8  ;;  %v4751_v8 = vpack.c.bf16 %v3220_v15, %v3219_v14  ;;  %v4818_v14 = vpack.c.bf16 %v191_v0, %v190_v63  ;;  %v4820_v15 = vpack.c.bf16 %v193_v12, %v192_v6  ;;  %v4408_v63 = vld [vmem:[%s5160_s1 + $0xc8] sm:$0xff]   ;;  %v4410_v0 = vld [vmem:[%s5160_s1 + $0xd0] sm:$0xff]   ;;  %v4414_v12 = vld [vmem:[%s5160_s1 + $0xe0] sm:$0xff]  }
  0x68   : > { %3709 = vmatprep.mubr.bf16.mxu1 %v4725_v4  ;;  %3917 = vmatprep.mubr.bf16.mxu0 %v4727_v5  ;;  %v3282_v6 = vld [vmem:[%s4506_s10 + $0x188] sm:$0xff] }
  0x69   : > { %3739 = vmatprep.subr.bf16.mxu1 %v4392_v13 }
  0x6b   : > { %3740 = vmatpush3.bf16.msra.mxu1 %v4392_v13  ;;  %v4816_v13 = vld [vmem:[%s5160_s1 + $0xc0] sm:$0xff]  }
  0x6c   : > { %3741 = vmatprep.subr.bf16.mxu1 %v4394_v19 }
  0x6e   : > { %3710 = vmatmul.mubr.bf16.gmra.mrb[4].mxu1 %v4749_v21 }
  0x6f   : > { %3918 = vmatmul.mubr.bf16.gmra.mrb[20].mxu0 %v4751_v8  ;;  %3713 = vmatprep.mubr.bf16.mxu1 %v4753_v26 }
  0x70   : > { %3921 = vmatprep.mubr.bf16.mxu0 %v4755_v27  ;;  %3742 = vmatpush3.bf16.msra.mxu1 %v4394_v19  ;;  %v196_v19 = vld [vmem:[%s4506_s10 + $0x120] sm:$0xff] }
  0x71   : > { %3743 = vmatprep.subr.bf16.mxu1 %v4396_v30 }
  0x74   : > { %3744 = vmatpush3.bf16.msra.mxu1 %v4396_v30  ;;  %v4840_v30 = vpack.c.bf16 %v197_v20, %v196_v19  ;;  %v2283_v20 = vpack.c.bf16 %v3310_v18, %v3309_v17  ;;  %v3377_v17 = vld [vmem:[%s4506_s10 + $0xc2] sm:$0xff]  ;;  %v3378_v18 = vld [vmem:[%s4506_s10 + $0xca] sm:$0xff] }
  0x75   : > { %3745 = vmatprep.subr.bf16.mxu1 %v4398_v41 }
  0x76   : > { %3714 = vmatmul.mubr.bf16.gmra.mrb[8].mxu1 %v4775_v42 }
  0x77   : > { %3922 = vmatmul.mubr.bf16.gmra.mrb[24].mxu0 %v4777_v43  ;;  %3717 = vmatprep.mubr.bf16.mxu1 %v4779_v44 }
  0x78   : > { %3925 = vmatprep.mubr.bf16.mxu0 %v4781_v45  ;;  %3746 = vmatpush3.bf16.msra.mxu1 %v4398_v41  ;;  %v4858_v41 = vpack.c.bf16 %v201_v34, %v200_v33  ;;  %v2285_v34 = vpack.c.bf16 %v3314_v32, %v3313_v31 }
  0x79   : > { %3747 = vmatprep.subr.bf16.mxu1 %v4400_v46 }
  0x7c   : > { %3748 = vmatpush3.bf16.msra.mxu1 %v4400_v46  ;;  %v4409_v46 = vld [vmem:[%s5160_s1 + $0x1e8] sm:$0xff]  }
  0x7d   : > { %3749 = vmatprep.subr.bf16.mxu1 %v4402_v57 }
  0x7e   : > { %3718 = vmatmul.mubr.bf16.gmra.mrb[12].mxu1 %v4799_v58 }
  0x7f   : > { %3926 = vmatmul.mubr.bf16.gmra.mrb[28].mxu0 %v1685_v60  ;;  %3721 = vmatprep.mubr.bf16.mxu1 %v4801_v61  ;;  %v4413_v60 = vld [vmem:[%s5160_s1 + $0x1f8] sm:$0xff]  }
  0x80   : > { %3945 = vmatprep.mubr.bf16.mxu0 %v4725_v4  ;;  %3750 = vmatpush3.bf16.msra.mxu1 %v4402_v57  ;;  %v751_v57 = vpack.c.bf16 %v720_v53, %v719_v50  ;;  %v4419_v50 = vld [vmem:[%s5160_s1 + $0x210] sm:$0xff]  }
  0x81   : > { %3751 = vmatprep.subr.bf16.mxu1 %v4404_v62 }
  0x84   : > { %3752 = vmatpush3.bf16.msra.mxu1 %v4404_v62  ;;  %v4415_v62 = vld [vmem:[%s5160_s1 + $0x200] sm:$0xff]  }
  0x85   : > { %3785 = vmatprep.subr.bf16.mxu1 %v4816_v13 }
  0x86   : > { %3722 = vmatmul.mubr.bf16.gmra.mrb[16].mxu1 %v4818_v14 }
  0x87   : > { %3946 = vmatmul.mubr.bf16.vlgmr.msra.gmra.mrb[0].mxu0 %v4749_v21  ;;  %3725 = vmatprep.mubr.bf16.mxu1 %v4820_v15 }
  0x88   : > { %3978 = vmatpush3.bf16.msra.mxu0 %v4719_v1  ;;  %3949 = vmatprep.mubr.bf16.mxu0 %v4753_v26  ;;  %v4405_v1 = vld [vmem:[%s5160_s1 + $0x1d8] sm:$0xff]  }
  0x89   : > { %3979 = vmatprep.subr.bf16.mxu0 %v4401_v16 }
  0x8c   : > { %3980 = vmatpush3.bf16.msra.mxu0 %v4401_v16  ;;  %v3284_v16 = vld [vmem:[%s4506_s10 + $0x1a0] sm:$0xff] }
  0x8d   : > { %3981 = vmatprep.subr.bf16.mxu0 %v4403_v28 }
  0x8e   : > { %3726 = vmatmul.mubr.bf16.gmra.mrb[20].mxu1 %v4838_v29 }
  0x8f   : > { %3950 = vmatmul.mubr.bf16.gmra.mrb[4].mxu0 %v4775_v42  ;;  %3729 = vmatprep.mubr.bf16.mxu1 %v4840_v30 }
  0x90   : > { %3953 = vmatprep.mubr.bf16.mxu0 %v4779_v44  ;;  %3982 = vmatpush3.bf16.msra.mxu0 %v4403_v28  ;;  %v3311_v28 = vld [vmem:[%s4506_s10 + $0x49] sm:$0xff] }
  0x91   : > { %3983 = vmatprep.subr.bf16.mxu0 %v4405_v1 }
  0x94   : > { %3984 = vmatpush3.bf16.msra.mxu0 %v4405_v1  ;;  %v3312_v1 = vld [vmem:[%s4506_s10 + $0x51] sm:$0xff] }
  0x95   : > { %3985 = vmatprep.subr.bf16.mxu0 %v4407_v35  ;;  %v2284_v33 = vpack.c.bf16 %v3312_v1, %v3311_v28  ;;  %v3381_v28 = vld [vmem:[%s4506_s10 + $0xf2] sm:$0xff]  ;;  %v3382_v1 = vld [vmem:[%s4506_s10 + $0xfa] sm:$0xff] }
  0x96   : > { %3730 = vmatmul.mubr.bf16.gmra.mrb[24].mxu1 %v4856_v40  ;;  %v2597_v32 = vpack.c.bf16 %v3382_v1, %v3381_v28 }
  0x97   : > { %3954 = vmatmul.mubr.bf16.gmra.mrb[8].mxu0 %v4799_v58  ;;  %3733 = vmatprep.mubr.bf16.mxu1 %v4858_v41 }
  0x98   : > { %3957 = vmatprep.mubr.bf16.mxu0 %v4801_v61  ;;  %3986 = vmatpush3.bf16.msra.mxu0 %v4407_v35  ;;  %v3315_v35 = vld [vmem:[%s4506_s10 + $0x79] sm:$0xff] }
  0x99   : > { %3987 = vmatprep.subr.bf16.mxu0 %v4409_v46 }
  0x9c   : > { %3988 = vmatpush3.bf16.msra.mxu0 %v4409_v46  ;;  %v3316_v46 = vld [vmem:[%s4506_s10 + $0x81] sm:$0xff] }
  0x9d   : > { %3989 = vmatprep.subr.bf16.mxu0 %v4411_v55  ;;  %v2286_v53 = vpack.c.bf16 %v3316_v46, %v3315_v35  ;;  %v3162_v35 = vld [vmem:[%s4506_s10 + $0x111] sm:$0xff]  ;;  %v3385_v46 = vld [vmem:[%s4506_s10 + $0x122] sm:$0xff] }
  0x9e   : > { %3734 = vmatmul.mubr.bf16.gmra.mrb[28].mxu1 %v4874_v56 }
  0x9f   : > { %3958 = vmatmul.mubr.bf16.gmra.mrb[12].mxu0 %v4818_v14  ;;  %3753 = vmatprep.mubr.bf16.mxu1 %v751_v57  ;;  %v3322_v57 = vld [vmem:[%s4506_s10 + $0xc9] sm:$0xff] }
  0xa0   : > { %3961 = vmatprep.mubr.bf16.mxu0 %v4820_v15  ;;  %3990 = vmatpush3.bf16.msra.mxu0 %v4411_v55  ;;  %v2287_v55 = vpack.c.bf16 %v3318_v48, %v3317_v47  ;;  %v3386_v47 = vld [vmem:[%s4506_s10 + $0x12a] sm:$0xff] }
  0xa1   : > { %3991 = vmatprep.subr.bf16.mxu0 %v4413_v60 }
  0xa4   : > { %3992 = vmatpush3.bf16.msra.mxu0 %v4413_v60  ;;  %v4422_v60 = vld [vmem:[%s5160_s1 + $0x220] sm:$0xff]  }
  0xa5   : > { %4025 = vmatprep.subr.bf16.mxu0 %v4415_v62 }
  0xa6   : > { %3754 = vmatmul.mubr.bf16.vlgmr.msra.gmra.mrb[0].mxu1 %v4591_v59  ;;  %v4412_v59 = vld [vmem:[%s5160_s1 + $0xd8] sm:$0xff]  }
  0xa7   : > { %3962 = vmatmul.mubr.bf16.gmra.mrb[16].mxu0 %v4838_v29  ;;  %3786 = vmatpush3.bf16.msra.mxu1 %v4816_v13 }
  0xa8   : > { %3757 = vmatprep.mubr.bf16.mxu1 %v4619_v9  ;;  %3965 = vmatprep.mubr.bf16.mxu0 %v4840_v30  ;;  %v3281_v9 = vld [vmem:[%s4506_s10 + $0x180] sm:$0xff] }
  0xa9   : > { %3787 = vmatprep.subr.bf16.mxu1 %v4408_v63  ;;  %v4908_v13 = vpack.c.bf16 %v3282_v6, %v3281_v9  ;;  %v3372_v6 = vld [vmem:[%s4506_s10 + $0x82] sm:$0xff] }
  0xab   : > { %3788 = vmatpush3.bf16.msra.mxu1 %v4408_v63  ;;  %v4423_v63 = vld [vmem:[%s5160_s1 + $0x228] sm:$0xff]  }
  0xac   : > { %3789 = vmatprep.subr.bf16.mxu1 %v4410_v0 }
  0xae   : > { %3758 = vmatmul.mubr.bf16.gmra.mrb[4].mxu1 %v4623_v11  ;;  %v4416_v11 = vld [vmem:[%s5160_s1 + $0xe8] sm:$0xff]  }
  0xaf   : > { %3966 = vmatmul.mubr.bf16.gmra.mrb[20].mxu0 %v4856_v40  ;;  %3761 = vmatprep.mubr.bf16.mxu1 %v4646_v23  ;;  %v3283_v23 = vld [vmem:[%s4506_s10 + $0x198] sm:$0xff] }
  0xb0   : > { %3969 = vmatprep.mubr.bf16.mxu0 %v4858_v41  ;;  %3790 = vmatpush3.bf16.msra.mxu1 %v4410_v0  ;;  %v1992_v19 = vpack.c.bf16 %v3284_v16, %v3283_v23  ;;  %v3370_v0 = vld [vmem:[%s4506_s10 + $0x6a] sm:$0xff] }
  0xb1   : > { %3791 = vmatprep.subr.bf16.mxu1 %v4412_v59 }
  0xb4   : > { %3792 = vmatpush3.bf16.msra.mxu1 %v4412_v59  ;;  %v4433_v59 = vld [vmem:[%s5160_s1 + $0x138] sm:$0xff]  }
  0xb5   : > { %3793 = vmatprep.subr.bf16.mxu1 %v4414_v12 }
  0xb6   : > { %3762 = vmatmul.mubr.bf16.gmra.mrb[8].mxu1 %v4650_v25  ;;  %v4418_v25 = vld [vmem:[%s5160_s1 + $0xf0] sm:$0xff]  }
  0xb7   : > { %3970 = vmatmul.mubr.bf16.gmra.mrb[24].mxu0 %v4874_v56  ;;  %3765 = vmatprep.mubr.bf16.mxu1 %v4672_v37  ;;  %v4420_v37 = vld [vmem:[%s5160_s1 + $0xf8] sm:$0xff]  }
  0xb8   : > { %3973 = vmatprep.mubr.bf16.mxu0 %v4908_v13  ;;  %3794 = vmatpush3.bf16.msra.mxu1 %v4414_v12  ;;  %v3373_v12 = vld [vmem:[%s4506_s10 + $0x92] sm:$0xff] }
  0xb9   : > { %3795 = vmatprep.subr.bf16.mxu1 %v4416_v11 }
  0xbc   : > { %3796 = vmatpush3.bf16.msra.mxu1 %v4416_v11  ;;  %v3374_v11 = vld [vmem:[%s4506_s10 + $0x9a] sm:$0xff] }
  0xbd   : > { %3797 = vmatprep.subr.bf16.mxu1 %v4418_v25  ;;  %v2593_v16 = vpack.c.bf16 %v3374_v11, %v3373_v12 }
  0xbe   : > { %3766 = vmatmul.mubr.bf16.gmra.mrb[12].mxu1 %v4676_v39  ;;  %v4417_v39 = vld [vmem:[%s5160_s1 + $0x208] sm:$0xff]  }
  0xbf   : > { %3974 = vmatmul.mubr.bf16.gmra.mrb[28].mxu0 %v1992_v19  ;;  %3769 = vmatprep.mubr.bf16.mxu1 %v4698_v52  ;;  %v4426_v52 = vld [vmem:[%s5160_s1 + $0x100] sm:$0xff]   ;;  %v2595_v19 = vpack.c.bf16 %v3378_v18, %v3377_v17 }
  0xc0   : > { %3993 = vmatprep.mubr.bf16.mxu0 %v2283_v20  ;;  %3798 = vmatpush3.bf16.msra.mxu1 %v4418_v25  ;;  %v3157_v20 = vld [vmem:[%s4506_s10 + $0xd9] sm:$0xff] }
  0xc1   : > { %3799 = vmatprep.subr.bf16.mxu1 %v4420_v37 }
  0xc4   : > { %3800 = vmatpush3.bf16.msra.mxu1 %v4420_v37  ;;  %v3158_v37 = vld [vmem:[%s4506_s10 + $0xe1] sm:$0xff] }
  0xc5   : > { %4073 = vmatprep.subr.bf16.mxu1 %v4426_v52 }
  0xc6   : > { %3770 = vmatmul.mubr.bf16.gmra.mrb[16].mxu1 %v4700_v54  ;;  %v4421_v54 = vld [vmem:[%s5160_s1 + $0x218] sm:$0xff]  }
  0xc7   : > { %3994 = vmatmul.mubr.bf16.vlgmr.msra.gmra.mrb[0].mxu0 %v2284_v33  ;;  %3773 = vmatprep.mubr.bf16.mxu1 %v4723_v3  ;;  %v3321_v3 = vld [vmem:[%s4506_s10 + $0xc1] sm:$0xff]  ;;  %v3160_v33 = vld [vmem:[%s4506_s10 + $0xf9] sm:$0xff] }
  0xc8   : > { %4026 = vmatpush3.bf16.msra.mxu0 %v4415_v62  ;;  %3997 = vmatprep.mubr.bf16.mxu0 %v2285_v34  ;;  %v2289_v62 = vpack.c.bf16 %v3322_v57, %v3321_v3  ;;  %v3383_v34 = vld [vmem:[%s4506_s10 + $0x10a] sm:$0xff]  ;;  %v3387_v3 = vld [vmem:[%s4506_s10 + $0x13a] sm:$0xff]  ;;  %v3388_v57 = vld [vmem:[%s4506_s10 + $0x142] sm:$0xff] }
  0xc9   : > { %4027 = vmatprep.subr.bf16.mxu0 %v4417_v39 }
  0xcc   : > { %4028 = vmatpush3.bf16.msra.mxu0 %v4417_v39  ;;  %v3384_v39 = vld [vmem:[%s4506_s10 + $0x112] sm:$0xff] }
  0xcd   : > { %4029 = vmatprep.subr.bf16.mxu0 %v4419_v50  ;;  %v2598_v48 = vpack.c.bf16 %v3384_v39, %v3383_v34 }
  0xce   : > { %3774 = vmatmul.mubr.bf16.gmra.mrb[20].mxu1 %v4727_v5  ;;  %v4424_v5 = vld [vmem:[%s5160_s1 + $0x230] sm:$0xff]  }
  0xcf   : > { %3998 = vmatmul.mubr.bf16.gmra.mrb[4].mxu0 %v2286_v53  ;;  %3777 = vmatprep.mubr.bf16.mxu1 %v4751_v8  ;;  %v4425_v8 = vld [vmem:[%s5160_s1 + $0x238] sm:$0xff]   ;;  %v2599_v53 = vpack.c.bf16 %v3386_v47, %v3385_v46 }
  0xd0   : > { %4001 = vmatprep.mubr.bf16.mxu0 %v2287_v55  ;;  %4030 = vmatpush3.bf16.msra.mxu0 %v4419_v50  ;;  %v3163_v55 = vld [vmem:[%s4506_s10 + $0x121] sm:$0xff] }
  0xd1   : > { %4031 = vmatprep.subr.bf16.mxu0 %v4421_v54 }
  0xd4   : > { %4032 = vmatpush3.bf16.msra.mxu0 %v4421_v54  ;;  %v3164_v54 = vld [vmem:[%s4506_s10 + $0x129] sm:$0xff] }
  0xd5   : > { %4033 = vmatprep.subr.bf16.mxu0 %v4422_v60 }
  0xd6   : > { %3778 = vmatmul.mubr.bf16.gmra.mrb[24].mxu1 %v4755_v27  ;;  %v4431_v27 = vld [vmem:[%s5160_s1 + $0x128] sm:$0xff]  }
  0xd7   : > { %4002 = vmatmul.mubr.bf16.gmra.mrb[8].mxu0 %v4572_v49  ;;  %3781 = vmatprep.mubr.bf16.mxu1 %v4777_v43  ;;  %v4427_v49 = vld [vmem:[%s5160_s1 + $0x108] sm:$0xff]   ;;  %v4432_v43 = vld [vmem:[%s5160_s1 + $0x130] sm:$0xff]  }
  0xd8   : > { %4005 = vmatprep.mubr.bf16.mxu0 %v2289_v62  ;;  %4034 = vmatpush3.bf16.msra.mxu0 %v4422_v60  ;;  %v3165_v60 = vld [vmem:[%s4506_s10 + $0x139] sm:$0xff]  ;;  %v3166_v62 = vld [vmem:[%s4506_s10 + $0x141] sm:$0xff] }
  0xd9   : > { %4035 = vmatprep.subr.bf16.mxu0 %v4423_v63 }
  0xdc   : > { %4036 = vmatpush3.bf16.msra.mxu0 %v4423_v63  ;;  %v3389_v63 = vld [vmem:[%s4506_s10 + $0x152] sm:$0xff] }
  0xdd   : > { %4037 = vmatprep.subr.bf16.mxu0 %v4424_v5 }
  0xde   : > { %3782 = vmatmul.mubr.bf16.gmra.mrb[28].mxu1 %v4781_v45  ;;  %v3368_v45 = vld [vmem:[%s4506_s10 + $0x52] sm:$0xff] }
  0xdf   : > { %4006 = vmatmul.mubr.bf16.gmra.mrb[12].mxu0 %v4612_v7  ;;  %3801 = vmatprep.mubr.bf16.mxu1 %v4721_v2  ;;  %v4428_v7 = vld [vmem:[%s5160_s1 + $0x110] sm:$0xff]  }
  0xe0   : > { %4009 = vmatprep.mubr.bf16.mxu0 %v4621_v10  ;;  %4038 = vmatpush3.bf16.msra.mxu0 %v4424_v5  ;;  %v3337_v10 = vld [vmem:[%s4506_s10 + $0x181] sm:$0xff] }
  0xe1   : > { %4039 = vmatprep.subr.bf16.mxu0 %v4425_v8  ;;  %v3390_v5 = vld [vmem:[%s4506_s10 + $0x15a] sm:$0xff] }
  0xe4   : > { %4040 = vmatpush3.bf16.msra.mxu0 %v4425_v8  ;;  %v1375_v8 = vpack.c.bf16 %v3164_v54, %v3163_v55 }
  0xe6   : > { %3802 = vmatmul.mubr.bf16.vlgmr.msra.gmra.mrb[0].mxu1 %v4725_v4  ;;  %v3340_v4 = vld [vmem:[%s4506_s10 + $0x1a1] sm:$0xff] }
  0xe7   : > { %4010 = vmatmul.mubr.bf16.gmra.mrb[16].mxu0 %v4644_v22  ;;  %4081 = vmatpush3.bf16.msra.mxu1 %v4426_v52  ;;  %v3338_v22 = vld [vmem:[%s4506_s10 + $0x189] sm:$0xff] }
  0xe8   : > { %3805 = vmatprep.mubr.bf16.mxu1 %v4749_v21  ;;  %4013 = vmatprep.mubr.bf16.mxu0 %v4648_v24  ;;  %v4429_v24 = vld [vmem:[%s5160_s1 + $0x118] sm:$0xff]   ;;  %v4993_v2 = vpack.c.bf16 %v3338_v22, %v3337_v10  ;;  %v3161_v52 = vld [vmem:[%s4506_s10 + $0x109] sm:$0xff]  ;;  %v2601_v10 = vpack.c.bf16 %v3390_v5, %v3389_v63 }
  0xe9   : > { %4074 = vmatprep.subr.bf16.mxu1 %v4427_v49  ;;  %v3365_v21 = vld [vmem:[%s4506_s10 + $0x32] sm:$0xff]  ;;  %v1374_v50 = vpack.c.bf16 %v3162_v35, %v3161_v52 }
  0xea   : > { %v3167_v22 = vld [vmem:[%s4506_s10 + $0x151] sm:$0xff] }
  0xeb   : > { %4082 = vmatpush3.bf16.msra.mxu1 %v4427_v49  ;;  %v2600_v49 = vpack.c.bf16 %v3388_v57, %v3387_v3 }
  0xec   : > { %4075 = vmatprep.subr.bf16.mxu1 %v4428_v7 }
  0xee   : > { %3806 = vmatmul.mubr.bf16.gmra.mrb[4].mxu1 %v4753_v26  ;;  %v3366_v26 = vld [vmem:[%s4506_s10 + $0x3a] sm:$0xff] }
  0xef   : > { %4014 = vmatmul.mubr.bf16.gmra.mrb[20].mxu0 %v4670_v36  ;;  %3809 = vmatprep.mubr.bf16.mxu1 %v4775_v42  ;;  %v4430_v36 = vld [vmem:[%s5160_s1 + $0x120] sm:$0xff]  }
  0xf0   : > { %4017 = vmatprep.mubr.bf16.mxu0 %v4674_v38  ;;  %4083 = vmatpush3.bf16.msra.mxu1 %v4428_v7  ;;  %v3339_v38 = vld [vmem:[%s4506_s10 + $0x199] sm:$0xff]  ;;  %v1376_v7 = vpack.c.bf16 %v3166_v62, %v3165_v60 }
  0xf1   : > { %4076 = vmatprep.subr.bf16.mxu1 %v4429_v24  ;;  %v2298_v42 = vpack.c.bf16 %v3340_v4, %v3339_v38  ;;  %v3392_v38 = vld [vmem:[%s4506_s10 + $0x172] sm:$0xff]  ;;  %v3169_v4 = vld [vmem:[%s4506_s10 + $0x169] sm:$0xff] }
  0xf4   : > { %4084 = vmatpush3.bf16.msra.mxu1 %v4429_v24  ;;  %v3168_v24 = vld [vmem:[%s4506_s10 + $0x159] sm:$0xff] }
  0xf5   : > { %4077 = vmatprep.subr.bf16.mxu1 %v4430_v36 }
  0xf6   : > { %3810 = vmatmul.mubr.bf16.gmra.mrb[8].mxu1 %v4779_v44  ;;  %v3367_v44 = vld [vmem:[%s4506_s10 + $0x4a] sm:$0xff] }
  0xf7   : > { %4018 = vmatmul.mubr.bf16.gmra.mrb[24].mxu0 %v4696_v51  ;;  %3813 = vmatprep.mubr.bf16.mxu1 %v4799_v58  ;;  %v2589_v51 = vpack.c.bf16 %v3366_v26, %v3365_v21  ;;  %v3369_v58 = vld [vmem:[%s4506_s10 + $0x62] sm:$0xff]  ;;  %v2590_v9 = vpack.c.bf16 %v3368_v45, %v3367_v44  ;;  %v3170_v21 = vld [vmem:[%s4506_s10 + $0x171] sm:$0xff]  ;;  %v3395_v45 = vld [vmem:[%s4506_s10 + $0x19a] sm:$0xff] }
  0xf8   : > { %4021 = vmatprep.mubr.bf16.mxu0 %v4993_v2  ;;  %4085 = vmatpush3.bf16.msra.mxu1 %v4430_v36  ;;  %v3391_v36 = vld [vmem:[%s4506_s10 + $0x16a] sm:$0xff]  ;;  %v3393_v26 = vld [vmem:[%s4506_s10 + $0x182] sm:$0xff] }
  0xf9   : > { %4078 = vmatprep.subr.bf16.mxu1 %v4431_v27 }
  0xfc   : > { %4086 = vmatpush3.bf16.msra.mxu1 %v4431_v27  ;;  %v3394_v27 = vld [vmem:[%s4506_s10 + $0x18a] sm:$0xff] }
  0xfd   : > { %4079 = vmatprep.subr.bf16.mxu1 %v4432_v43  ;;  %v2603_v44 = vpack.c.bf16 %v3394_v27, %v3393_v26 }
  0xfe   : > { %3814 = vmatmul.mubr.bf16.gmra.mrb[12].mxu1 %v4801_v61  ;;  %v2591_v61 = vpack.c.bf16 %v3370_v0, %v3369_v58  ;;  %v3396_v58 = vld [vmem:[%s4506_s10 + $0x1a2] sm:$0xff] }
  0xff   : > { %4022 = vmatmul.mubr.bf16.gmra.mrb[28].mxu0 %v2298_v42  ;;  %3817 = vmatprep.mubr.bf16.mxu1 %v4818_v14  ;;  %v3371_v14 = vld [vmem:[%s4506_s10 + $0x7a] sm:$0xff]  ;;  %v1377_v42 = vpack.c.bf16 %v3168_v24, %v3167_v22  ;;  %v2604_v0 = vpack.c.bf16 %v3396_v58, %v3395_v45 }
 0x100   : > { %4041 = vmatprep.mubr.bf16.mxu0 %v2589_v51  ;;  %4087 = vmatpush3.bf16.msra.mxu1 %v4432_v43  ;;  %v2592_v23 = vpack.c.bf16 %v3372_v6, %v3371_v14  ;;  %v2602_v51 = vpack.c.bf16 %v3392_v38, %v3391_v36  ;;  %v1378_v43 = vpack.c.bf16 %v3170_v21, %v3169_v4 }
 0x101   : > { %4080 = vmatprep.subr.bf16.mxu1 %v4433_v59 }
 0x104   : > { %4088 = vmatpush3.bf16.msra.mxu1 %v4433_v59 }
 0x106   : > { %3818 = vmatmul.mubr.bf16.gmra.mrb[16].mxu1 %v4820_v15  ;;  %v3375_v15 = vld [vmem:[%s4506_s10 + $0xaa] sm:$0xff] }
 0x107   : > { %4042 = vmatmul.mubr.bf16.vlgmr.msra.gmra.mrb[0].mxu0 %v2590_v9  ;;  %3821 = vmatprep.mubr.bf16.mxu1 %v4838_v29  ;;  %v3376_v29 = vld [vmem:[%s4506_s10 + $0xb2] sm:$0xff] }
 0x108   : > { %4045 = vmatprep.mubr.bf16.mxu0 %v2591_v61  ;;  %v2594_v25 = vpack.c.bf16 %v3376_v29, %v3375_v15 }
 0x10e   : > { %3822 = vmatmul.mubr.bf16.gmra.mrb[20].mxu1 %v4840_v30  ;;  %v3379_v30 = vld [vmem:[%s4506_s10 + $0xda] sm:$0xff] }
 0x10f   : > { %4046 = vmatmul.mubr.bf16.gmra.mrb[4].mxu0 %v2592_v23  ;;  %3825 = vmatprep.mubr.bf16.mxu1 %v4856_v40  ;;  %v3380_v40 = vld [vmem:[%s4506_s10 + $0xe2] sm:$0xff] }
 0x110   : > { %4049 = vmatprep.mubr.bf16.mxu0 %v2593_v16  ;;  %v2596_v31 = vpack.c.bf16 %v3380_v40, %v3379_v30  ;;  %v5080_v40 = vld [vmem:[%s5161_s2] ss:$0 sm:$0xff] }
 0x116   : > { %3826 = vmatmul.mubr.bf16.gmra.mrb[24].mxu1 %v4858_v41  ;;  %v1372_v41 = vpack.c.bf16 %v3158_v37, %v3157_v20 }
 0x117   : > { %4050 = vmatmul.mubr.bf16.gmra.mrb[8].mxu0 %v2594_v25  ;;  %3829 = vmatprep.mubr.bf16.mxu1 %v4874_v56  ;;  %v3159_v56 = vld [vmem:[%s4506_s10 + $0xf1] sm:$0xff] }
 0x118   : > { %4053 = vmatprep.mubr.bf16.mxu0 %v2595_v19 }
 0x11e   : > { %3830 = vmatmul.mubr.bf16.gmra.mrb[28].mxu1 %v4908_v13  ;;  %v1373_v13 = vpack.c.bf16 %v3160_v33, %v3159_v56 }
 0x11f   : > { %4054 = vmatmul.mubr.bf16.gmra.mrb[12].mxu0 %v2596_v31  ;;  %3865 = vmatprep.mubr.bf16.mxu1 %v1372_v41 }
 0x120   : > { %4057 = vmatprep.mubr.bf16.mxu0 %v2597_v32 }
 0x126   : > { %3866 = vmatmul.mubr.bf16.vlgmr.msra.gmra.mrb[16].mxu1 %v1373_v13 }
 0x127   : > { %4058 = vmatmul.mubr.bf16.gmra.mrb[16].mxu0 %v2598_v48  ;;  %3869 = vmatprep.mubr.bf16.mxu1 %v1374_v50 }
 0x128   : > { %4061 = vmatprep.mubr.bf16.mxu0 %v2599_v53 }
 0x12e   : > { %3870 = vmatmul.mubr.bf16.gmra.mrb[20].mxu1 %v1375_v8 }
 0x12f   : > { %4062 = vmatmul.mubr.bf16.gmra.mrb[20].mxu0 %v2600_v49  ;;  %3873 = vmatprep.mubr.bf16.mxu1 %v1376_v7 }
 0x130   : > { %4065 = vmatprep.mubr.bf16.mxu0 %v2601_v10 }
 0x136   : > { %3874 = vmatmul.mubr.bf16.gmra.mrb[24].mxu1 %v1377_v42 }
 0x137   : > { %4066 = vmatmul.mubr.bf16.gmra.mrb[24].mxu0 %v2602_v51  ;;  %3877 = vmatprep.mubr.bf16.mxu1 %v1378_v43 }
 0x138   : > { %4069 = vmatprep.mubr.bf16.mxu0 %v2603_v44 }
 0x13e   : > { %3878 = vmatmul.mubr.bf16.gmra.mrb[28].mxu1 %v4993_v2 }
 0x13f   : > { %4070 = vmatmul.mubr.bf16.gmra.mrb[28].mxu0 %v2604_v0 }
 0x1b9   : > { %v3803_v59 = vpop.f32.mrb[0].mxu1 }
 0x1ba   : > { %v1173_v9 = vpop.f32.mrb[1].mxu1 }
 0x1bb   : > { %v3804_v61 = vpop.f32.mrb[2].mxu1 }
 0x1bc   : > { %v1176_v14 = vpop.f32.mrb[3].mxu1 }
 0x1c1   : > { %v3807_v6 = vpop.f32.mrb[4].mxu1 }
 0x1c2   : > { %v1189_v12 = vpop.f32.mrb[5].mxu1 }
 0x1c3   : > { %v3808_v11 = vpop.f32.mrb[6].mxu1 }
 0x1c4   : > { %v1192_v23 = vpop.f32.mrb[7].mxu1 }
 0x1c9   : > { %v3811_v16 = vpop.f32.mrb[8].mxu1 }
 0x1ca   : > { %v1205_v15 = vpop.f32.mrb[9].mxu1 }
 0x1cb   : > { %v3812_v29 = vpop.f32.mrb[10].mxu1 }
 0x1cc   : > { %v1208_v17 = vpop.f32.mrb[11].mxu1 }
 0x1d1   : > { %v5069_v18 = vpop.f32.mrb[12].mxu1 }
 0x1d2   : > { %v5071_v25 = vpop.f32.mrb[13].mxu1 }
 0x1d3   : > { %v5073_v19 = vpop.f32.mrb[14].mxu1 }
 0x1d4   : > { %v5075_v2 = vpop.f32.mrb[15].mxu1 }
 0x1da   : > { %v4043_v30 = vpop.f32.mrb[0].mxu0 }
 0x1db   : > { %v4089_v20 = vadd.f32 %v4043_v30, %v3803_v59  ;;  %v2704_v37 = vpop.f32.mrb[1].mxu0 }
 0x1dc   : > { %v4090_v28 = vadd.f32 %v2704_v37, %v1173_v9  ;;  %v4044_v1 = vpop.f32.mrb[2].mxu0 }
 0x1dd   : > { %v2872_v31 = vadd.f32 %v4089_v20, %v5080_v40  ;;  %v4091_v41 = vadd.f32 %v4044_v1, %v3804_v61  ;;  %v2707_v32 = vpop.f32.mrb[3].mxu0 }
 0x1de   : > { %v2870_v56 = vadd.f32 %v4090_v28, %v5080_v40  ;;  %v4092_v33 = vadd.f32 %v2707_v32, %v1176_v14 }
 0x1df   : > { %v2904_v34 = vmax.f32 %v2872_v31, 0.0  ;;  %v2873_v39 = vadd.f32 %v4091_v41, %v5080_v40 }
 0x1e0   : > { %v2902_v52 = vmax.f32 %v2870_v56, 0.0  ;;  %v2871_v35 = vadd.f32 %v4092_v33, %v5080_v40 }
 0x1e1   : > { %2936 = vst [vmem:[%s5087_s11 + $0x10] sm:$0xff] %v2904_v34  ;;  %v2905_v46 = vmax.f32 %v2873_v39, 0.0 }
 0x1e2   : > { %2934 = vst [vmem:[%s5087_s11] sm:$0xff] %v2902_v52  ;;  %v2903_v47 = vmax.f32 %v2871_v35, 0.0  ;;  %v4047_v13 = vpop.f32.mrb[4].mxu0 }
 0x1e3   : > { %2937 = vst [vmem:[%s5087_s11 + $0x18] sm:$0xff] %v2905_v46  ;;  %v4093_v48 = vadd.f32 %v4047_v13, %v3807_v6  ;;  %v2720_v50 = vpop.f32.mrb[5].mxu0 }
 0x1e4   : > { %2935 = vst [vmem:[%s5087_s11 + $0x8] sm:$0xff] %v2903_v47  ;;  %v4094_v53 = vadd.f32 %v2720_v50, %v1189_v12  ;;  %v4048_v55 = vpop.f32.mrb[6].mxu0 }
 0x1e5   : > { %v2876_v54 = vadd.f32 %v4093_v48, %v5080_v40  ;;  %v4095_v3 = vadd.f32 %v4048_v55, %v3808_v11  ;;  %v2723_v57 = vpop.f32.mrb[7].mxu0 }
 0x1e6   : > { %v2874_v60 = vadd.f32 %v4094_v53, %v5080_v40  ;;  %v4096_v62 = vadd.f32 %v2723_v57, %v1192_v23 }
 0x1e7   : > { %v2908_v63 = vmax.f32 %v2876_v54, 0.0  ;;  %v2877_v5 = vadd.f32 %v4095_v3, %v5080_v40 }
 0x1e8   : > { %v2906_v8 = vmax.f32 %v2874_v60, 0.0  ;;  %v2875_v49 = vadd.f32 %v4096_v62, %v5080_v40 }
 0x1e9   : > { %2940 = vst [vmem:[%s5087_s11 + $0x30] sm:$0xff] %v2908_v63  ;;  %v2909_v7 = vmax.f32 %v2877_v5, 0.0 }
 0x1ea   : > { %2938 = vst [vmem:[%s5087_s11 + $0x20] sm:$0xff] %v2906_v8  ;;  %v2907_v10 = vmax.f32 %v2875_v49, 0.0  ;;  %v4051_v22 = vpop.f32.mrb[8].mxu0 }
 0x1eb   : > { %2941 = vst [vmem:[%s5087_s11 + $0x38] sm:$0xff] %v2909_v7  ;;  %v4097_v24 = vadd.f32 %v4051_v22, %v3811_v16  ;;  %v2736_v36 = vpop.f32.mrb[9].mxu0 }
 0x1ec   : > { %2939 = vst [vmem:[%s5087_s11 + $0x28] sm:$0xff] %v2907_v10  ;;  %v4098_v38 = vadd.f32 %v2736_v36, %v1205_v15  ;;  %v4052_v4 = vpop.f32.mrb[10].mxu0 }
 0x1ed   : > { %v2880_v21 = vadd.f32 %v4097_v24, %v5080_v40  ;;  %v4099_v26 = vadd.f32 %v4052_v4, %v3812_v29  ;;  %v2739_v27 = vpop.f32.mrb[11].mxu0 }
 0x1ee   : > { %v2878_v42 = vadd.f32 %v4098_v38, %v5080_v40  ;;  %v4100_v51 = vadd.f32 %v2739_v27, %v1208_v17 }
 0x1ef   : > { %v2912_v43 = vmax.f32 %v2880_v21, 0.0  ;;  %v2881_v44 = vadd.f32 %v4099_v26, %v5080_v40 }
 0x1f0   : > { %v2910_v45 = vmax.f32 %v2878_v42, 0.0  ;;  %v2879_v58 = vadd.f32 %v4100_v51, %v5080_v40 }
 0x1f1   : > { %2944 = vst [vmem:[%s5087_s11 + $0x50] sm:$0xff] %v2912_v43  ;;  %v2913_v0 = vmax.f32 %v2881_v44, 0.0 }
 0x1f2   : > { %2942 = vst [vmem:[%s5087_s11 + $0x40] sm:$0xff] %v2910_v45  ;;  %v2911_v59 = vmax.f32 %v2879_v58, 0.0  ;;  %v4055_v9 = vpop.f32.mrb[12].mxu0 }
 0x1f3   : > { %2945 = vst [vmem:[%s5087_s11 + $0x58] sm:$0xff] %v2913_v0  ;;  %v4101_v61 = vadd.f32 %v4055_v9, %v5069_v18  ;;  %v2752_v14 = vpop.f32.mrb[13].mxu0 }
 0x1f4   : > { %2943 = vst [vmem:[%s5087_s11 + $0x48] sm:$0xff] %v2911_v59  ;;  %v4102_v6 = vadd.f32 %v2752_v14, %v5071_v25  ;;  %v4056_v12 = vpop.f32.mrb[14].mxu0 }
 0x1f5   : > { %v2884_v11 = vadd.f32 %v4101_v61, %v5080_v40  ;;  %v4103_v23 = vadd.f32 %v4056_v12, %v5073_v19  ;;  %v2755_v16 = vpop.f32.mrb[15].mxu0 }
 0x1f6   : > { %v2882_v15 = vadd.f32 %v4102_v6, %v5080_v40  ;;  %v4104_v29 = vadd.f32 %v2755_v16, %v5075_v2 }
 0x1f7   : > { %v2916_v17 = vmax.f32 %v2884_v11, 0.0  ;;  %v2885_v18 = vadd.f32 %v4103_v23, %v5080_v40 }
 0x1f8   : > { %v2914_v30 = vmax.f32 %v2882_v15, 0.0  ;;  %v2883_v20 = vadd.f32 %v4104_v29, %v5080_v40 }
 0x1f9   : > { %2948 = vst [vmem:[%s5087_s11 + $0x70] sm:$0xff] %v2916_v17  ;;  %v2917_v25 = vmax.f32 %v2885_v18, 0.0  ;;  %v3867_v37 = vpop.f32.mrb[16].mxu1 }
 0x1fa   : > { %2946 = vst [vmem:[%s5087_s11 + $0x60] sm:$0xff] %v2914_v30  ;;  %v2915_v28 = vmax.f32 %v2883_v20, 0.0  ;;  %v4059_v1 = vpop.f32.mrb[16].mxu0  ;;  %v1543_v31 = vpop.f32.mrb[17].mxu1 }
 0x1fb   : > { %2949 = vst [vmem:[%s5087_s11 + $0x78] sm:$0xff] %v2917_v25  ;;  %v4105_v19 = vadd.f32 %v4059_v1, %v3867_v37  ;;  %v2768_v41 = vpop.f32.mrb[17].mxu0  ;;  %v3868_v32 = vpop.f32.mrb[18].mxu1 }
 0x1fc   : > { %2947 = vst [vmem:[%s5087_s11 + $0x68] sm:$0xff] %v2915_v28  ;;  %v4106_v2 = vadd.f32 %v2768_v41, %v1543_v31  ;;  %v4060_v56 = vpop.f32.mrb[18].mxu0  ;;  %v1546_v33 = vpop.f32.mrb[19].mxu1 }
 0x1fd   : > { %v2888_v34 = vadd.f32 %v4105_v19, %v5080_v40  ;;  %v4107_v39 = vadd.f32 %v4060_v56, %v3868_v32  ;;  %v2771_v52 = vpop.f32.mrb[19].mxu0 }
 0x1fe   : > { %v2886_v35 = vadd.f32 %v4106_v2, %v5080_v40  ;;  %v4108_v46 = vadd.f32 %v2771_v52, %v1546_v33 }
 0x1ff   : > { %v2920_v47 = vmax.f32 %v2888_v34, 0.0  ;;  %v2889_v13 = vadd.f32 %v4107_v39, %v5080_v40 }
 0x200   : > { %v2918_v48 = vmax.f32 %v2886_v35, 0.0  ;;  %v2887_v50 = vadd.f32 %v4108_v46, %v5080_v40 }
 0x201   : > { %2952 = vst [vmem:[%s5087_s11 + $0x90] sm:$0xff] %v2920_v47  ;;  %v2921_v53 = vmax.f32 %v2889_v13, 0.0  ;;  %v3871_v55 = vpop.f32.mrb[20].mxu1 }
 0x202   : > { %2950 = vst [vmem:[%s5087_s11 + $0x80] sm:$0xff] %v2918_v48  ;;  %v2919_v54 = vmax.f32 %v2887_v50, 0.0  ;;  %v4063_v3 = vpop.f32.mrb[20].mxu0  ;;  %v1559_v57 = vpop.f32.mrb[21].mxu1 }
 0x203   : > { %2953 = vst [vmem:[%s5087_s11 + $0x98] sm:$0xff] %v2921_v53  ;;  %v4109_v60 = vadd.f32 %v4063_v3, %v3871_v55  ;;  %v2784_v62 = vpop.f32.mrb[21].mxu0  ;;  %v3872_v63 = vpop.f32.mrb[22].mxu1 }
 0x204   : > { %2951 = vst [vmem:[%s5087_s11 + $0x88] sm:$0xff] %v2919_v54  ;;  %v4110_v5 = vadd.f32 %v2784_v62, %v1559_v57  ;;  %v4064_v8 = vpop.f32.mrb[22].mxu0  ;;  %v1562_v49 = vpop.f32.mrb[23].mxu1 }
 0x205   : > { %v2892_v7 = vadd.f32 %v4109_v60, %v5080_v40  ;;  %v4111_v10 = vadd.f32 %v4064_v8, %v3872_v63  ;;  %v2787_v22 = vpop.f32.mrb[23].mxu0 }
 0x206   : > { %v2890_v24 = vadd.f32 %v4110_v5, %v5080_v40  ;;  %v4112_v36 = vadd.f32 %v2787_v22, %v1562_v49 }
 0x207   : > { %v2924_v38 = vmax.f32 %v2892_v7, 0.0  ;;  %v2893_v4 = vadd.f32 %v4111_v10, %v5080_v40 }
 0x208   : > { %v2922_v21 = vmax.f32 %v2890_v24, 0.0  ;;  %v2891_v26 = vadd.f32 %v4112_v36, %v5080_v40 }
 0x209   : > { %2956 = vst [vmem:[%s5087_s11 + $0xb0] sm:$0xff] %v2924_v38  ;;  %v2925_v27 = vmax.f32 %v2893_v4, 0.0  ;;  %v3875_v42 = vpop.f32.mrb[24].mxu1 }
 0x20a   : > { %2954 = vst [vmem:[%s5087_s11 + $0xa0] sm:$0xff] %v2922_v21  ;;  %v2923_v51 = vmax.f32 %v2891_v26, 0.0  ;;  %v4067_v43 = vpop.f32.mrb[24].mxu0  ;;  %v1575_v44 = vpop.f32.mrb[25].mxu1 }
 0x20b   : > { %2957 = vst [vmem:[%s5087_s11 + $0xb8] sm:$0xff] %v2925_v27  ;;  %v4113_v45 = vadd.f32 %v4067_v43, %v3875_v42  ;;  %v2800_v58 = vpop.f32.mrb[25].mxu0  ;;  %v3876_v0 = vpop.f32.mrb[26].mxu1 }
 0x20c   : > { %2955 = vst [vmem:[%s5087_s11 + $0xa8] sm:$0xff] %v2923_v51  ;;  %v4114_v59 = vadd.f32 %v2800_v58, %v1575_v44  ;;  %v4068_v9 = vpop.f32.mrb[26].mxu0  ;;  %v1578_v61 = vpop.f32.mrb[27].mxu1 }
 0x20d   : > { %v2896_v14 = vadd.f32 %v4113_v45, %v5080_v40  ;;  %v4115_v6 = vadd.f32 %v4068_v9, %v3876_v0  ;;  %v2803_v12 = vpop.f32.mrb[27].mxu0 }
 0x20e   : > { %v2894_v11 = vadd.f32 %v4114_v59, %v5080_v40  ;;  %v4116_v23 = vadd.f32 %v2803_v12, %v1578_v61 }
 0x20f   : > { %v2928_v16 = vmax.f32 %v2896_v14, 0.0  ;;  %v2897_v15 = vadd.f32 %v4115_v6, %v5080_v40 }
 0x210   : > { %v2926_v29 = vmax.f32 %v2894_v11, 0.0  ;;  %v2895_v17 = vadd.f32 %v4116_v23, %v5080_v40 }
 0x211   : > { %2960 = vst [vmem:[%s5087_s11 + $0xd0] sm:$0xff] %v2928_v16  ;;  %v2929_v18 = vmax.f32 %v2897_v15, 0.0  ;;  %v3879_v30 = vpop.f32.mrb[28].mxu1 }
 0x212   : > { %2958 = vst [vmem:[%s5087_s11 + $0xc0] sm:$0xff] %v2926_v29  ;;  %v2927_v20 = vmax.f32 %v2895_v17, 0.0  ;;  %v4071_v25 = vpop.f32.mrb[28].mxu0  ;;  %v1591_v37 = vpop.f32.mrb[29].mxu1 }
 0x213   : > { %2961 = vst [vmem:[%s5087_s11 + $0xd8] sm:$0xff] %v2929_v18  ;;  %v4117_v28 = vadd.f32 %v4071_v25, %v3879_v30  ;;  %v2816_v1 = vpop.f32.mrb[29].mxu0  ;;  %v3880_v31 = vpop.f32.mrb[30].mxu1 }
 0x214   : > { %2959 = vst [vmem:[%s5087_s11 + $0xc8] sm:$0xff] %v2927_v20  ;;  %v4118_v19 = vadd.f32 %v2816_v1, %v1591_v37  ;;  %v4072_v41 = vpop.f32.mrb[30].mxu0  ;;  %v1594_v32 = vpop.f32.mrb[31].mxu1 }
 0x215   : > { %v2900_v2 = vadd.f32 %v4117_v28, %v5080_v40  ;;  %v4119_v56 = vadd.f32 %v4072_v41, %v3880_v31  ;;  %v2819_v33 = vpop.f32.mrb[31].mxu0 }
 0x216   : > { %v2898_v34 = vadd.f32 %v4118_v19, %v5080_v40  ;;  %v4120_v39 = vadd.f32 %v2819_v33, %v1594_v32 }
 0x217   : > { %v2932_v52 = vmax.f32 %v2900_v2, 0.0  ;;  %v2901_v35 = vadd.f32 %v4119_v56, %v5080_v40 }
 0x218   : > { %v2930_v46 = vmax.f32 %v2898_v34, 0.0  ;;  %v2899_v47 = vadd.f32 %v4120_v39, %v5080_v40 }
 0x219   : > { %2964 = vst [vmem:[%s5087_s11 + $0xf0] sm:$0xff] %v2932_v52  ;;  %v2933_v13 = vmax.f32 %v2901_v35, 0.0 }
 0x21a   : > { %2962 = vst [vmem:[%s5087_s11 + $0xe0] sm:$0xff] %v2930_v46  ;;  %v2931_v48 = vmax.f32 %v2899_v47, 0.0 }
 0x21b   : > { %2965 = vst [vmem:[%s5087_s11 + $0xf8] sm:$0xff] %v2933_v13 }
 0x21c   : > { %2963 = vst [vmem:[%s5087_s11 + $0xe8] sm:$0xff] %v2931_v48 }
 0x21d PF: > { %s13_s12 = sadd.s32 1, %s4440_s12  }
 0x21e   : > { %p10_p4 = scmp.ge.s32.totalorder %s13_s12, 6  }
 0x220   :  { %12 = sbr.rel (!%p10_p4) target bundleno = 1 (0x1), region = 72 }

// kernel: simclrv2_forward.9
= control target key start
LH: loop header
LB: loop body
LE: loop exit
PB: predicated region body
PF: predicated region fallthrough
CT: control target
= control target key end

     0   :  { %v511_v0 = vmov 0.0   ;;  %vm512_vm0 = vmmov 0   ;;  %s670_s1 = inlined_call_operand.vmem [shape: bf16[128,128], index: 1, kind: input, shape index: {}]   ;;  %s671_s3 = inlined_call_operand.vmem [shape: bf16[128,128], index: 3, kind: input, shape index: {}]   ;;  %s672_s0 = inlined_call_operand.vmem [shape: f32[4,128], index: 0, kind: input, shape index: {}]   ;;  %s673_s5 = inlined_call_operand.vmem [shape: bf16[128,128], index: 5, kind: input, shape index: {}]   ;;  %s674_s2 = inlined_call_operand.vmem [shape: f32[1,128], index: 2, kind: input, shape index: {}]   ;;  %s675_s4 = inlined_call_operand.vmem [shape: f32[1,128], index: 4, kind: input, shape index: {}]   ;;  %s676_s6 = inlined_call_operand.vmem [shape: f32[1,128], index: 6, kind: input, shape index: {}]   ;;  %s677_s7 = inlined_call_operand.vmem [shape: f32[4,128], index: 7, kind: output, shape index: {}]  }
   0x1   :  { %425 = vmatprep.subr.bf16.mxu0 %v511_v0  ;;  %v487_v1 = vld [vmem:[%s670_s1] sm:$0xff]   ;;  %441 = vmatprep.mubr.msk.bf16.mxu0 %vm512_vm0, %v511_v0  ;;  %v488_v2 = vld [vmem:[%s670_s1 + $0x8] sm:$0xff]   ;;  %v489_v3 = vld [vmem:[%s670_s1 + $0x10] sm:$0xff]  }
   0x2   :  { %445 = vmatprep.subr.bf16.mxu1 %v511_v0  ;;  %461 = vmatprep.mubr.msk.bf16.mxu1 %vm512_vm0, %v511_v0  ;;  %v495_v4 = vld [vmem:[%s671_s3] sm:$0xff]   ;;  %v490_v5 = vld [vmem:[%s670_s1 + $0x18] sm:$0xff]   ;;  %v496_v6 = vld [vmem:[%s671_s3 + $0x8] sm:$0xff]  }
   0x3   :  { %426 = vmatpush3.bf16.msra.mxu0 %v487_v1  ;;  %446 = vmatpush3.bf16.msra.mxu1 %v495_v4  ;;  %v491_v7 = vld [vmem:[%s670_s1 + $0x20] sm:$0xff]   ;;  %v497_v8 = vld [vmem:[%s671_s3 + $0x10] sm:$0xff]   ;;  %v492_v9 = vld [vmem:[%s670_s1 + $0x28] sm:$0xff]  }
   0x4   :  { %427 = vmatprep.subr.bf16.mxu0 %v511_v0  ;;  %447 = vmatprep.subr.bf16.mxu1 %v511_v0  ;;  %v498_v10 = vld [vmem:[%s671_s3 + $0x18] sm:$0xff]   ;;  %v493_v11 = vld [vmem:[%s670_s1 + $0x30] sm:$0xff]   ;;  %v499_v12 = vld [vmem:[%s671_s3 + $0x20] sm:$0xff]  }
   0x5   :  { %v494_v13 = vld [vmem:[%s670_s1 + $0x38] sm:$0xff]   ;;  %v27_v14 = vld [vmem:[%s672_s0] sm:$0xf]  ;;  %v500_v15 = vld [vmem:[%s671_s3 + $0x28] sm:$0xff]  }
   0x6   :  { %v28_v16 = vpack.c.bf16 %v27_v14, %v27_v14  ;;  %v501_v17 = vld [vmem:[%s671_s3 + $0x30] sm:$0xff]   ;;  %v502_v18 = vld [vmem:[%s671_s3 + $0x38] sm:$0xff]   ;;  %v503_v19 = vld [vmem:[%s673_s5] sm:$0xff]  }
   0x7   :  { %428 = vmatpush3.bf16.msra.mxu0 %v488_v2  ;;  %448 = vmatpush3.bf16.msra.mxu1 %v496_v6  ;;  %v504_v20 = vld [vmem:[%s673_s5 + $0x8] sm:$0xff]   ;;  %v505_v21 = vld [vmem:[%s673_s5 + $0x10] sm:$0xff]   ;;  %v506_v22 = vld [vmem:[%s673_s5 + $0x18] sm:$0xff]  }
   0x8   :  { %429 = vmatprep.subr.bf16.mxu0 %v511_v0  ;;  %449 = vmatprep.subr.bf16.mxu1 %v511_v0  ;;  %v507_v23 = vld [vmem:[%s673_s5 + $0x20] sm:$0xff]   ;;  %v508_v24 = vld [vmem:[%s673_s5 + $0x28] sm:$0xff]   ;;  %v509_v33 = vld [vmem:[%s673_s5 + $0x30] sm:$0xff]  }
   0x9   :  { %v371_v25 = vld [vmem:[%s674_s2] ss:$0 sm:$0xff]  ;;  %v510_v34 = vld [vmem:[%s673_s5 + $0x38] sm:$0xff]  }
   0xa   :  { %v380_v35 = vld [vmem:[%s675_s4] ss:$0 sm:$0xff] }
   0xb   :  { %430 = vmatpush3.bf16.msra.mxu0 %v489_v3  ;;  %450 = vmatpush3.bf16.msra.mxu1 %v497_v8  ;;  %v389_v43 = vld [vmem:[%s676_s6] ss:$0 sm:$0xff] }
   0xc   :  { %431 = vmatprep.subr.bf16.mxu0 %v511_v0  ;;  %451 = vmatprep.subr.bf16.mxu1 %v511_v0 }
   0xf   :  { %432 = vmatpush3.bf16.msra.mxu0 %v490_v5  ;;  %452 = vmatpush3.bf16.msra.mxu1 %v498_v10 }
  0x10   :  { %433 = vmatprep.subr.bf16.mxu0 %v511_v0  ;;  %453 = vmatprep.subr.bf16.mxu1 %v511_v0 }
  0x13   :  { %434 = vmatpush3.bf16.msra.mxu0 %v491_v7  ;;  %454 = vmatpush3.bf16.msra.mxu1 %v499_v12 }
  0x14   :  { %435 = vmatprep.subr.bf16.mxu0 %v511_v0  ;;  %455 = vmatprep.subr.bf16.mxu1 %v511_v0 }
  0x17   :  { %436 = vmatpush3.bf16.msra.mxu0 %v492_v9  ;;  %456 = vmatpush3.bf16.msra.mxu1 %v500_v15 }
  0x18   :  { %437 = vmatprep.subr.bf16.mxu0 %v511_v0  ;;  %457 = vmatprep.subr.bf16.mxu1 %v511_v0 }
  0x1b   :  { %438 = vmatpush3.bf16.msra.mxu0 %v493_v11  ;;  %458 = vmatpush3.bf16.msra.mxu1 %v501_v17 }
  0x1c   :  { %439 = vmatprep.subr.bf16.mxu0 %v511_v0  ;;  %459 = vmatprep.subr.bf16.mxu1 %v511_v0 }
  0x1f   :  { %440 = vmatpush3.bf16.msra.mxu0 %v494_v13  ;;  %460 = vmatpush3.bf16.msra.mxu1 %v502_v18 }
  0x20   :  { %465 = vmatprep.subr.bf16.mxu0 %v511_v0 }
  0x22   :  { %442 = vmatmul.mubr.bf16.vlgmr.msra.gmra.mrb[0].mxu0 %v28_v16 }
  0x23   :  { %481 = vmatprep.mubr.msk.bf16.mxu0 %vm512_vm0, %v511_v0  ;;  %466 = vmatpush3.bf16.msra.mxu0 %v503_v19 }
  0x24   :  { %467 = vmatprep.subr.bf16.mxu0 %v511_v0 }
  0x27   :  { %468 = vmatpush3.bf16.msra.mxu0 %v504_v20 }
  0x28   :  { %469 = vmatprep.subr.bf16.mxu0 %v511_v0 }
  0x2b   :  { %470 = vmatpush3.bf16.msra.mxu0 %v505_v21 }
  0x2c   :  { %471 = vmatprep.subr.bf16.mxu0 %v511_v0 }
  0x2f   :  { %472 = vmatpush3.bf16.msra.mxu0 %v506_v22 }
  0x30   :  { %473 = vmatprep.subr.bf16.mxu0 %v511_v0 }
  0x33   :  { %474 = vmatpush3.bf16.msra.mxu0 %v507_v23 }
  0x34   :  { %475 = vmatprep.subr.bf16.mxu0 %v511_v0 }
  0x37   :  { %476 = vmatpush3.bf16.msra.mxu0 %v508_v24 }
  0x38   :  { %477 = vmatprep.subr.bf16.mxu0 %v511_v0 }
  0x3b   :  { %478 = vmatpush3.bf16.msra.mxu0 %v509_v33 }
  0x3c   :  { %479 = vmatprep.subr.bf16.mxu0 %v511_v0 }
  0x3f   :  { %480 = vmatpush3.bf16.msra.mxu0 %v510_v34 }
  0xf5   :  { %v134_v26 = vpop.f32.mrb[0].mxu0 }
  0xf6   :  { %v135_v27 = vadd.f32 %v371_v25, %v134_v26  ;;  %v443_v28 = vpop.f32.mrb[1].mxu0 }
  0xf7   :  { %v137_v29 = vpop.f32.mrb[2].mxu0 }
  0xf8   :  { %v140_v30 = vmax.f32 %v135_v27, 0.0  ;;  %v444_v31 = vpop.f32.mrb[3].mxu0 }
  0xfa   :  { %v141_v32 = vpack.c.bf16 %v140_v30, %v140_v30 }
  0xfc   :  { %462 = vmatmul.mubr.bf16.vlgmr.msra.gmra.mrb[0].mxu1 %v141_v32 }
 0x1cf   :  { %v247_v36 = vpop.f32.mrb[0].mxu1 }
 0x1d0   :  { %v248_v37 = vadd.f32 %v380_v35, %v247_v36  ;;  %v463_v38 = vpop.f32.mrb[1].mxu1 }
 0x1d1   :  { %v250_v39 = vpop.f32.mrb[2].mxu1 }
 0x1d2   :  { %v253_v40 = vmax.f32 %v248_v37, 0.0  ;;  %v464_v41 = vpop.f32.mrb[3].mxu1 }
 0x1d4   :  { %v254_v42 = vpack.c.bf16 %v253_v40, %v253_v40 }
 0x1d6   :  { %482 = vmatmul.mubr.bf16.vlgmr.msra.gmra.mrb[4].mxu0 %v254_v42 }
 0x2a9   :  { %v360_v44 = vpop.f32.mrb[4].mxu0 }
 0x2aa   :  { %v361_v45 = vadd.f32 %v389_v43, %v360_v44  ;;  %v483_v46 = vpop.f32.mrb[5].mxu0 }
 0x2ab   :  { %v363_v47 = vpop.f32.mrb[6].mxu0 }
 0x2ac   :  { %366 = vst [vmem:[%s677_s7] sm:$0xf] %v361_v45  ;;  %v484_v48 = vpop.f32.mrb[7].mxu0 }

// kernel: simclrv2_forward.7
= control target key start
LH: loop header
LB: loop body
LE: loop exit
PB: predicated region body
PF: predicated region fallthrough
CT: control target
= control target key end

     0   :  { %s4593_s15 = smov 0   ;;  %s5339_s0 = inlined_call_operand.vmem [shape: f32[4,18,18,128], index: 0, kind: input, shape index: {}]   ;;  %s5340_s1 = inlined_call_operand.vmem [shape: bf16[9,128,128], index: 1, kind: input, shape index: {}]   ;;  %s5341_s2 = inlined_call_operand.vmem [shape: f32[1,128], index: 2, kind: input, shape index: {}]   ;;  %s5342_s3 = inlined_call_operand.vmem [shape: f32[4,16,16,128], index: 3, kind: input, shape index: {}]   ;;  %s5343_s4 = inlined_call_operand.vmem [shape: f32[4,16,16,128], index: 4, kind: output, shape index: {}]  }
   0x1 LB: > { %s3144_s16 = sadd.s32 4294967295, %s4566_s15   ;;  %p3148_p0 = scmp.ge.s32.totalorder %s4566_s15, 1  ;;  %s4566_s15 = sphi %s4593_s15, %s14_s15  }
   0x2   : > { %p172_p1 = scmp.lt.s32.totalorder %s4566_s15, 5 }
   0x4   : > { %p173_p2 = pnand %p3148_p0, %p172_p1 }
   0x5   : > { %v4480_v0 = vld [vmem:[%s5340_s1 + $0x40] sm:$0xff] (!%p173_p2)   ;;  %p203_p3 = scmp.lt.s32.totalorder (!%p173_p2), %s3144_s16, 3  ;;  %v4482_v2 = vld [vmem:[%s5340_s1 + $0x48] sm:$0xff] (!%p173_p2)   ;;  %v4484_v4 = vld [vmem:[%s5340_s1 + $0x50] sm:$0xff] (!%p173_p2)  }
   0x6   : > { %176 = sbr.rel (%p173_p2) target bundleno = 543 (0x21f), region = 36  ;;  %v4481_v1 = vld [vmem:[%s5340_s1 + $0x100] sm:$0xff] (!%p173_p2)   ;;  %3767 = vmatprep.subr.bf16.mxu1 (!%p173_p2), %v4480_v0  ;;  %v4483_v3 = vld [vmem:[%s5340_s1 + $0x108] sm:$0xff] (!%p173_p2)   ;;  %v4485_v5 = vld [vmem:[%s5340_s1 + $0x110] sm:$0xff] (!%p173_p2)  }
   0x7   : > { %3959 = vmatprep.subr.bf16.mxu0 (!%p173_p2), %v4481_v1  ;;  %3768 = vmatpush3.bf16.msra.mxu1 (!%p173_p2), %v4480_v0  ;;  %v4486_v6 = vld [vmem:[%s5340_s1 + $0x58] sm:$0xff] (!%p173_p2)   ;;  %v4488_v8 = vld [vmem:[%s5340_s1 + $0x60] sm:$0xff] (!%p173_p2)   ;;  %v4490_v10 = vld [vmem:[%s5340_s1 + $0x68] sm:$0xff] (!%p173_p2)  }
   0x8   : > { %3960 = vmatpush3.bf16.msra.mxu0 (!%p173_p2), %v4481_v1  ;;  %3769 = vmatprep.subr.bf16.mxu1 (!%p173_p2), %v4482_v2  ;;  %v4487_v7 = vld [vmem:[%s5340_s1 + $0x118] sm:$0xff] (!%p173_p2)   ;;  %v4489_v9 = vld [vmem:[%s5340_s1 + $0x120] sm:$0xff] (!%p173_p2)   ;;  %v4491_v11 = vld [vmem:[%s5340_s1 + $0x128] sm:$0xff] (!%p173_p2)  }
   0x9   : > { %3961 = vmatprep.subr.bf16.mxu0 (!%p173_p2), %v4483_v3  ;;  %v4492_v18 = vld [vmem:[%s5340_s1 + $0x70] sm:$0xff] (!%p173_p2)   ;;  %v4494_v20 = vld [vmem:[%s5340_s1 + $0x78] sm:$0xff] (!%p173_p2)   ;;  %v4496_v22 = vld [vmem:[%s5340_s1] sm:$0xff] (!%p173_p2)  }
   0xa   : > { %v4493_v19 = vld [vmem:[%s5340_s1 + $0x130] sm:$0xff] (!%p173_p2)   ;;  %v4495_v21 = vld [vmem:[%s5340_s1 + $0x138] sm:$0xff] (!%p173_p2)   ;;  %v4497_v25 = vld [vmem:[%s5340_s1 + $0x140] sm:$0xff] (!%p173_p2)  }
   0xb   : > { %3770 = vmatpush3.bf16.msra.mxu1 (!%p173_p2), %v4482_v2  ;;  %v4498_v29 = vld [vmem:[%s5340_s1 + $0x148] sm:$0xff] (!%p173_p2)   ;;  %v4500_v34 = vld [vmem:[%s5340_s1 + $0x150] sm:$0xff] (!%p173_p2)   ;;  %v4501_v40 = vld [vmem:[%s5340_s1 + $0x158] sm:$0xff] (!%p173_p2)  }
   0xc   : > { %3962 = vmatpush3.bf16.msra.mxu0 (!%p173_p2), %v4483_v3  ;;  %3771 = vmatprep.subr.bf16.mxu1 (!%p173_p2), %v4484_v4  ;;  %v4499_v31 = vld [vmem:[%s5340_s1 + $0x8] sm:$0xff] (!%p173_p2)   ;;  %v4502_v36 = vld [vmem:[%s5340_s1 + $0x10] sm:$0xff] (!%p173_p2)   ;;  %v4505_v41 = vld [vmem:[%s5340_s1 + $0x18] sm:$0xff] (!%p173_p2)  }
   0xd   : > { %s5345_s16 = smov (!%p203_p3, %s3144_s16), 3  ;;  %3963 = vmatprep.subr.bf16.mxu0 %v4485_v5  ;;  %v4503_v44 = vld [vmem:[%s5340_s1 + $0x160] sm:$0xff]   ;;  %v4504_v50 = vld [vmem:[%s5340_s1 + $0x168] sm:$0xff]   ;;  %v4506_v54 = vld [vmem:[%s5340_s1 + $0x170] sm:$0xff]  }
   0xe   : > { %s4471_s7 = smul.u32 432, %s5345_s16  ;;  %v4508_v47 = vld [vmem:[%s5340_s1 + $0x20] sm:$0xff]   ;;  %v4510_v51 = vld [vmem:[%s5340_s1 + $0x28] sm:$0xff]   ;;  %v4512_v57 = vld [vmem:[%s5340_s1 + $0x30] sm:$0xff]  }
   0xf   : > { %3772 = vmatpush3.bf16.msra.mxu1 %v4484_v4  ;;  %v4507_v60 = vld [vmem:[%s5340_s1 + $0x178] sm:$0xff]   ;;  %v4509_v4 = vld [vmem:[%s5340_s1 + $0x180] sm:$0xff]  }
  0x10   : > { %3964 = vmatpush3.bf16.msra.mxu0 %v4485_v5  ;;  %3773 = vmatprep.subr.bf16.mxu1 %v4486_v6  ;;  %s4637_s14 = scalar_lea.vmem %s5339_s0, %s4471_s7  ;;  %v4514_v0 = vld [vmem:[%s5340_s1 + $0x38] sm:$0xff]  }
  0x11   : > { %3965 = vmatprep.subr.bf16.mxu0 %v4487_v7  ;;  %v283_v12 = vld [vmem:[%s4637_s14 + $0x1] sm:$0xff]  ;;  %v284_v13 = vld [vmem:[%s4637_s14 + $0x9] sm:$0xff]  ;;  %v3266_v14 = vld [vmem:[%s4637_s14 + $0x19] sm:$0xff] }
  0x12   : > { %v315_v15 = vpack.c.bf16 %v284_v13, %v283_v12  ;;  %v3267_v16 = vld [vmem:[%s4637_s14 + $0x21] sm:$0xff]  ;;  %v3268_v23 = vld [vmem:[%s4637_s14 + $0x31] sm:$0xff]  ;;  %v3269_v24 = vld [vmem:[%s4637_s14 + $0x39] sm:$0xff] }
  0x13   : > { %3774 = vmatpush3.bf16.msra.mxu1 %v4486_v6  ;;  %v1411_v17 = vpack.c.bf16 %v3267_v16, %v3266_v14  ;;  %v3270_v26 = vld [vmem:[%s4637_s14 + $0x49] sm:$0xff]  ;;  %v3271_v27 = vld [vmem:[%s4637_s14 + $0x51] sm:$0xff]  ;;  %v1412_v28 = vpack.c.bf16 %v3269_v24, %v3268_v23  ;;  %v3272_v32 = vld [vmem:[%s4637_s14 + $0x61] sm:$0xff] }
  0x14   : > { %3966 = vmatpush3.bf16.msra.mxu0 %v4487_v7  ;;  %3775 = vmatprep.subr.bf16.mxu1 %v4488_v8  ;;  %v1413_v30 = vpack.c.bf16 %v3271_v27, %v3270_v26  ;;  %v3273_v33 = vld [vmem:[%s4637_s14 + $0x69] sm:$0xff]  ;;  %v3274_v35 = vld [vmem:[%s4637_s14 + $0x79] sm:$0xff]  ;;  %v3275_v37 = vld [vmem:[%s4637_s14 + $0x81] sm:$0xff] }
  0x15   : > { %3967 = vmatprep.subr.bf16.mxu0 %v4489_v9  ;;  %3783 = vmatprep.mubr.bf16.mxu1 %v315_v15  ;;  %v1414_v38 = vpack.c.bf16 %v3273_v33, %v3272_v32  ;;  %v1415_v39 = vpack.c.bf16 %v3275_v37, %v3274_v35  ;;  %v3276_v42 = vld [vmem:[%s4637_s14 + $0x91] sm:$0xff]  ;;  %v3277_v43 = vld [vmem:[%s4637_s14 + $0x99] sm:$0xff]  ;;  %v3278_v45 = vld [vmem:[%s4637_s14 + $0xa9] sm:$0xff] }
  0x16   : > { %3975 = vmatprep.mubr.bf16.mxu0 %v1411_v17  ;;  %v3279_v46 = vld [vmem:[%s4637_s14 + $0xb1] sm:$0xff]  ;;  %v1416_v48 = vpack.c.bf16 %v3277_v43, %v3276_v42  ;;  %v3280_v52 = vld [vmem:[%s4637_s14 + $0xc1] sm:$0xff]  ;;  %v3281_v53 = vld [vmem:[%s4637_s14 + $0xc9] sm:$0xff] }
  0x17   : > { %3776 = vmatpush3.bf16.msra.mxu1 %v4488_v8  ;;  %v4703_v49 = vpack.c.bf16 %v3279_v46, %v3278_v45  ;;  %v3322_v55 = vld [vmem:[%s4637_s14 + $0x1a] sm:$0xff]  ;;  %v3323_v56 = vld [vmem:[%s4637_s14 + $0x22] sm:$0xff]  ;;  %v1418_v58 = vpack.c.bf16 %v3281_v53, %v3280_v52  ;;  %v3324_v63 = vld [vmem:[%s4637_s14 + $0x32] sm:$0xff] }
  0x18   : > { %3968 = vmatpush3.bf16.msra.mxu0 %v4489_v9  ;;  %3777 = vmatprep.subr.bf16.mxu1 %v4490_v10  ;;  %v4722_v59 = vpack.c.bf16 %v3323_v56, %v3322_v55  ;;  %v301_v61 = vld [vmem:[%s4637_s14 + $0xd9] sm:$0xff]  ;;  %v302_v62 = vld [vmem:[%s4637_s14 + $0xe1] sm:$0xff]  ;;  %v303_v2 = vld [vmem:[%s4637_s14 + $0xf1] sm:$0xff] }
  0x19   : > { %3969 = vmatprep.subr.bf16.mxu0 %v4491_v11  ;;  %v3325_v1 = vld [vmem:[%s4637_s14 + $0x3a] sm:$0xff]  ;;  %v3326_v5 = vld [vmem:[%s4637_s14 + $0x4a] sm:$0xff]  ;;  %v3327_v6 = vld [vmem:[%s4637_s14 + $0x52] sm:$0xff]  ;;  %v4743_v7 = vpack.c.bf16 %v302_v62, %v301_v61 }
  0x1a   : > { %v304_v3 = vld [vmem:[%s4637_s14 + $0xf9] sm:$0xff]  ;;  %v4750_v9 = vpack.c.bf16 %v3325_v1, %v3324_v63  ;;  %v4511_v12 = vld [vmem:[%s5340_s1 + $0x188] sm:$0xff]   ;;  %v306_v14 = vld [vmem:[%s4637_s14 + $0x111] sm:$0xff] }
  0x1b   : > { %3778 = vmatpush3.bf16.msra.mxu1 %v4490_v10  ;;  %v4748_v8 = vld [vmem:[%s5340_s1 + $0x80] sm:$0xff]   ;;  %v4752_v10 = vpack.c.bf16 %v304_v3, %v303_v2  ;;  %v305_v13 = vld [vmem:[%s4637_s14 + $0x109] sm:$0xff]  ;;  %v4515_v27 = vld [vmem:[%s5340_s1 + $0x198] sm:$0xff]  }
  0x1c   : > { %3970 = vmatpush3.bf16.msra.mxu0 %v4491_v11  ;;  %3779 = vmatprep.subr.bf16.mxu1 %v4492_v18  ;;  %v4754_v11 = vpack.c.bf16 %v3327_v6, %v3326_v5  ;;  %v3328_v15 = vld [vmem:[%s4637_s14 + $0x62] sm:$0xff]  ;;  %v3329_v16 = vld [vmem:[%s4637_s14 + $0x6a] sm:$0xff]  ;;  %v309_v26 = vld [vmem:[%s4637_s14 + $0x139] sm:$0xff] }
  0x1d   : > { %3971 = vmatprep.subr.bf16.mxu0 %v4493_v19  ;;  %v4777_v23 = vpack.c.bf16 %v3329_v16, %v3328_v15  ;;  %v312_v32 = vld [vmem:[%s4637_s14 + $0x159] sm:$0xff]  ;;  %v3334_v33 = vld [vmem:[%s4637_s14 + $0xaa] sm:$0xff]  ;;  %v3336_v43 = vld [vmem:[%s4637_s14 + $0xc2] sm:$0xff] }
  0x1e   : > { %v4517_v35 = vld [vmem:[%s5340_s1 + $0x1a0] sm:$0xff]   ;;  %v4519_v42 = vld [vmem:[%s5340_s1 + $0x1a8] sm:$0xff]   ;;  %v221_v55 = vld [vmem:[%s4637_s14 + $0x18] sm:$0xff] }
  0x1f   : > { %3780 = vmatpush3.bf16.msra.mxu1 %v4492_v18  ;;  %v308_v18 = vld [vmem:[%s4637_s14 + $0x129] sm:$0xff]  ;;  %v219_v45 = vld [vmem:[%s4637_s14] sm:$0xff]  ;;  %v224_v62 = vld [vmem:[%s4637_s14 + $0x38] sm:$0xff] }
  0x20   : > { %3972 = vmatpush3.bf16.msra.mxu0 %v4493_v19  ;;  %3781 = vmatprep.subr.bf16.mxu1 %v4494_v20  ;;  %v3330_v19 = vld [vmem:[%s4637_s14 + $0x7a] sm:$0xff]  ;;  %v220_v46 = vld [vmem:[%s4637_s14 + $0x8] sm:$0xff]  ;;  %v223_v61 = vld [vmem:[%s4637_s14 + $0x30] sm:$0xff] }
  0x21   : > { %3973 = vmatprep.subr.bf16.mxu0 %v4495_v21  ;;  %v251_v53 = vpack.c.bf16 %v220_v46, %v219_v45  ;;  %v222_v56 = vld [vmem:[%s4637_s14 + $0x20] sm:$0xff]  ;;  %v3342_v63 = vld [vmem:[%s4637_s14 + $0x10a] sm:$0xff] }
  0x22   : > { %v4850_v1 = vld [vmem:[%s5340_s1 + $0x1c0] sm:$0xff]   ;;  %v4852_v2 = vpack.c.bf16 %v222_v56, %v221_v55  ;;  %v225_v6 = vld [vmem:[%s4637_s14 + $0x48] sm:$0xff] }
  0x23   : > { %3782 = vmatpush3.bf16.msra.mxu1 %v4494_v20  ;;  %v3331_v20 = vld [vmem:[%s4637_s14 + $0x82] sm:$0xff]  ;;  %v3345_v15 = vld [vmem:[%s4637_s14 + $0x12a] sm:$0xff] }
  0x24   : > { %3974 = vmatpush3.bf16.msra.mxu0 %v4495_v21  ;;  %3815 = vmatprep.subr.bf16.mxu1 %v4496_v22  ;;  %v4513_v21 = vld [vmem:[%s5340_s1 + $0x190] sm:$0xff]   ;;  %v227_v16 = vld [vmem:[%s4637_s14 + $0x60] sm:$0xff]  ;;  %v4526_v46 = vld [vmem:[%s5340_s1 + $0xa8] sm:$0xff]  }
  0x25   : > { %4007 = vmatprep.subr.bf16.mxu0 %v4497_v25  ;;  %v235_v55 = vld [vmem:[%s4637_s14 + $0xc0] sm:$0xff]  ;;  %v236_v56 = vld [vmem:[%s4637_s14 + $0xc8] sm:$0xff] }
  0x26   : > { %3784 = vmatmul.mubr.bf16.vlgmr.msra.gmra.mrb[0].mxu1 %v1411_v17  ;;  %v307_v17 = vld [vmem:[%s4637_s14 + $0x121] sm:$0xff] }
  0x27   : > { %3976 = vmatmul.mubr.bf16.vlgmr.msra.gmra.mrb[0].mxu0 %v1412_v28  ;;  %3816 = vmatpush3.bf16.msra.mxu1 %v4496_v22  ;;  %v4775_v22 = vpack.c.bf16 %v306_v14, %v305_v13  ;;  %v4779_v24 = vpack.c.bf16 %v308_v18, %v307_v17  ;;  %v4518_v13 = vld [vmem:[%s5340_s1 + $0x88] sm:$0xff]   ;;  %v3346_v18 = vld [vmem:[%s4637_s14 + $0x13a] sm:$0xff] }
  0x28   : > { %4008 = vmatpush3.bf16.msra.mxu0 %v4497_v25  ;;  %3787 = vmatprep.mubr.bf16.mxu1 %v1412_v28  ;;  %v4781_v25 = vpack.c.bf16 %v3331_v20, %v3330_v19  ;;  %v310_v28 = vld [vmem:[%s4637_s14 + $0x141] sm:$0xff]  ;;  %v4520_v19 = vld [vmem:[%s5340_s1 + $0x90] sm:$0xff]  }
  0x29   : > { %4009 = vmatprep.subr.bf16.mxu0 %v4498_v29  ;;  %3979 = vmatprep.mubr.bf16.mxu0 %v1413_v30  ;;  %v3344_v14 = vld [vmem:[%s4637_s14 + $0x122] sm:$0xff] }
  0x2a   : > { %3817 = vmatprep.subr.bf16.mxu1 %v4499_v31  ;;  %v228_v17 = vld [vmem:[%s4637_s14 + $0x68] sm:$0xff] }
  0x2b   : > { %3818 = vmatpush3.bf16.msra.mxu1 %v4499_v31  ;;  %v311_v31 = vld [vmem:[%s4637_s14 + $0x151] sm:$0xff]  ;;  %v3347_v20 = vld [vmem:[%s4637_s14 + $0x142] sm:$0xff] }
  0x2c   : > { %4010 = vmatpush3.bf16.msra.mxu0 %v4498_v29  ;;  %3819 = vmatprep.subr.bf16.mxu1 %v4502_v36  ;;  %v3332_v29 = vld [vmem:[%s4637_s14 + $0x92] sm:$0xff] }
  0x2d   : > { %4011 = vmatprep.subr.bf16.mxu0 %v4500_v34 }
  0x2e   : > { %3788 = vmatmul.mubr.bf16.gmra.mrb[4].mxu1 %v1413_v30  ;;  %v3333_v30 = vld [vmem:[%s4637_s14 + $0x9a] sm:$0xff] }
  0x2f   : > { %3980 = vmatmul.mubr.bf16.gmra.mrb[4].mxu0 %v1414_v38  ;;  %3791 = vmatprep.mubr.bf16.mxu1 %v1414_v38  ;;  %v4803_v37 = vpack.c.bf16 %v3333_v30, %v3332_v29  ;;  %v4805_v38 = vpack.c.bf16 %v312_v32, %v311_v31  ;;  %v230_v29 = vld [vmem:[%s4637_s14 + $0x80] sm:$0xff]  ;;  %v4522_v30 = vld [vmem:[%s5340_s1 + $0x98] sm:$0xff]  }
  0x30   : > { %4012 = vmatpush3.bf16.msra.mxu0 %v4500_v34  ;;  %3983 = vmatprep.mubr.bf16.mxu0 %v1415_v39  ;;  %v3335_v34 = vld [vmem:[%s4637_s14 + $0xb2] sm:$0xff]  ;;  %v3349_v32 = vld [vmem:[%s4637_s14 + $0x15a] sm:$0xff] }
  0x31   : > { %4013 = vmatprep.subr.bf16.mxu0 %v4501_v40  ;;  %3820 = vmatpush3.bf16.msra.mxu1 %v4502_v36  ;;  %v4801_v36 = vpack.c.bf16 %v310_v28, %v309_v26  ;;  %v4884_v26 = vpack.c.bf16 %v228_v17, %v227_v16  ;;  %v229_v28 = vld [vmem:[%s4637_s14 + $0x78] sm:$0xff]  ;;  %v4527_v16 = vld [vmem:[%s5340_s1 + $0x1c8] sm:$0xff]  }
  0x32   : > { %3821 = vmatprep.subr.bf16.mxu1 %v4505_v41  ;;  %v3348_v31 = vld [vmem:[%s4637_s14 + $0x152] sm:$0xff]  ;;  %v241_v17 = vld [vmem:[%s4637_s14 + $0x108] sm:$0xff] }
  0x34   : > { %4014 = vmatpush3.bf16.msra.mxu0 %v4501_v40  ;;  %v313_v40 = vld [vmem:[%s4637_s14 + $0x169] sm:$0xff] }
  0x35   : > { %4015 = vmatprep.subr.bf16.mxu0 %v4503_v44  ;;  %3822 = vmatpush3.bf16.msra.mxu1 %v4505_v41  ;;  %v314_v41 = vld [vmem:[%s4637_s14 + $0x171] sm:$0xff] }
  0x36   : > { %3792 = vmatmul.mubr.bf16.gmra.mrb[8].mxu1 %v1415_v39  ;;  %3823 = vmatprep.subr.bf16.mxu1 %v4508_v47  ;;  %v4807_v39 = vpack.c.bf16 %v3335_v34, %v3334_v33  ;;  %v231_v33 = vld [vmem:[%s4637_s14 + $0x90] sm:$0xff]  ;;  %v232_v34 = vld [vmem:[%s4637_s14 + $0x98] sm:$0xff] }
  0x37   : > { %3984 = vmatmul.mubr.bf16.gmra.mrb[8].mxu0 %v1416_v48  ;;  %3795 = vmatprep.mubr.bf16.mxu1 %v1416_v48  ;;  %v3339_v48 = vld [vmem:[%s4637_s14 + $0xe2] sm:$0xff] }
  0x38   : > { %4016 = vmatpush3.bf16.msra.mxu0 %v4503_v44  ;;  %3987 = vmatprep.mubr.bf16.mxu0 %v4703_v49  ;;  %v3337_v44 = vld [vmem:[%s4637_s14 + $0xca] sm:$0xff] }
  0x39   : > { %4017 = vmatprep.subr.bf16.mxu0 %v4504_v50  ;;  %3824 = vmatpush3.bf16.msra.mxu1 %v4508_v47  ;;  %v3338_v47 = vld [vmem:[%s4637_s14 + $0xda] sm:$0xff]  ;;  %v4829_v52 = vpack.c.bf16 %v3337_v44, %v3336_v43  ;;  %v4908_v43 = vpack.c.bf16 %v3349_v32, %v3348_v31  ;;  %v4910_v44 = vpack.c.bf16 %v232_v34, %v231_v33  ;;  %v247_v33 = vld [vmem:[%s4637_s14 + $0x150] sm:$0xff] }
  0x3a   : > { %3825 = vmatprep.subr.bf16.mxu1 %v4510_v51  ;;  %v245_v31 = vld [vmem:[%s4637_s14 + $0x138] sm:$0xff]  ;;  %v246_v32 = vld [vmem:[%s4637_s14 + $0x140] sm:$0xff] }
  0x3b   : > { %v248_v34 = vld [vmem:[%s4637_s14 + $0x158] sm:$0xff] }
  0x3c   : > { %4018 = vmatpush3.bf16.msra.mxu0 %v4504_v50  ;;  %v4521_v50 = vld [vmem:[%s5340_s1 + $0x1b0] sm:$0xff]  }
  0x3d   : > { %4019 = vmatprep.subr.bf16.mxu0 %v4506_v54  ;;  %3826 = vmatpush3.bf16.msra.mxu1 %v4510_v51  ;;  %v4827_v51 = vpack.c.bf16 %v314_v41, %v313_v40  ;;  %v3351_v40 = vld [vmem:[%s4637_s14 + $0x172] sm:$0xff]  ;;  %v4524_v41 = vld [vmem:[%s5340_s1 + $0xa0] sm:$0xff]  }
  0x3e   : > { %3796 = vmatmul.mubr.bf16.gmra.mrb[12].mxu1 %v4703_v49  ;;  %3827 = vmatprep.subr.bf16.mxu1 %v4512_v57 }
  0x3f   : > { %3988 = vmatmul.mubr.bf16.gmra.mrb[12].mxu0 %v1418_v58  ;;  %3799 = vmatprep.mubr.bf16.mxu1 %v1418_v58  ;;  %v3340_v58 = vld [vmem:[%s4637_s14 + $0xf2] sm:$0xff] }
  0x40   : > { %4020 = vmatpush3.bf16.msra.mxu0 %v4506_v54  ;;  %4023 = vmatprep.mubr.bf16.mxu0 %v4722_v59  ;;  %v4831_v54 = vpack.c.bf16 %v3339_v48, %v3338_v47  ;;  %v233_v47 = vld [vmem:[%s4637_s14 + $0xa8] sm:$0xff]  ;;  %v234_v48 = vld [vmem:[%s4637_s14 + $0xb0] sm:$0xff] }
  0x41   : > { %4021 = vmatprep.subr.bf16.mxu0 %v4507_v60  ;;  %3828 = vmatpush3.bf16.msra.mxu1 %v4512_v57  ;;  %v4523_v57 = vld [vmem:[%s5340_s1 + $0x1b8] sm:$0xff]  }
  0x42   : > { %3829 = vmatprep.subr.bf16.mxu1 %v4514_v0 }
  0x44   : > { %4022 = vmatpush3.bf16.msra.mxu0 %v4507_v60  ;;  %v3341_v60 = vld [vmem:[%s4637_s14 + $0xfa] sm:$0xff] }
  0x45   : > { %4055 = vmatprep.subr.bf16.mxu0 %v4509_v4  ;;  %3830 = vmatpush3.bf16.msra.mxu1 %v4514_v0  ;;  %v3343_v0 = vld [vmem:[%s4637_s14 + $0x112] sm:$0xff]  ;;  %v4854_v3 = vpack.c.bf16 %v3341_v60, %v3340_v58  ;;  %v4930_v58 = vpack.c.bf16 %v234_v48, %v233_v47  ;;  %v249_v47 = vld [vmem:[%s4637_s14 + $0x168] sm:$0xff] }
  0x46   : > { %3800 = vmatmul.mubr.bf16.gmra.mrb[16].mxu1 %v4743_v7  ;;  %3863 = vmatprep.subr.bf16.mxu1 %v4748_v8  ;;  %v4858_v5 = vpack.c.bf16 %v3343_v0, %v3342_v63  ;;  %v237_v63 = vld [vmem:[%s4637_s14 + $0xd8] sm:$0xff]  ;;  %v238_v0 = vld [vmem:[%s4637_s14 + $0xe0] sm:$0xff]  ;;  %v250_v48 = vld [vmem:[%s4637_s14 + $0x170] sm:$0xff] }
  0x47   : > { %4024 = vmatmul.mubr.bf16.vlgmr.msra.gmra.mrb[0].mxu0 %v4750_v9  ;;  %3803 = vmatprep.mubr.bf16.mxu1 %v4752_v10 }
  0x48   : > { %4056 = vmatpush3.bf16.msra.mxu0 %v4509_v4  ;;  %4027 = vmatprep.mubr.bf16.mxu0 %v4754_v11  ;;  %v4856_v4 = vpack.c.bf16 %v224_v62, %v223_v61  ;;  %v4932_v61 = vpack.c.bf16 %v236_v56, %v235_v55  ;;  %v4530_v62 = vld [vmem:[%s5340_s1 + $0xb8] sm:$0xff]   ;;  %v4537_v55 = vld [vmem:[%s5340_s1 + $0x1f0] sm:$0xff]   ;;  %v5005_v56 = vpack.c.bf16 %v250_v48, %v249_v47 }
  0x49   : > { %4057 = vmatprep.subr.bf16.mxu0 %v4511_v12  ;;  %v3442_v47 = vld [vmem:[%s4637_s14 + $0x91] sm:$0xff]  ;;  %v3443_v48 = vld [vmem:[%s4637_s14 + $0x99] sm:$0xff] }
  0x4c   : > { %4058 = vmatpush3.bf16.msra.mxu0 %v4511_v12  ;;  %v226_v12 = vld [vmem:[%s4637_s14 + $0x50] sm:$0xff] }
  0x4d   : > { %4059 = vmatprep.subr.bf16.mxu0 %v4513_v21 }
  0x4e   : > { %3804 = vmatmul.mubr.bf16.gmra.mrb[20].mxu1 %v4775_v22 }
  0x4f   : > { %4028 = vmatmul.mubr.bf16.gmra.mrb[4].mxu0 %v4777_v23  ;;  %3807 = vmatprep.mubr.bf16.mxu1 %v4779_v24 }
  0x50   : > { %4031 = vmatprep.mubr.bf16.mxu0 %v4781_v25  ;;  %4060 = vmatpush3.bf16.msra.mxu0 %v4513_v21  ;;  %v4880_v21 = vpack.c.bf16 %v226_v12, %v225_v6  ;;  %v239_v6 = vld [vmem:[%s4637_s14 + $0xf0] sm:$0xff]  ;;  %v240_v12 = vld [vmem:[%s4637_s14 + $0xf8] sm:$0xff] }
  0x51   : > { %4061 = vmatprep.subr.bf16.mxu0 %v4515_v27 }
  0x54   : > { %4062 = vmatpush3.bf16.msra.mxu0 %v4515_v27  ;;  %v4886_v27 = vpack.c.bf16 %v3347_v20, %v3346_v18  ;;  %v242_v18 = vld [vmem:[%s4637_s14 + $0x110] sm:$0xff]  ;;  %v244_v20 = vld [vmem:[%s4637_s14 + $0x128] sm:$0xff] }
  0x55   : > { %4063 = vmatprep.subr.bf16.mxu0 %v4517_v35 }
  0x56   : > { %3808 = vmatmul.mubr.bf16.gmra.mrb[24].mxu1 %v4801_v36 }
  0x57   : > { %4032 = vmatmul.mubr.bf16.gmra.mrb[8].mxu0 %v4803_v37  ;;  %3811 = vmatprep.mubr.bf16.mxu1 %v4805_v38 }
  0x58   : > { %4035 = vmatprep.mubr.bf16.mxu0 %v4807_v39  ;;  %4064 = vmatpush3.bf16.msra.mxu0 %v4517_v35  ;;  %v3350_v35 = vld [vmem:[%s4637_s14 + $0x16a] sm:$0xff] }
  0x59   : > { %4065 = vmatprep.subr.bf16.mxu0 %v4519_v42  ;;  %v4912_v45 = vpack.c.bf16 %v3351_v40, %v3350_v35  ;;  %v4533_v35 = vld [vmem:[%s5340_s1 + $0x1e0] sm:$0xff]   ;;  %v4987_v40 = vpack.c.bf16 %v246_v32, %v245_v31  ;;  %v3439_v32 = vld [vmem:[%s4637_s14 + $0x69] sm:$0xff] }
  0x5a   : > { %v3438_v31 = vld [vmem:[%s4637_s14 + $0x61] sm:$0xff] }
  0x5c   : > { %4066 = vmatpush3.bf16.msra.mxu0 %v4519_v42  ;;  %v4906_v42 = vpack.c.bf16 %v230_v29, %v229_v28  ;;  %v4529_v28 = vld [vmem:[%s5340_s1 + $0x1d0] sm:$0xff]   ;;  %v4969_v29 = vpack.c.bf16 %v242_v18, %v241_v17  ;;  %v3435_v18 = vld [vmem:[%s4637_s14 + $0x39] sm:$0xff] }
  0x5d   : > { %4067 = vmatprep.subr.bf16.mxu0 %v4521_v50  ;;  %v3434_v17 = vld [vmem:[%s4637_s14 + $0x31] sm:$0xff] }
  0x5e   : > { %3812 = vmatmul.mubr.bf16.gmra.mrb[28].mxu1 %v4827_v51 }
  0x5f   : > { %4036 = vmatmul.mubr.bf16.gmra.mrb[12].mxu0 %v4829_v52  ;;  %3831 = vmatprep.mubr.bf16.mxu1 %v251_v53  ;;  %v3353_v53 = vld [vmem:[%s4637_s14 + $0x18a] sm:$0xff] }
  0x60   : > { %4039 = vmatprep.mubr.bf16.mxu0 %v4831_v54  ;;  %4068 = vmatpush3.bf16.msra.mxu0 %v4521_v50  ;;  %v3352_v50 = vld [vmem:[%s4637_s14 + $0x182] sm:$0xff] }
  0x61   : > { %4069 = vmatprep.subr.bf16.mxu0 %v4523_v57  ;;  %v1732_v60 = vpack.c.bf16 %v3353_v53, %v3352_v50  ;;  %v766_v50 = vld [vmem:[%s4637_s14 + $0x2] sm:$0xff]  ;;  %v767_v53 = vld [vmem:[%s4637_s14 + $0xa] sm:$0xff] }
  0x64   : > { %4070 = vmatpush3.bf16.msra.mxu0 %v4523_v57  ;;  %v4528_v57 = vld [vmem:[%s5340_s1 + $0xb0] sm:$0xff]  }
  0x65   : > { %4103 = vmatprep.subr.bf16.mxu0 %v4850_v1 }
  0x66   : > { %3832 = vmatmul.mubr.bf16.vlgmr.msra.gmra.mrb[0].mxu1 %v4852_v2 }
  0x67   : > { %4040 = vmatmul.mubr.bf16.gmra.mrb[16].mxu0 %v4854_v3  ;;  %3864 = vmatpush3.bf16.msra.mxu1 %v4748_v8  ;;  %v4882_v8 = vpack.c.bf16 %v3345_v15, %v3344_v14  ;;  %v4949_v14 = vpack.c.bf16 %v238_v0, %v237_v63  ;;  %v4951_v15 = vpack.c.bf16 %v240_v12, %v239_v6  ;;  %v4534_v63 = vld [vmem:[%s5340_s1 + $0xc8] sm:$0xff]   ;;  %v4536_v0 = vld [vmem:[%s5340_s1 + $0xd0] sm:$0xff]   ;;  %v4540_v12 = vld [vmem:[%s5340_s1 + $0xe0] sm:$0xff]  }
  0x68   : > { %3835 = vmatprep.mubr.bf16.mxu1 %v4856_v4  ;;  %4043 = vmatprep.mubr.bf16.mxu0 %v4858_v5  ;;  %v3407_v6 = vld [vmem:[%s4637_s14 + $0x188] sm:$0xff] }
  0x69   : > { %3865 = vmatprep.subr.bf16.mxu1 %v4518_v13 }
  0x6b   : > { %3866 = vmatpush3.bf16.msra.mxu1 %v4518_v13  ;;  %v4947_v13 = vld [vmem:[%s5340_s1 + $0xc0] sm:$0xff]  }
  0x6c   : > { %3867 = vmatprep.subr.bf16.mxu1 %v4520_v19 }
  0x6e   : > { %3836 = vmatmul.mubr.bf16.gmra.mrb[4].mxu1 %v4880_v21 }
  0x6f   : > { %4044 = vmatmul.mubr.bf16.gmra.mrb[20].mxu0 %v4882_v8  ;;  %3839 = vmatprep.mubr.bf16.mxu1 %v4884_v26 }
  0x70   : > { %4047 = vmatprep.mubr.bf16.mxu0 %v4886_v27  ;;  %3868 = vmatpush3.bf16.msra.mxu1 %v4520_v19  ;;  %v243_v19 = vld [vmem:[%s4637_s14 + $0x120] sm:$0xff] }
  0x71   : > { %3869 = vmatprep.subr.bf16.mxu1 %v4522_v30 }
  0x74   : > { %3870 = vmatpush3.bf16.msra.mxu1 %v4522_v30  ;;  %v4971_v30 = vpack.c.bf16 %v244_v20, %v243_v19  ;;  %v2330_v20 = vpack.c.bf16 %v3435_v18, %v3434_v17  ;;  %v3502_v17 = vld [vmem:[%s4637_s14 + $0xc2] sm:$0xff]  ;;  %v3503_v18 = vld [vmem:[%s4637_s14 + $0xca] sm:$0xff] }
  0x75   : > { %3871 = vmatprep.subr.bf16.mxu1 %v4524_v41 }
  0x76   : > { %3840 = vmatmul.mubr.bf16.gmra.mrb[8].mxu1 %v4906_v42 }
  0x77   : > { %4048 = vmatmul.mubr.bf16.gmra.mrb[24].mxu0 %v4908_v43  ;;  %3843 = vmatprep.mubr.bf16.mxu1 %v4910_v44 }
  0x78   : > { %4051 = vmatprep.mubr.bf16.mxu0 %v4912_v45  ;;  %3872 = vmatpush3.bf16.msra.mxu1 %v4524_v41  ;;  %v4989_v41 = vpack.c.bf16 %v248_v34, %v247_v33  ;;  %v2332_v34 = vpack.c.bf16 %v3439_v32, %v3438_v31 }
  0x79   : > { %3873 = vmatprep.subr.bf16.mxu1 %v4526_v46 }
  0x7c   : > { %3874 = vmatpush3.bf16.msra.mxu1 %v4526_v46  ;;  %v4535_v46 = vld [vmem:[%s5340_s1 + $0x1e8] sm:$0xff]  }
  0x7d   : > { %3875 = vmatprep.subr.bf16.mxu1 %v4528_v57 }
  0x7e   : > { %3844 = vmatmul.mubr.bf16.gmra.mrb[12].mxu1 %v4930_v58 }
  0x7f   : > { %4052 = vmatmul.mubr.bf16.gmra.mrb[28].mxu0 %v1732_v60  ;;  %3847 = vmatprep.mubr.bf16.mxu1 %v4932_v61  ;;  %v4539_v60 = vld [vmem:[%s5340_s1 + $0x1f8] sm:$0xff]  }
  0x80   : > { %4071 = vmatprep.mubr.bf16.mxu0 %v4856_v4  ;;  %3876 = vmatpush3.bf16.msra.mxu1 %v4528_v57  ;;  %v798_v57 = vpack.c.bf16 %v767_v53, %v766_v50  ;;  %v4545_v50 = vld [vmem:[%s5340_s1 + $0x210] sm:$0xff]  }
  0x81   : > { %3877 = vmatprep.subr.bf16.mxu1 %v4530_v62 }
  0x84   : > { %3878 = vmatpush3.bf16.msra.mxu1 %v4530_v62  ;;  %v4541_v62 = vld [vmem:[%s5340_s1 + $0x200] sm:$0xff]  }
  0x85   : > { %3911 = vmatprep.subr.bf16.mxu1 %v4947_v13 }
  0x86   : > { %3848 = vmatmul.mubr.bf16.gmra.mrb[16].mxu1 %v4949_v14 }
  0x87   : > { %4072 = vmatmul.mubr.bf16.vlgmr.msra.gmra.mrb[0].mxu0 %v4880_v21  ;;  %3851 = vmatprep.mubr.bf16.mxu1 %v4951_v15 }
  0x88   : > { %4104 = vmatpush3.bf16.msra.mxu0 %v4850_v1  ;;  %4075 = vmatprep.mubr.bf16.mxu0 %v4884_v26  ;;  %v4531_v1 = vld [vmem:[%s5340_s1 + $0x1d8] sm:$0xff]  }
  0x89   : > { %4105 = vmatprep.subr.bf16.mxu0 %v4527_v16 }
  0x8c   : > { %4106 = vmatpush3.bf16.msra.mxu0 %v4527_v16  ;;  %v3409_v16 = vld [vmem:[%s4637_s14 + $0x1a0] sm:$0xff] }
  0x8d   : > { %4107 = vmatprep.subr.bf16.mxu0 %v4529_v28 }
  0x8e   : > { %3852 = vmatmul.mubr.bf16.gmra.mrb[20].mxu1 %v4969_v29 }
  0x8f   : > { %4076 = vmatmul.mubr.bf16.gmra.mrb[4].mxu0 %v4906_v42  ;;  %3855 = vmatprep.mubr.bf16.mxu1 %v4971_v30 }
  0x90   : > { %4079 = vmatprep.mubr.bf16.mxu0 %v4910_v44  ;;  %4108 = vmatpush3.bf16.msra.mxu0 %v4529_v28  ;;  %v3436_v28 = vld [vmem:[%s4637_s14 + $0x49] sm:$0xff] }
  0x91   : > { %4109 = vmatprep.subr.bf16.mxu0 %v4531_v1 }
  0x94   : > { %4110 = vmatpush3.bf16.msra.mxu0 %v4531_v1  ;;  %v3437_v1 = vld [vmem:[%s4637_s14 + $0x51] sm:$0xff] }
  0x95   : > { %4111 = vmatprep.subr.bf16.mxu0 %v4533_v35  ;;  %v2331_v33 = vpack.c.bf16 %v3437_v1, %v3436_v28  ;;  %v3506_v28 = vld [vmem:[%s4637_s14 + $0xf2] sm:$0xff]  ;;  %v3507_v1 = vld [vmem:[%s4637_s14 + $0xfa] sm:$0xff] }
  0x96   : > { %3856 = vmatmul.mubr.bf16.gmra.mrb[24].mxu1 %v4987_v40  ;;  %v2644_v32 = vpack.c.bf16 %v3507_v1, %v3506_v28 }
  0x97   : > { %4080 = vmatmul.mubr.bf16.gmra.mrb[8].mxu0 %v4930_v58  ;;  %3859 = vmatprep.mubr.bf16.mxu1 %v4989_v41 }
  0x98   : > { %4083 = vmatprep.mubr.bf16.mxu0 %v4932_v61  ;;  %4112 = vmatpush3.bf16.msra.mxu0 %v4533_v35  ;;  %v3440_v35 = vld [vmem:[%s4637_s14 + $0x79] sm:$0xff] }
  0x99   : > { %4113 = vmatprep.subr.bf16.mxu0 %v4535_v46 }
  0x9c   : > { %4114 = vmatpush3.bf16.msra.mxu0 %v4535_v46  ;;  %v3441_v46 = vld [vmem:[%s4637_s14 + $0x81] sm:$0xff] }
  0x9d   : > { %4115 = vmatprep.subr.bf16.mxu0 %v4537_v55  ;;  %v2333_v53 = vpack.c.bf16 %v3441_v46, %v3440_v35  ;;  %v3287_v35 = vld [vmem:[%s4637_s14 + $0x111] sm:$0xff]  ;;  %v3510_v46 = vld [vmem:[%s4637_s14 + $0x122] sm:$0xff] }
  0x9e   : > { %3860 = vmatmul.mubr.bf16.gmra.mrb[28].mxu1 %v5005_v56 }
  0x9f   : > { %4084 = vmatmul.mubr.bf16.gmra.mrb[12].mxu0 %v4949_v14  ;;  %3879 = vmatprep.mubr.bf16.mxu1 %v798_v57  ;;  %v3447_v57 = vld [vmem:[%s4637_s14 + $0xc9] sm:$0xff] }
  0xa0   : > { %4087 = vmatprep.mubr.bf16.mxu0 %v4951_v15  ;;  %4116 = vmatpush3.bf16.msra.mxu0 %v4537_v55  ;;  %v2334_v55 = vpack.c.bf16 %v3443_v48, %v3442_v47  ;;  %v3511_v47 = vld [vmem:[%s4637_s14 + $0x12a] sm:$0xff] }
  0xa1   : > { %4117 = vmatprep.subr.bf16.mxu0 %v4539_v60 }
  0xa4   : > { %4118 = vmatpush3.bf16.msra.mxu0 %v4539_v60  ;;  %v4548_v60 = vld [vmem:[%s5340_s1 + $0x220] sm:$0xff]  }
  0xa5   : > { %4151 = vmatprep.subr.bf16.mxu0 %v4541_v62 }
  0xa6   : > { %3880 = vmatmul.mubr.bf16.vlgmr.msra.gmra.mrb[0].mxu1 %v4722_v59  ;;  %v4538_v59 = vld [vmem:[%s5340_s1 + $0xd8] sm:$0xff]  }
  0xa7   : > { %4088 = vmatmul.mubr.bf16.gmra.mrb[16].mxu0 %v4969_v29  ;;  %3912 = vmatpush3.bf16.msra.mxu1 %v4947_v13 }
  0xa8   : > { %3883 = vmatprep.mubr.bf16.mxu1 %v4750_v9  ;;  %4091 = vmatprep.mubr.bf16.mxu0 %v4971_v30  ;;  %v3406_v9 = vld [vmem:[%s4637_s14 + $0x180] sm:$0xff] }
  0xa9   : > { %3913 = vmatprep.subr.bf16.mxu1 %v4534_v63  ;;  %v5039_v13 = vpack.c.bf16 %v3407_v6, %v3406_v9  ;;  %v3497_v6 = vld [vmem:[%s4637_s14 + $0x82] sm:$0xff] }
  0xab   : > { %3914 = vmatpush3.bf16.msra.mxu1 %v4534_v63  ;;  %v4549_v63 = vld [vmem:[%s5340_s1 + $0x228] sm:$0xff]  }
  0xac   : > { %3915 = vmatprep.subr.bf16.mxu1 %v4536_v0 }
  0xae   : > { %3884 = vmatmul.mubr.bf16.gmra.mrb[4].mxu1 %v4754_v11  ;;  %v4542_v11 = vld [vmem:[%s5340_s1 + $0xe8] sm:$0xff]  }
  0xaf   : > { %4092 = vmatmul.mubr.bf16.gmra.mrb[20].mxu0 %v4987_v40  ;;  %3887 = vmatprep.mubr.bf16.mxu1 %v4777_v23  ;;  %v3408_v23 = vld [vmem:[%s4637_s14 + $0x198] sm:$0xff] }
  0xb0   : > { %4095 = vmatprep.mubr.bf16.mxu0 %v4989_v41  ;;  %3916 = vmatpush3.bf16.msra.mxu1 %v4536_v0  ;;  %v2039_v19 = vpack.c.bf16 %v3409_v16, %v3408_v23  ;;  %v3495_v0 = vld [vmem:[%s4637_s14 + $0x6a] sm:$0xff] }
  0xb1   : > { %3917 = vmatprep.subr.bf16.mxu1 %v4538_v59 }
  0xb4   : > { %3918 = vmatpush3.bf16.msra.mxu1 %v4538_v59  ;;  %v4559_v59 = vld [vmem:[%s5340_s1 + $0x138] sm:$0xff]  }
  0xb5   : > { %3919 = vmatprep.subr.bf16.mxu1 %v4540_v12 }
  0xb6   : > { %3888 = vmatmul.mubr.bf16.gmra.mrb[8].mxu1 %v4781_v25  ;;  %v4544_v25 = vld [vmem:[%s5340_s1 + $0xf0] sm:$0xff]  }
  0xb7   : > { %4096 = vmatmul.mubr.bf16.gmra.mrb[24].mxu0 %v5005_v56  ;;  %3891 = vmatprep.mubr.bf16.mxu1 %v4803_v37  ;;  %v4546_v37 = vld [vmem:[%s5340_s1 + $0xf8] sm:$0xff]  }
  0xb8   : > { %4099 = vmatprep.mubr.bf16.mxu0 %v5039_v13  ;;  %3920 = vmatpush3.bf16.msra.mxu1 %v4540_v12  ;;  %v3498_v12 = vld [vmem:[%s4637_s14 + $0x92] sm:$0xff] }
  0xb9   : > { %3921 = vmatprep.subr.bf16.mxu1 %v4542_v11 }
  0xbc   : > { %3922 = vmatpush3.bf16.msra.mxu1 %v4542_v11  ;;  %v3499_v11 = vld [vmem:[%s4637_s14 + $0x9a] sm:$0xff] }
  0xbd   : > { %3923 = vmatprep.subr.bf16.mxu1 %v4544_v25  ;;  %v2640_v16 = vpack.c.bf16 %v3499_v11, %v3498_v12 }
  0xbe   : > { %3892 = vmatmul.mubr.bf16.gmra.mrb[12].mxu1 %v4807_v39  ;;  %v4543_v39 = vld [vmem:[%s5340_s1 + $0x208] sm:$0xff]  }
  0xbf   : > { %4100 = vmatmul.mubr.bf16.gmra.mrb[28].mxu0 %v2039_v19  ;;  %3895 = vmatprep.mubr.bf16.mxu1 %v4829_v52  ;;  %v4552_v52 = vld [vmem:[%s5340_s1 + $0x100] sm:$0xff]   ;;  %v2642_v19 = vpack.c.bf16 %v3503_v18, %v3502_v17 }
  0xc0   : > { %4119 = vmatprep.mubr.bf16.mxu0 %v2330_v20  ;;  %3924 = vmatpush3.bf16.msra.mxu1 %v4544_v25  ;;  %v3282_v20 = vld [vmem:[%s4637_s14 + $0xd9] sm:$0xff] }
  0xc1   : > { %3925 = vmatprep.subr.bf16.mxu1 %v4546_v37 }
  0xc4   : > { %3926 = vmatpush3.bf16.msra.mxu1 %v4546_v37  ;;  %v3283_v37 = vld [vmem:[%s4637_s14 + $0xe1] sm:$0xff] }
  0xc5   : > { %4199 = vmatprep.subr.bf16.mxu1 %v4552_v52 }
  0xc6   : > { %3896 = vmatmul.mubr.bf16.gmra.mrb[16].mxu1 %v4831_v54  ;;  %v4547_v54 = vld [vmem:[%s5340_s1 + $0x218] sm:$0xff]  }
  0xc7   : > { %4120 = vmatmul.mubr.bf16.vlgmr.msra.gmra.mrb[0].mxu0 %v2331_v33  ;;  %3899 = vmatprep.mubr.bf16.mxu1 %v4854_v3  ;;  %v3446_v3 = vld [vmem:[%s4637_s14 + $0xc1] sm:$0xff]  ;;  %v3285_v33 = vld [vmem:[%s4637_s14 + $0xf9] sm:$0xff] }
  0xc8   : > { %4152 = vmatpush3.bf16.msra.mxu0 %v4541_v62  ;;  %4123 = vmatprep.mubr.bf16.mxu0 %v2332_v34  ;;  %v2336_v62 = vpack.c.bf16 %v3447_v57, %v3446_v3  ;;  %v3508_v34 = vld [vmem:[%s4637_s14 + $0x10a] sm:$0xff]  ;;  %v3512_v3 = vld [vmem:[%s4637_s14 + $0x13a] sm:$0xff]  ;;  %v3513_v57 = vld [vmem:[%s4637_s14 + $0x142] sm:$0xff] }
  0xc9   : > { %4153 = vmatprep.subr.bf16.mxu0 %v4543_v39 }
  0xcc   : > { %4154 = vmatpush3.bf16.msra.mxu0 %v4543_v39  ;;  %v3509_v39 = vld [vmem:[%s4637_s14 + $0x112] sm:$0xff] }
  0xcd   : > { %4155 = vmatprep.subr.bf16.mxu0 %v4545_v50  ;;  %v2645_v48 = vpack.c.bf16 %v3509_v39, %v3508_v34 }
  0xce   : > { %3900 = vmatmul.mubr.bf16.gmra.mrb[20].mxu1 %v4858_v5  ;;  %v4550_v5 = vld [vmem:[%s5340_s1 + $0x230] sm:$0xff]  }
  0xcf   : > { %4124 = vmatmul.mubr.bf16.gmra.mrb[4].mxu0 %v2333_v53  ;;  %3903 = vmatprep.mubr.bf16.mxu1 %v4882_v8  ;;  %v4551_v8 = vld [vmem:[%s5340_s1 + $0x238] sm:$0xff]   ;;  %v2646_v53 = vpack.c.bf16 %v3511_v47, %v3510_v46 }
  0xd0   : > { %4127 = vmatprep.mubr.bf16.mxu0 %v2334_v55  ;;  %4156 = vmatpush3.bf16.msra.mxu0 %v4545_v50  ;;  %v3288_v55 = vld [vmem:[%s4637_s14 + $0x121] sm:$0xff] }
  0xd1   : > { %4157 = vmatprep.subr.bf16.mxu0 %v4547_v54 }
  0xd4   : > { %4158 = vmatpush3.bf16.msra.mxu0 %v4547_v54  ;;  %v3289_v54 = vld [vmem:[%s4637_s14 + $0x129] sm:$0xff] }
  0xd5   : > { %4159 = vmatprep.subr.bf16.mxu0 %v4548_v60 }
  0xd6   : > { %3904 = vmatmul.mubr.bf16.gmra.mrb[24].mxu1 %v4886_v27  ;;  %v4557_v27 = vld [vmem:[%s5340_s1 + $0x128] sm:$0xff]  }
  0xd7   : > { %4128 = vmatmul.mubr.bf16.gmra.mrb[8].mxu0 %v4703_v49  ;;  %3907 = vmatprep.mubr.bf16.mxu1 %v4908_v43  ;;  %v4553_v49 = vld [vmem:[%s5340_s1 + $0x108] sm:$0xff]   ;;  %v4558_v43 = vld [vmem:[%s5340_s1 + $0x130] sm:$0xff]  }
  0xd8   : > { %4131 = vmatprep.mubr.bf16.mxu0 %v2336_v62  ;;  %4160 = vmatpush3.bf16.msra.mxu0 %v4548_v60  ;;  %v3290_v60 = vld [vmem:[%s4637_s14 + $0x139] sm:$0xff]  ;;  %v3291_v62 = vld [vmem:[%s4637_s14 + $0x141] sm:$0xff] }
  0xd9   : > { %4161 = vmatprep.subr.bf16.mxu0 %v4549_v63 }
  0xdc   : > { %4162 = vmatpush3.bf16.msra.mxu0 %v4549_v63  ;;  %v3514_v63 = vld [vmem:[%s4637_s14 + $0x152] sm:$0xff] }
  0xdd   : > { %4163 = vmatprep.subr.bf16.mxu0 %v4550_v5 }
  0xde   : > { %3908 = vmatmul.mubr.bf16.gmra.mrb[28].mxu1 %v4912_v45  ;;  %v3493_v45 = vld [vmem:[%s4637_s14 + $0x52] sm:$0xff] }
  0xdf   : > { %4132 = vmatmul.mubr.bf16.gmra.mrb[12].mxu0 %v4743_v7  ;;  %3927 = vmatprep.mubr.bf16.mxu1 %v4852_v2  ;;  %v4554_v7 = vld [vmem:[%s5340_s1 + $0x110] sm:$0xff]  }
  0xe0   : > { %4135 = vmatprep.mubr.bf16.mxu0 %v4752_v10  ;;  %4164 = vmatpush3.bf16.msra.mxu0 %v4550_v5  ;;  %v3462_v10 = vld [vmem:[%s4637_s14 + $0x181] sm:$0xff] }
  0xe1   : > { %4165 = vmatprep.subr.bf16.mxu0 %v4551_v8  ;;  %v3515_v5 = vld [vmem:[%s4637_s14 + $0x15a] sm:$0xff] }
  0xe4   : > { %4166 = vmatpush3.bf16.msra.mxu0 %v4551_v8  ;;  %v1422_v8 = vpack.c.bf16 %v3289_v54, %v3288_v55 }
  0xe6   : > { %3928 = vmatmul.mubr.bf16.vlgmr.msra.gmra.mrb[0].mxu1 %v4856_v4  ;;  %v3465_v4 = vld [vmem:[%s4637_s14 + $0x1a1] sm:$0xff] }
  0xe7   : > { %4136 = vmatmul.mubr.bf16.gmra.mrb[16].mxu0 %v4775_v22  ;;  %4207 = vmatpush3.bf16.msra.mxu1 %v4552_v52  ;;  %v3463_v22 = vld [vmem:[%s4637_s14 + $0x189] sm:$0xff] }
  0xe8   : > { %3931 = vmatprep.mubr.bf16.mxu1 %v4880_v21  ;;  %4139 = vmatprep.mubr.bf16.mxu0 %v4779_v24  ;;  %v4555_v24 = vld [vmem:[%s5340_s1 + $0x118] sm:$0xff]   ;;  %v5124_v2 = vpack.c.bf16 %v3463_v22, %v3462_v10  ;;  %v3286_v52 = vld [vmem:[%s4637_s14 + $0x109] sm:$0xff]  ;;  %v2648_v10 = vpack.c.bf16 %v3515_v5, %v3514_v63 }
  0xe9   : > { %4200 = vmatprep.subr.bf16.mxu1 %v4553_v49  ;;  %v3490_v21 = vld [vmem:[%s4637_s14 + $0x32] sm:$0xff]  ;;  %v1421_v50 = vpack.c.bf16 %v3287_v35, %v3286_v52 }
  0xea   : > { %v3292_v22 = vld [vmem:[%s4637_s14 + $0x151] sm:$0xff] }
  0xeb   : > { %4208 = vmatpush3.bf16.msra.mxu1 %v4553_v49  ;;  %v2647_v49 = vpack.c.bf16 %v3513_v57, %v3512_v3 }
  0xec   : > { %4201 = vmatprep.subr.bf16.mxu1 %v4554_v7 }
  0xee   : > { %3932 = vmatmul.mubr.bf16.gmra.mrb[4].mxu1 %v4884_v26  ;;  %v3491_v26 = vld [vmem:[%s4637_s14 + $0x3a] sm:$0xff] }
  0xef   : > { %4140 = vmatmul.mubr.bf16.gmra.mrb[20].mxu0 %v4801_v36  ;;  %3935 = vmatprep.mubr.bf16.mxu1 %v4906_v42  ;;  %v4556_v36 = vld [vmem:[%s5340_s1 + $0x120] sm:$0xff]  }
  0xf0   : > { %4143 = vmatprep.mubr.bf16.mxu0 %v4805_v38  ;;  %4209 = vmatpush3.bf16.msra.mxu1 %v4554_v7  ;;  %v3464_v38 = vld [vmem:[%s4637_s14 + $0x199] sm:$0xff]  ;;  %v1423_v7 = vpack.c.bf16 %v3291_v62, %v3290_v60 }
  0xf1   : > { %4202 = vmatprep.subr.bf16.mxu1 %v4555_v24  ;;  %v2345_v42 = vpack.c.bf16 %v3465_v4, %v3464_v38  ;;  %v3517_v38 = vld [vmem:[%s4637_s14 + $0x172] sm:$0xff]  ;;  %v3294_v4 = vld [vmem:[%s4637_s14 + $0x169] sm:$0xff] }
  0xf4   : > { %4210 = vmatpush3.bf16.msra.mxu1 %v4555_v24  ;;  %v3293_v24 = vld [vmem:[%s4637_s14 + $0x159] sm:$0xff] }
  0xf5   : > { %4203 = vmatprep.subr.bf16.mxu1 %v4556_v36 }
  0xf6   : > { %3936 = vmatmul.mubr.bf16.gmra.mrb[8].mxu1 %v4910_v44  ;;  %v3492_v44 = vld [vmem:[%s4637_s14 + $0x4a] sm:$0xff] }
  0xf7   : > { %4144 = vmatmul.mubr.bf16.gmra.mrb[24].mxu0 %v4827_v51  ;;  %3939 = vmatprep.mubr.bf16.mxu1 %v4930_v58  ;;  %v2636_v51 = vpack.c.bf16 %v3491_v26, %v3490_v21  ;;  %v3494_v58 = vld [vmem:[%s4637_s14 + $0x62] sm:$0xff]  ;;  %v2637_v9 = vpack.c.bf16 %v3493_v45, %v3492_v44  ;;  %v3295_v21 = vld [vmem:[%s4637_s14 + $0x171] sm:$0xff]  ;;  %v3520_v45 = vld [vmem:[%s4637_s14 + $0x19a] sm:$0xff] }
  0xf8   : > { %4147 = vmatprep.mubr.bf16.mxu0 %v5124_v2  ;;  %4211 = vmatpush3.bf16.msra.mxu1 %v4556_v36  ;;  %v3516_v36 = vld [vmem:[%s4637_s14 + $0x16a] sm:$0xff]  ;;  %v3518_v26 = vld [vmem:[%s4637_s14 + $0x182] sm:$0xff] }
  0xf9   : > { %4204 = vmatprep.subr.bf16.mxu1 %v4557_v27 }
  0xfc   : > { %4212 = vmatpush3.bf16.msra.mxu1 %v4557_v27  ;;  %v3519_v27 = vld [vmem:[%s4637_s14 + $0x18a] sm:$0xff] }
  0xfd   : > { %4205 = vmatprep.subr.bf16.mxu1 %v4558_v43  ;;  %v2650_v44 = vpack.c.bf16 %v3519_v27, %v3518_v26 }
  0xfe   : > { %3940 = vmatmul.mubr.bf16.gmra.mrb[12].mxu1 %v4932_v61  ;;  %v2638_v61 = vpack.c.bf16 %v3495_v0, %v3494_v58  ;;  %v3521_v58 = vld [vmem:[%s4637_s14 + $0x1a2] sm:$0xff] }
  0xff   : > { %4148 = vmatmul.mubr.bf16.gmra.mrb[28].mxu0 %v2345_v42  ;;  %3943 = vmatprep.mubr.bf16.mxu1 %v4949_v14  ;;  %v3496_v14 = vld [vmem:[%s4637_s14 + $0x7a] sm:$0xff]  ;;  %v1424_v42 = vpack.c.bf16 %v3293_v24, %v3292_v22  ;;  %v2651_v0 = vpack.c.bf16 %v3521_v58, %v3520_v45 }
 0x100   : > { %4167 = vmatprep.mubr.bf16.mxu0 %v2636_v51  ;;  %4213 = vmatpush3.bf16.msra.mxu1 %v4558_v43  ;;  %v2639_v23 = vpack.c.bf16 %v3497_v6, %v3496_v14  ;;  %v2649_v51 = vpack.c.bf16 %v3517_v38, %v3516_v36  ;;  %v1425_v43 = vpack.c.bf16 %v3295_v21, %v3294_v4 }
 0x101   : > { %4206 = vmatprep.subr.bf16.mxu1 %v4559_v59 }
 0x104   : > { %4214 = vmatpush3.bf16.msra.mxu1 %v4559_v59 }
 0x106   : > { %3944 = vmatmul.mubr.bf16.gmra.mrb[16].mxu1 %v4951_v15  ;;  %v3500_v15 = vld [vmem:[%s4637_s14 + $0xaa] sm:$0xff] }
 0x107   : > { %4168 = vmatmul.mubr.bf16.vlgmr.msra.gmra.mrb[0].mxu0 %v2637_v9  ;;  %3947 = vmatprep.mubr.bf16.mxu1 %v4969_v29  ;;  %v3501_v29 = vld [vmem:[%s4637_s14 + $0xb2] sm:$0xff] }
 0x108   : > { %4171 = vmatprep.mubr.bf16.mxu0 %v2638_v61  ;;  %v2641_v25 = vpack.c.bf16 %v3501_v29, %v3500_v15 }
 0x10e   : > { %3948 = vmatmul.mubr.bf16.gmra.mrb[20].mxu1 %v4971_v30  ;;  %v3504_v30 = vld [vmem:[%s4637_s14 + $0xda] sm:$0xff] }
 0x10f   : > { %4172 = vmatmul.mubr.bf16.gmra.mrb[4].mxu0 %v2639_v23  ;;  %3951 = vmatprep.mubr.bf16.mxu1 %v4987_v40  ;;  %v3505_v40 = vld [vmem:[%s4637_s14 + $0xe2] sm:$0xff] }
 0x110   : > { %4175 = vmatprep.mubr.bf16.mxu0 %v2640_v16  ;;  %v2643_v31 = vpack.c.bf16 %v3505_v40, %v3504_v30  ;;  %v5225_v40 = vld [vmem:[%s5341_s2] ss:$0 sm:$0xff] }
 0x116   : > { %3952 = vmatmul.mubr.bf16.gmra.mrb[24].mxu1 %v4989_v41  ;;  %v1419_v41 = vpack.c.bf16 %v3283_v37, %v3282_v20 }
 0x117   : > { %4176 = vmatmul.mubr.bf16.gmra.mrb[8].mxu0 %v2641_v25  ;;  %3955 = vmatprep.mubr.bf16.mxu1 %v5005_v56  ;;  %v3284_v56 = vld [vmem:[%s4637_s14 + $0xf1] sm:$0xff]  ;;  %s3549_s14 = sshll.u32 %s5345_s16, 8 }
 0x118   : > { %4179 = vmatprep.mubr.bf16.mxu0 %v2642_v19  ;;  %s5220_s21 = scalar_lea.vmem %s5342_s3, %s3549_s14  ;;  %s5237_s25 = scalar_lea.vmem %s5343_s4, %s3549_s14 }
 0x119   : > { %v2951_v28 = vld [vmem:[%s5220_s21 + $0x10] sm:$0xff]  ;;  %v2952_v39 = vld [vmem:[%s5220_s21 + $0x18] sm:$0xff]  ;;  %v2950_v47 = vld [vmem:[%s5220_s21 + $0x8] sm:$0xff] }
 0x11a   : > { %v2955_v5 = vld [vmem:[%s5220_s21 + $0x30] sm:$0xff]  ;;  %v2956_v38 = vld [vmem:[%s5220_s21 + $0x38] sm:$0xff]  ;;  %v2954_v27 = vld [vmem:[%s5220_s21 + $0x28] sm:$0xff] }
 0x11e   : > { %3956 = vmatmul.mubr.bf16.gmra.mrb[28].mxu1 %v5039_v13  ;;  %v1420_v13 = vpack.c.bf16 %v3285_v33, %v3284_v56 }
 0x11f   : > { %4180 = vmatmul.mubr.bf16.gmra.mrb[12].mxu0 %v2643_v31  ;;  %3991 = vmatprep.mubr.bf16.mxu1 %v1419_v41 }
 0x120   : > { %4183 = vmatprep.mubr.bf16.mxu0 %v2644_v32  ;;  %v2949_v32 = vld [vmem:[%s5220_s21] sm:$0xff] }
 0x126   : > { %3992 = vmatmul.mubr.bf16.vlgmr.msra.gmra.mrb[16].mxu1 %v1420_v13 }
 0x127   : > { %4184 = vmatmul.mubr.bf16.gmra.mrb[16].mxu0 %v2645_v48  ;;  %3995 = vmatprep.mubr.bf16.mxu1 %v1421_v50 }
 0x128   : > { %4187 = vmatprep.mubr.bf16.mxu0 %v2646_v53 }
 0x12e   : > { %3996 = vmatmul.mubr.bf16.gmra.mrb[20].mxu1 %v1422_v8 }
 0x12f   : > { %4188 = vmatmul.mubr.bf16.gmra.mrb[20].mxu0 %v2647_v49  ;;  %3999 = vmatprep.mubr.bf16.mxu1 %v1423_v7 }
 0x130   : > { %4191 = vmatprep.mubr.bf16.mxu0 %v2648_v10  ;;  %v2953_v10 = vld [vmem:[%s5220_s21 + $0x20] sm:$0xff] }
 0x136   : > { %4000 = vmatmul.mubr.bf16.gmra.mrb[24].mxu1 %v1424_v42 }
 0x137   : > { %4192 = vmatmul.mubr.bf16.gmra.mrb[24].mxu0 %v2649_v51  ;;  %4003 = vmatprep.mubr.bf16.mxu1 %v1425_v43 }
 0x138   : > { %4195 = vmatprep.mubr.bf16.mxu0 %v2650_v44 }
 0x13e   : > { %4004 = vmatmul.mubr.bf16.gmra.mrb[28].mxu1 %v5124_v2 }
 0x13f   : > { %4196 = vmatmul.mubr.bf16.gmra.mrb[28].mxu0 %v2651_v0 }
 0x1b9   : > { %v3929_v59 = vpop.f32.mrb[0].mxu1 }
 0x1ba   : > { %v1220_v9 = vpop.f32.mrb[1].mxu1 }
 0x1bb   : > { %v3930_v61 = vpop.f32.mrb[2].mxu1 }
 0x1bc   : > { %v1223_v14 = vpop.f32.mrb[3].mxu1 }
 0x1c1   : > { %v3933_v6 = vpop.f32.mrb[4].mxu1 }
 0x1c2   : > { %v1236_v12 = vpop.f32.mrb[5].mxu1 }
 0x1c3   : > { %v3934_v11 = vpop.f32.mrb[6].mxu1 }
 0x1c4   : > { %v1239_v23 = vpop.f32.mrb[7].mxu1 }
 0x1c9   : > { %v5200_v16 = vpop.f32.mrb[8].mxu1 }
 0x1ca   : > { %v5202_v15 = vpop.f32.mrb[9].mxu1 }
 0x1cb   : > { %v5204_v29 = vpop.f32.mrb[10].mxu1 }
 0x1cc   : > { %v5206_v17 = vpop.f32.mrb[11].mxu1 }
 0x1d1   : > { %v5208_v18 = vpop.f32.mrb[12].mxu1 }
 0x1d2   : > { %v5210_v2 = vpop.f32.mrb[13].mxu1 }
 0x1d3   : > { %v5212_v25 = vpop.f32.mrb[14].mxu1 }
 0x1d4   : > { %v5214_v19 = vpop.f32.mrb[15].mxu1 }
 0x1da   : > { %v4169_v30 = vpop.f32.mrb[0].mxu0 }
 0x1db   : > { %v4215_v20 = vadd.f32 %v4169_v30, %v3929_v59  ;;  %v2751_v37 = vpop.f32.mrb[1].mxu0  ;;  %v2957_v30 = vld [vmem:[%s5220_s21 + $0x40] sm:$0xff] }
 0x1dc   : > { %v4216_v1 = vadd.f32 %v2751_v37, %v1220_v9  ;;  %v4170_v31 = vpop.f32.mrb[2].mxu0 }
 0x1dd   : > { %v2919_v41 = vadd.f32 %v4215_v20, %v5225_v40  ;;  %v4217_v56 = vadd.f32 %v4170_v31, %v3930_v61  ;;  %v2754_v33 = vpop.f32.mrb[3].mxu0 }
 0x1de   : > { %v2917_v34 = vadd.f32 %v4216_v1, %v5225_v40  ;;  %v4218_v52 = vadd.f32 %v2754_v33, %v1223_v14 }
 0x1df   : > { %v2983_v35 = vadd.f32 %v2951_v28, %v2919_v41  ;;  %v2920_v46 = vadd.f32 %v4217_v56, %v5225_v40  ;;  %v2958_v41 = vld [vmem:[%s5220_s21 + $0x48] sm:$0xff] }
 0x1e0   : > { %v2981_v13 = vadd.f32 %v2949_v32, %v2917_v34  ;;  %v2918_v48 = vadd.f32 %v4218_v52, %v5225_v40 }
 0x1e1   : > { %v3015_v50 = vmax.f32 %v2983_v35, 0.0  ;;  %v2984_v53 = vadd.f32 %v2952_v39, %v2920_v46 }
 0x1e2   : > { %v3013_v55 = vmax.f32 %v2981_v13, 0.0  ;;  %v2982_v54 = vadd.f32 %v2950_v47, %v2918_v48  ;;  %v4173_v3 = vpop.f32.mrb[4].mxu0  ;;  %v2963_v13 = vld [vmem:[%s5220_s21 + $0x70] sm:$0xff] }
 0x1e3   : > { %3047 = vst [vmem:[%s5237_s25 + $0x10] sm:$0xff] %v3015_v50  ;;  %v3016_v57 = vmax.f32 %v2984_v53, 0.0  ;;  %v4219_v60 = vadd.f32 %v4173_v3, %v3933_v6  ;;  %v2767_v62 = vpop.f32.mrb[5].mxu0  ;;  %v2959_v6 = vld [vmem:[%s5220_s21 + $0x50] sm:$0xff] }
 0x1e4   : > { %3045 = vst [vmem:[%s5237_s25] sm:$0xff] %v3013_v55  ;;  %v3014_v63 = vmax.f32 %v2982_v54, 0.0  ;;  %v4220_v8 = vadd.f32 %v2767_v62, %v1236_v12  ;;  %v4174_v49 = vpop.f32.mrb[6].mxu0  ;;  %v2961_v55 = vld [vmem:[%s5220_s21 + $0x60] sm:$0xff] }
 0x1e5   : > { %3048 = vst [vmem:[%s5237_s25 + $0x18] sm:$0xff] %v3016_v57  ;;  %v2923_v7 = vadd.f32 %v4219_v60, %v5225_v40  ;;  %v4221_v22 = vadd.f32 %v4174_v49, %v3934_v11  ;;  %v2770_v24 = vpop.f32.mrb[7].mxu0 }
 0x1e6   : > { %3046 = vst [vmem:[%s5237_s25 + $0x8] sm:$0xff] %v3014_v63  ;;  %v2921_v36 = vadd.f32 %v4220_v8, %v5225_v40  ;;  %v4222_v4 = vadd.f32 %v2770_v24, %v1239_v23 }
 0x1e7   : > { %v2987_v21 = vadd.f32 %v2955_v5, %v2923_v7  ;;  %v2924_v26 = vadd.f32 %v4221_v22, %v5225_v40 }
 0x1e8   : > { %v2985_v42 = vadd.f32 %v2953_v10, %v2921_v36  ;;  %v2922_v51 = vadd.f32 %v4222_v4, %v5225_v40 }
 0x1e9   : > { %v3019_v43 = vmax.f32 %v2987_v21, 0.0  ;;  %v2988_v44 = vadd.f32 %v2956_v38, %v2924_v26 }
 0x1ea   : > { %v3017_v45 = vmax.f32 %v2985_v42, 0.0  ;;  %v2986_v58 = vadd.f32 %v2954_v27, %v2922_v51  ;;  %v4177_v0 = vpop.f32.mrb[8].mxu0  ;;  %v2967_v27 = vld [vmem:[%s5220_s21 + $0x90] sm:$0xff] }
 0x1eb   : > { %3051 = vst [vmem:[%s5237_s25 + $0x30] sm:$0xff] %v3019_v43  ;;  %v3020_v59 = vmax.f32 %v2988_v44, 0.0  ;;  %v4223_v9 = vadd.f32 %v4177_v0, %v5200_v16  ;;  %v2783_v61 = vpop.f32.mrb[9].mxu0  ;;  %v2960_v16 = vld [vmem:[%s5220_s21 + $0x58] sm:$0xff] }
 0x1ec   : > { %3049 = vst [vmem:[%s5237_s25 + $0x20] sm:$0xff] %v3017_v45  ;;  %v3018_v14 = vmax.f32 %v2986_v58, 0.0  ;;  %v4224_v12 = vadd.f32 %v2783_v61, %v5202_v15  ;;  %v4178_v11 = vpop.f32.mrb[10].mxu0  ;;  %v2965_v45 = vld [vmem:[%s5220_s21 + $0x80] sm:$0xff] }
 0x1ed   : > { %3052 = vst [vmem:[%s5237_s25 + $0x38] sm:$0xff] %v3020_v59  ;;  %v2927_v23 = vadd.f32 %v4223_v9, %v5225_v40  ;;  %v4225_v20 = vadd.f32 %v4178_v11, %v5204_v29  ;;  %v2786_v37 = vpop.f32.mrb[11].mxu0  ;;  %v2968_v9 = vld [vmem:[%s5220_s21 + $0x98] sm:$0xff] }
 0x1ee   : > { %3050 = vst [vmem:[%s5237_s25 + $0x28] sm:$0xff] %v3018_v14  ;;  %v2925_v28 = vadd.f32 %v4224_v12, %v5225_v40  ;;  %v4226_v1 = vadd.f32 %v2786_v37, %v5206_v17  ;;  %v2966_v12 = vld [vmem:[%s5220_s21 + $0x88] sm:$0xff] }
 0x1ef   : > { %v2991_v31 = vadd.f32 %v2959_v6, %v2927_v23  ;;  %v2928_v15 = vadd.f32 %v4225_v20, %v5225_v40 }
 0x1f0   : > { %v2989_v32 = vadd.f32 %v2957_v30, %v2925_v28  ;;  %v2926_v56 = vadd.f32 %v4226_v1, %v5225_v40 }
 0x1f1   : > { %v3023_v33 = vmax.f32 %v2991_v31, 0.0  ;;  %v2992_v29 = vadd.f32 %v2960_v16, %v2928_v15 }
 0x1f2   : > { %v3021_v34 = vmax.f32 %v2989_v32, 0.0  ;;  %v2990_v39 = vadd.f32 %v2958_v41, %v2926_v56  ;;  %v4181_v52 = vpop.f32.mrb[12].mxu0 }
 0x1f3   : > { %3055 = vst [vmem:[%s5237_s25 + $0x50] sm:$0xff] %v3023_v33  ;;  %v3024_v35 = vmax.f32 %v2992_v29, 0.0  ;;  %v4227_v17 = vadd.f32 %v4181_v52, %v5208_v18  ;;  %v2799_v46 = vpop.f32.mrb[13].mxu0  ;;  %v2964_v18 = vld [vmem:[%s5220_s21 + $0x78] sm:$0xff]  ;;  %v2971_v29 = vld [vmem:[%s5220_s21 + $0xb0] sm:$0xff] }
 0x1f4   : > { %3053 = vst [vmem:[%s5237_s25 + $0x40] sm:$0xff] %v3021_v34  ;;  %v3022_v47 = vmax.f32 %v2990_v39, 0.0  ;;  %v4228_v48 = vadd.f32 %v2799_v46, %v5210_v2  ;;  %v4182_v50 = vpop.f32.mrb[14].mxu0  ;;  %v2962_v2 = vld [vmem:[%s5220_s21 + $0x68] sm:$0xff] }
 0x1f5   : > { %3056 = vst [vmem:[%s5237_s25 + $0x58] sm:$0xff] %v3024_v35  ;;  %v2931_v53 = vadd.f32 %v4227_v17, %v5225_v40  ;;  %v4229_v54 = vadd.f32 %v4182_v50, %v5212_v25  ;;  %v2802_v3 = vpop.f32.mrb[15].mxu0  ;;  %v2969_v17 = vld [vmem:[%s5220_s21 + $0xa0] sm:$0xff] }
 0x1f6   : > { %3054 = vst [vmem:[%s5237_s25 + $0x48] sm:$0xff] %v3022_v47  ;;  %v2929_v57 = vadd.f32 %v4228_v48, %v5225_v40  ;;  %v4230_v60 = vadd.f32 %v2802_v3, %v5214_v19  ;;  %v2972_v48 = vld [vmem:[%s5220_s21 + $0xb8] sm:$0xff] }
 0x1f7   : > { %v2995_v62 = vadd.f32 %v2963_v13, %v2931_v53  ;;  %v2932_v63 = vadd.f32 %v4229_v54, %v5225_v40  ;;  %v2970_v54 = vld [vmem:[%s5220_s21 + $0xa8] sm:$0xff] }
 0x1f8   : > { %v2993_v5 = vadd.f32 %v2961_v55, %v2929_v57  ;;  %v2930_v8 = vadd.f32 %v4230_v60, %v5225_v40 }
 0x1f9   : > { %v3027_v49 = vmax.f32 %v2995_v62, 0.0  ;;  %v2996_v7 = vadd.f32 %v2964_v18, %v2932_v63  ;;  %v3993_v25 = vpop.f32.mrb[16].mxu1 }
 0x1fa   : > { %v3025_v10 = vmax.f32 %v2993_v5, 0.0  ;;  %v2994_v22 = vadd.f32 %v2962_v2, %v2930_v8  ;;  %v4185_v24 = vpop.f32.mrb[16].mxu0  ;;  %v1590_v36 = vpop.f32.mrb[17].mxu1 }
 0x1fb   : > { %3059 = vst [vmem:[%s5237_s25 + $0x70] sm:$0xff] %v3027_v49  ;;  %v3028_v19 = vmax.f32 %v2996_v7, 0.0  ;;  %v4231_v38 = vadd.f32 %v4185_v24, %v3993_v25  ;;  %v2815_v4 = vpop.f32.mrb[17].mxu0  ;;  %v3994_v21 = vpop.f32.mrb[18].mxu1  ;;  %v2975_v24 = vld [vmem:[%s5220_s21 + $0xd0] sm:$0xff] }
 0x1fc   : > { %3057 = vst [vmem:[%s5237_s25 + $0x60] sm:$0xff] %v3025_v10  ;;  %v3026_v26 = vmax.f32 %v2994_v22, 0.0  ;;  %v4232_v42 = vadd.f32 %v2815_v4, %v1590_v36  ;;  %v4186_v51 = vpop.f32.mrb[18].mxu0  ;;  %v1593_v43 = vpop.f32.mrb[19].mxu1 }
 0x1fd   : > { %3060 = vst [vmem:[%s5237_s25 + $0x78] sm:$0xff] %v3028_v19  ;;  %v2935_v44 = vadd.f32 %v4231_v38, %v5225_v40  ;;  %v4233_v58 = vadd.f32 %v4186_v51, %v3994_v21  ;;  %v2818_v0 = vpop.f32.mrb[19].mxu0  ;;  %v2973_v21 = vld [vmem:[%s5220_s21 + $0xc0] sm:$0xff]  ;;  %v2976_v51 = vld [vmem:[%s5220_s21 + $0xd8] sm:$0xff] }
 0x1fe   : > { %3058 = vst [vmem:[%s5237_s25 + $0x68] sm:$0xff] %v3026_v26  ;;  %v2933_v59 = vadd.f32 %v4232_v42, %v5225_v40  ;;  %v4234_v61 = vadd.f32 %v2818_v0, %v1593_v43 }
 0x1ff   : > { %v2999_v14 = vadd.f32 %v2967_v27, %v2935_v44  ;;  %v2936_v6 = vadd.f32 %v4233_v58, %v5225_v40  ;;  %v2974_v58 = vld [vmem:[%s5220_s21 + $0xc8] sm:$0xff] }
 0x200   : > { %v2997_v11 = vadd.f32 %v2965_v45, %v2933_v59  ;;  %v2934_v23 = vadd.f32 %v4234_v61, %v5225_v40 }
 0x201   : > { %v3031_v30 = vmax.f32 %v2999_v14, 0.0  ;;  %v3000_v20 = vadd.f32 %v2968_v9, %v2936_v6  ;;  %v3997_v37 = vpop.f32.mrb[20].mxu1 }
 0x202   : > { %v3029_v28 = vmax.f32 %v2997_v11, 0.0  ;;  %v2998_v16 = vadd.f32 %v2966_v12, %v2934_v23  ;;  %v4189_v1 = vpop.f32.mrb[20].mxu0  ;;  %v1606_v31 = vpop.f32.mrb[21].mxu1 }
 0x203   : > { %3063 = vst [vmem:[%s5237_s25 + $0x90] sm:$0xff] %v3031_v30  ;;  %v3032_v15 = vmax.f32 %v3000_v20, 0.0  ;;  %v4235_v41 = vadd.f32 %v4189_v1, %v3997_v37  ;;  %v2831_v32 = vpop.f32.mrb[21].mxu0  ;;  %v3998_v56 = vpop.f32.mrb[22].mxu1  ;;  %v2979_v1 = vld [vmem:[%s5220_s21 + $0xf0] sm:$0xff] }
 0x204   : > { %3061 = vst [vmem:[%s5237_s25 + $0x80] sm:$0xff] %v3029_v28  ;;  %v3030_v33 = vmax.f32 %v2998_v16, 0.0  ;;  %v4236_v34 = vadd.f32 %v2831_v32, %v1606_v31  ;;  %v4190_v39 = vpop.f32.mrb[22].mxu0  ;;  %v1609_v52 = vpop.f32.mrb[23].mxu1 }
 0x205   : > { %3064 = vst [vmem:[%s5237_s25 + $0x98] sm:$0xff] %v3032_v15  ;;  %v2939_v35 = vadd.f32 %v4235_v41, %v5225_v40  ;;  %v4237_v46 = vadd.f32 %v4190_v39, %v3998_v56  ;;  %v2834_v47 = vpop.f32.mrb[23].mxu0  ;;  %v2977_v56 = vld [vmem:[%s5220_s21 + $0xe0] sm:$0xff]  ;;  %v2980_v39 = vld [vmem:[%s5220_s21 + $0xf8] sm:$0xff] }
 0x206   : > { %3062 = vst [vmem:[%s5237_s25 + $0x88] sm:$0xff] %v3030_v33  ;;  %v2937_v13 = vadd.f32 %v4236_v34, %v5225_v40  ;;  %v4238_v50 = vadd.f32 %v2834_v47, %v1609_v52 }
 0x207   : > { %v3003_v53 = vadd.f32 %v2971_v29, %v2939_v35  ;;  %v2940_v55 = vadd.f32 %v4237_v46, %v5225_v40  ;;  %v2978_v46 = vld [vmem:[%s5220_s21 + $0xe8] sm:$0xff] }
 0x208   : > { %v3001_v3 = vadd.f32 %v2969_v17, %v2937_v13  ;;  %v2938_v57 = vadd.f32 %v4238_v50, %v5225_v40 }
 0x209   : > { %v3035_v18 = vmax.f32 %v3003_v53, 0.0  ;;  %v3004_v60 = vadd.f32 %v2972_v48, %v2940_v55  ;;  %v4001_v62 = vpop.f32.mrb[24].mxu1 }
 0x20a   : > { %v3033_v63 = vmax.f32 %v3001_v3, 0.0  ;;  %v3002_v2 = vadd.f32 %v2970_v54, %v2938_v57  ;;  %v4193_v5 = vpop.f32.mrb[24].mxu0  ;;  %v1622_v8 = vpop.f32.mrb[25].mxu1 }
 0x20b   : > { %3067 = vst [vmem:[%s5237_s25 + $0xb0] sm:$0xff] %v3035_v18  ;;  %v3036_v49 = vmax.f32 %v3004_v60, 0.0  ;;  %v4239_v7 = vadd.f32 %v4193_v5, %v4001_v62  ;;  %v2847_v25 = vpop.f32.mrb[25].mxu0  ;;  %v4002_v10 = vpop.f32.mrb[26].mxu1 }
 0x20c   : > { %3065 = vst [vmem:[%s5237_s25 + $0xa0] sm:$0xff] %v3033_v63  ;;  %v3034_v22 = vmax.f32 %v3002_v2, 0.0  ;;  %v4240_v36 = vadd.f32 %v2847_v25, %v1622_v8  ;;  %v4194_v19 = vpop.f32.mrb[26].mxu0  ;;  %v1625_v38 = vpop.f32.mrb[27].mxu1 }
 0x20d   : > { %3068 = vst [vmem:[%s5237_s25 + $0xb8] sm:$0xff] %v3036_v49  ;;  %v2943_v4 = vadd.f32 %v4239_v7, %v5225_v40  ;;  %v4241_v26 = vadd.f32 %v4194_v19, %v4002_v10  ;;  %v2850_v27 = vpop.f32.mrb[27].mxu0 }
 0x20e   : > { %3066 = vst [vmem:[%s5237_s25 + $0xa8] sm:$0xff] %v3034_v22  ;;  %v2941_v42 = vadd.f32 %v4240_v36, %v5225_v40  ;;  %v4242_v43 = vadd.f32 %v2850_v27, %v1625_v38 }
 0x20f   : > { %v3007_v44 = vadd.f32 %v2975_v24, %v2943_v4  ;;  %v2944_v45 = vadd.f32 %v4241_v26, %v5225_v40 }
 0x210   : > { %v3005_v0 = vadd.f32 %v2973_v21, %v2941_v42  ;;  %v2942_v59 = vadd.f32 %v4242_v43, %v5225_v40 }
 0x211   : > { %v3039_v9 = vmax.f32 %v3007_v44, 0.0  ;;  %v3008_v61 = vadd.f32 %v2976_v51, %v2944_v45  ;;  %v4005_v14 = vpop.f32.mrb[28].mxu1 }
 0x212   : > { %v3037_v6 = vmax.f32 %v3005_v0, 0.0  ;;  %v3006_v12 = vadd.f32 %v2974_v58, %v2942_v59  ;;  %v4197_v11 = vpop.f32.mrb[28].mxu0  ;;  %v1638_v23 = vpop.f32.mrb[29].mxu1 }
 0x213   : > { %3071 = vst [vmem:[%s5237_s25 + $0xd0] sm:$0xff] %v3039_v9  ;;  %v3040_v30 = vmax.f32 %v3008_v61, 0.0  ;;  %v4243_v20 = vadd.f32 %v4197_v11, %v4005_v14  ;;  %v2863_v37 = vpop.f32.mrb[29].mxu0  ;;  %v4006_v28 = vpop.f32.mrb[30].mxu1 }
 0x214   : > { %3069 = vst [vmem:[%s5237_s25 + $0xc0] sm:$0xff] %v3037_v6  ;;  %v3038_v16 = vmax.f32 %v3006_v12, 0.0  ;;  %v4244_v31 = vadd.f32 %v2863_v37, %v1638_v23  ;;  %v4198_v15 = vpop.f32.mrb[30].mxu0  ;;  %v1641_v41 = vpop.f32.mrb[31].mxu1 }
 0x215   : > { %3072 = vst [vmem:[%s5237_s25 + $0xd8] sm:$0xff] %v3040_v30  ;;  %v2947_v32 = vadd.f32 %v4243_v20, %v5225_v40  ;;  %v4245_v33 = vadd.f32 %v4198_v15, %v4006_v28  ;;  %v2866_v29 = vpop.f32.mrb[31].mxu0 }
 0x216   : > { %3070 = vst [vmem:[%s5237_s25 + $0xc8] sm:$0xff] %v3038_v16  ;;  %v2945_v34 = vadd.f32 %v4244_v31, %v5225_v40  ;;  %v4246_v52 = vadd.f32 %v2866_v29, %v1641_v41 }
 0x217   : > { %v3011_v35 = vadd.f32 %v2979_v1, %v2947_v32  ;;  %v2948_v17 = vadd.f32 %v4245_v33, %v5225_v40 }
 0x218   : > { %v3009_v47 = vadd.f32 %v2977_v56, %v2945_v34  ;;  %v2946_v13 = vadd.f32 %v4246_v52, %v5225_v40 }
 0x219   : > { %v3043_v48 = vmax.f32 %v3011_v35, 0.0  ;;  %v3012_v50 = vadd.f32 %v2980_v39, %v2948_v17 }
 0x21a   : > { %v3041_v53 = vmax.f32 %v3009_v47, 0.0  ;;  %v3010_v55 = vadd.f32 %v2978_v46, %v2946_v13 }
 0x21b   : > { %3075 = vst [vmem:[%s5237_s25 + $0xf0] sm:$0xff] %v3043_v48  ;;  %v3044_v54 = vmax.f32 %v3012_v50, 0.0 }
 0x21c   : > { %3073 = vst [vmem:[%s5237_s25 + $0xe0] sm:$0xff] %v3041_v53  ;;  %v3042_v3 = vmax.f32 %v3010_v55, 0.0 }
 0x21d   : > { %3076 = vst [vmem:[%s5237_s25 + $0xf8] sm:$0xff] %v3044_v54 }
 0x21e   : > { %3074 = vst [vmem:[%s5237_s25 + $0xe8] sm:$0xff] %v3042_v3 }
 0x21f PF: > { %s14_s15 = sadd.s32 1, %s4566_s15  }
 0x220   : > { %p11_p4 = scmp.ge.s32.totalorder %s14_s15, 6  }
 0x222   :  { %13 = sbr.rel (!%p11_p4) target bundleno = 1 (0x1), region = 79 }

</bundles_post_ra>
